<compile_context>
chip_gen: v7x
topology: tpu7x:2x2x1
jax: 0.10.0
libtpu: 0.0.40
codegen_flags: <defaults>
</compile_context>

<pallas_src>
import jax
import jax.numpy as jnp
from jax.experimental import pallas as pl
from jax.experimental.pallas import tpu as pltpu

D_INPUT = 2
D_MODEL = 64
NHEAD = 2
NUM_BINS = 32
DIM_FF = 2048          # nn.TransformerEncoderLayer default dim_feedforward
LN_EPS = 1e-5

HEAD_OUT = NUM_BINS + D_INPUT      # 34 real columns
HEAD_PAD = 128                     # lane-dense padded head output width

PARAM_ORDER = [
    "embed_w", "embed_b",
    "attn_w", "attn_b",
    "norm1_w", "norm1_b",
    "linear1_w", "linear1_b", "linear2_w", "linear2_b",
    "norm2_w", "norm2_b",
    "norm_w", "norm_b",
    "head_w", "head_b",
]


def _round_up(x, m):
    return ((x + m - 1) // m) * m


def _layernorm(x, w, b):
    # Single-pass statistics: mean and E[x^2] from one set of lane reductions.
    s = jnp.sum(x, axis=-1, keepdims=True)
    sq = jnp.sum(x * x, axis=-1, keepdims=True)
    inv_d = 1.0 / D_MODEL
    mu = s * inv_d
    var = sq * inv_d - mu * mu          # biased variance (matches PyTorch LayerNorm)
    return (x - mu) * jax.lax.rsqrt(var + LN_EPS) * w + b


# --------------------------------------------------------------------------- #
# Kernel
# --------------------------------------------------------------------------- #
def transformer_kernel(x_ref,
                       ew_ref, eb_ref,
                       aw_ref, ab_ref,
                       n1w_ref, n1b_ref,
                       l1w_ref, l1b_ref, l2w_ref, l2b_ref,
                       n2w_ref, n2b_ref,
                       nw_ref, nb_ref,
                       hw_ref, hb_ref,
                       out_ref):
    x = x_ref[...]                                           # (tb, D_INPUT) f32

    # embed: Linear(2 -> 64) as two VPU FMAs (avoids a degenerate K=2 MXU push)
    ew = ew_ref[...]                                         # (2, 64)
    h = (x[:, 0:1] * ew[0:1, :] + x[:, 1:2] * ew[1:2, :]) + eb_ref[...]

    # fused self-attention (seq_len == 1): one 64x64 affine
    attn = jnp.dot(h, aw_ref[...], preferred_element_type=jnp.float32) + ab_ref[...]

    # post-norm residual 1
    h = _layernorm(h + attn, n1w_ref[...], n1b_ref[...])

    # feed-forward: Linear(64 -> 2048) -> ReLU -> Linear(2048 -> 64)
    # bf16 operands through the MXU, f32 accumulation, biases/LN kept in f32.
    ff = jnp.dot(h.astype(jnp.bfloat16), l1w_ref[...],
                 preferred_element_type=jnp.float32) + l1b_ref[...]
    ff = jnp.maximum(ff, 0.0)
    ff = jnp.dot(ff.astype(jnp.bfloat16), l2w_ref[...],
                 preferred_element_type=jnp.float32) + l2b_ref[...]

    # post-norm residual 2
    h = _layernorm(h + ff, n2w_ref[...], n2b_ref[...])

    # final model-level LayerNorm (self.norm)
    h = _layernorm(h, nw_ref[...], nb_ref[...])

    # fused heads: one (64 -> 128) matmul into a lane-dense output slab
    out_ref[...] = jnp.dot(h, hw_ref[...], preferred_element_type=jnp.float32) + hb_ref[...]


# --------------------------------------------------------------------------- #
# Host-side param fusion (attention collapse, bf16 FF weights, padded head)
# --------------------------------------------------------------------------- #
def fuse_params(p):
    wv = p["in_proj_w"][:, 2 * D_MODEL:]                     # (64, 64) V projection
    bv = p["in_proj_b"][:, 2 * D_MODEL:]                     # (1, 64)
    attn_w = wv @ p["out_proj_w"]                            # (64, 64)
    attn_b = bv @ p["out_proj_w"] + p["out_proj_b"]          # (1, 64)

    head_w = jnp.zeros((D_MODEL, HEAD_PAD), jnp.float32)
    head_w = head_w.at[:, :NUM_BINS].set(p["cls_w"])
    head_w = head_w.at[:, NUM_BINS:HEAD_OUT].set(p["reg_w"])
    head_b = jnp.zeros((1, HEAD_PAD), jnp.float32)
    head_b = head_b.at[:, :NUM_BINS].set(p["cls_b"])
    head_b = head_b.at[:, NUM_BINS:HEAD_OUT].set(p["reg_b"])

    return {
        "embed_w": p["embed_w"], "embed_b": p["embed_b"],
        "attn_w": attn_w, "attn_b": attn_b,
        "norm1_w": p["norm1_w"], "norm1_b": p["norm1_b"],
        "linear1_w": p["linear1_w"].astype(jnp.bfloat16), "linear1_b": p["linear1_b"],
        "linear2_w": p["linear2_w"].astype(jnp.bfloat16), "linear2_b": p["linear2_b"],
        "norm2_w": p["norm2_w"], "norm2_b": p["norm2_b"],
        "norm_w": p["norm_w"], "norm_b": p["norm_b"],
        "head_w": head_w, "head_b": head_b,
    }


# --------------------------------------------------------------------------- #
# Wrapper
# --------------------------------------------------------------------------- #
def transformer_forward(x, params, tb=256):
    """x: (B, D_INPUT) f32, params: raw (unfused) param dict."""
    B = x.shape[0]
    x = x.astype(jnp.float32)

    # Clamp the batch tile to the (8-rounded) batch and keep it a multiple of 8.
    tb = min(tb, _round_up(B, 8))
    tb = _round_up(max(tb, 8), 8)
    Bp = _round_up(B, tb)
    if Bp != B:
        x = jnp.pad(x, ((0, Bp - B), (0, 0)))

    fused = fuse_params(params)
    ordered = [fused[k] for k in PARAM_ORDER]

    in_specs = [pl.BlockSpec((tb, D_INPUT), lambda i: (i, 0))]
    in_specs += [pl.BlockSpec(p.shape, lambda i: (0, 0)) for p in ordered]
    out_specs = pl.BlockSpec((tb, HEAD_PAD), lambda i: (i, 0))

    num_steps = Bp // tb

    # VMEM budgeting: raise the scoped limit if the tile footprint demands it.
    weight_bytes = sum(int(p.size) * p.dtype.itemsize for p in ordered)
    act_bytes = tb * DIM_FF * (4 + 2) + 8 * tb * D_MODEL * 4      # FF intermediate + temps
    io_bytes = 2 * (tb * D_INPUT * 4 + tb * HEAD_PAD * 4)         # double-buffered I/O
    est = 2 * weight_bytes + act_bytes + io_bytes
    vmem_limit = int(min(max(2 * est, 32 * 1024 * 1024), 60 * 1024 * 1024))

    flops_per_row = 2 * (2 * D_MODEL + D_MODEL * D_MODEL
                         + 2 * D_MODEL * DIM_FF + D_MODEL * HEAD_PAD)
    cost = pl.CostEstimate(
        flops=int(Bp * flops_per_row),
        transcendentals=int(3 * Bp),
        bytes_accessed=int(Bp * (D_INPUT + HEAD_PAD) * 4 + num_steps * weight_bytes),
    )

    out = pl.pallas_call(
        transformer_kernel,
        out_shape=jax.ShapeDtypeStruct((Bp, HEAD_PAD), jnp.float32),
        grid=(num_steps,),
        in_specs=in_specs,
        out_specs=out_specs,
        compiler_params=pltpu.CompilerParams(
            dimension_semantics=("parallel",),
            vmem_limit_bytes=vmem_limit,
        ),
        cost_estimate=cost,
    )(x, *ordered)

    cls_out = out[:B, :NUM_BINS]
    reg_out = out[:B, NUM_BINS:HEAD_OUT]
    return cls_out, reg_out


# --------------------------------------------------------------------------- #
# References
# --------------------------------------------------------------------------- #
def reference_forward(x, fp):
    """Pure-JAX reference mirroring the kernel math exactly (fused params, bf16 FF)."""
    ew = fp["embed_w"]
    h = x[:, 0:1] * ew[0:1, :] + x[:, 1:2] * ew[1:2, :] + fp["embed_b"]
    attn = h @ fp["attn_w"] + fp["attn_b"]
    h = _layernorm(h + attn, fp["norm1_w"], fp["norm1_b"])
    ff = jnp.dot(h.astype(jnp.bfloat16), fp["linear1_w"],
                 preferred_element_type=jnp.float32) + fp["linear1_b"]
    ff = jnp.maximum(ff, 0.0)
    ff = jnp.dot(ff.astype(jnp.bfloat16), fp["linear2_w"],
                 preferred_element_type=jnp.float32) + fp["linear2_b"]
    h = _layernorm(h + ff, fp["norm2_w"], fp["norm2_b"])
    h = _layernorm(h, fp["norm_w"], fp["norm_b"])
    out = h @ fp["head_w"] + fp["head_b"]
    return out[:, :NUM_BINS], out[:, NUM_BINS:HEAD_OUT]


def reference_forward_f32(x, p):
    """Full-f32, unfused semantics of the original PyTorch module (sanity check)."""
    h = x @ p["embed_w"] + p["embed_b"]
    v = h @ p["in_proj_w"][:, 2 * D_MODEL:] + p["in_proj_b"][:, 2 * D_MODEL:]
    attn = v @ p["out_proj_w"] + p["out_proj_b"]
    h = _layernorm(h + attn, p["norm1_w"], p["norm1_b"])
    ff = jnp.maximum(h @ p["linear1_w"] + p["linear1_b"], 0.0)
    ff = ff @ p["linear2_w"] + p["linear2_b"]
    h = _layernorm(h + ff, p["norm2_w"], p["norm2_b"])
    h = _layernorm(h, p["norm_w"], p["norm_b"])
    return h @ p["cls_w"] + p["cls_b"], h @ p["reg_w"] + p["reg_b"]


# --------------------------------------------------------------------------- #
# Params & self-test
# --------------------------------------------------------------------------- #
def init_params(key):
    ks = jax.random.split(key, 12)

    def w(k, fan_in, fan_out, scale=0.05):
        return jax.random.normal(k, (fan_in, fan_out), jnp.float32) * scale

    def b(k, fan_out, scale=0.02):
        return jax.random.normal(k, (1, fan_out), jnp.float32) * scale

    ones = lambda n: jnp.ones((1, n), jnp.float32)
    zeros = lambda n: jnp.zeros((1, n), jnp.float32)

    return {
        "embed_w": w(ks[0], D_INPUT, D_MODEL),       "embed_b": b(ks[1], D_MODEL),
        "in_proj_w": w(ks[2], D_MODEL, 3 * D_MODEL), "in_proj_b": b(ks[3], 3 * D_MODEL),
        "out_proj_w": w(ks[4], D_MODEL, D_MODEL),    "out_proj_b": b(ks[5], D_MODEL),
        "norm1_w": ones(D_MODEL),                    "norm1_b": zeros(D_MODEL),
        "linear1_w": w(ks[6], D_MODEL, DIM_FF),      "linear1_b": b(ks[7], DIM_FF),
        "linear2_w": w(ks[8], DIM_FF, D_MODEL),      "linear2_b": b(ks[9], D_MODEL),
        "norm2_w": ones(D_MODEL),                    "norm2_b": zeros(D_MODEL),
        "norm_w": ones(D_MODEL),                     "norm_b": zeros(D_MODEL),
        "cls_w": w(ks[10], D_MODEL, NUM_BINS),       "cls_b": zeros(NUM_BINS),
        "reg_w": w(ks[11], D_MODEL, D_INPUT),        "reg_b": zeros(D_INPUT),
    }


if __name__ == "__main__":
    key = jax.random.PRNGKey(0)
    k_param, k_x = jax.random.split(key)

    params = init_params(k_param)
    B = 64
    x = jax.random.normal(k_x, (B, D_INPUT), jnp.float32)

    cls_out, reg_out = transformer_forward(x, params)        # tb auto-clamped to 64
    cls_out, reg_out = jax.block_until_ready((cls_out, reg_out))

    assert cls_out.shape == (B, NUM_BINS) and reg_out.shape == (B, D_INPUT)

    # Bit-for-bit-ish check vs. a reference using identical (fused, bf16-FF) math.
    cls_ref, reg_ref = reference_forward(x, fuse_params(params))
    assert jnp.allclose(cls_out, cls_ref, atol=2e-3, rtol=2e-3)
    assert jnp.allclose(reg_out, reg_ref, atol=2e-3, rtol=2e-3)

    # Looser check vs. the original full-f32 unfused semantics.
    cls_f32, reg_f32 = reference_forward_f32(x, params)
    assert jnp.allclose(cls_out, cls_f32, atol=5e-2, rtol=5e-2)
    assert jnp.allclose(reg_out, reg_f32, atol=5e-2, rtol=5e-2)

    print("KERNEL_OK")
</pallas_src>

<mosaic_0001>
module attributes {stable_mosaic.version = 11 : i64} {
  func.func @transformer_kernel(%arg0: i32, %arg1: memref<64x2xf32, #tpu.memory_space<vmem>>, %arg2: memref<2x64xf32, #tpu.memory_space<vmem>>, %arg3: memref<1x64xf32, #tpu.memory_space<vmem>>, %arg4: memref<64x64xf32, #tpu.memory_space<vmem>>, %arg5: memref<1x64xf32, #tpu.memory_space<vmem>>, %arg6: memref<1x64xf32, #tpu.memory_space<vmem>>, %arg7: memref<1x64xf32, #tpu.memory_space<vmem>>, %arg8: memref<64x2048xbf16, #tpu.memory_space<vmem>>, %arg9: memref<1x2048xf32, #tpu.memory_space<vmem>>, %arg10: memref<2048x64xbf16, #tpu.memory_space<vmem>>, %arg11: memref<1x64xf32, #tpu.memory_space<vmem>>, %arg12: memref<1x64xf32, #tpu.memory_space<vmem>>, %arg13: memref<1x64xf32, #tpu.memory_space<vmem>>, %arg14: memref<1x64xf32, #tpu.memory_space<vmem>>, %arg15: memref<1x64xf32, #tpu.memory_space<vmem>>, %arg16: memref<64x128xf32, #tpu.memory_space<vmem>>, %arg17: memref<1x128xf32, #tpu.memory_space<vmem>>, %arg18: memref<64x128xf32, #tpu.memory_space<vmem>>) attributes {dimension_semantics = [#tpu.dimension_semantics<parallel>], iteration_bounds = array<i64: 1>, scalar_prefetch = 0 : i64, scratch_operands = 0 : i64, tpu.core_type = #tpu.core_type<tc>, window_params = [{transform_indices = @transform_0, window_bounds = array<i64: 64, 2>}, {pipeline_mode = #tpu.pipeline_mode<synchronous>, transform_indices = @transform_1, window_bounds = array<i64: 2, 64>}, {pipeline_mode = #tpu.pipeline_mode<synchronous>, transform_indices = @transform_2, window_bounds = array<i64: 1, 64>}, {pipeline_mode = #tpu.pipeline_mode<synchronous>, transform_indices = @transform_3, window_bounds = array<i64: 64, 64>}, {pipeline_mode = #tpu.pipeline_mode<synchronous>, transform_indices = @transform_4, window_bounds = array<i64: 1, 64>}, {pipeline_mode = #tpu.pipeline_mode<synchronous>, transform_indices = @transform_5, window_bounds = array<i64: 1, 64>}, {pipeline_mode = #tpu.pipeline_mode<synchronous>, transform_indices = @transform_6, window_bounds = array<i64: 1, 64>}, {pipeline_mode = #tpu.pipeline_mode<synchronous>, transform_indices = @transform_7, window_bounds = array<i64: 64, 2048>}, {pipeline_mode = #tpu.pipeline_mode<synchronous>, transform_indices = @transform_8, window_bounds = array<i64: 1, 2048>}, {pipeline_mode = #tpu.pipeline_mode<synchronous>, transform_indices = @transform_9, window_bounds = array<i64: 2048, 64>}, {pipeline_mode = #tpu.pipeline_mode<synchronous>, transform_indices = @transform_10, window_bounds = array<i64: 1, 64>}, {pipeline_mode = #tpu.pipeline_mode<synchronous>, transform_indices = @transform_11, window_bounds = array<i64: 1, 64>}, {pipeline_mode = #tpu.pipeline_mode<synchronous>, transform_indices = @transform_12, window_bounds = array<i64: 1, 64>}, {pipeline_mode = #tpu.pipeline_mode<synchronous>, transform_indices = @transform_13, window_bounds = array<i64: 1, 64>}, {pipeline_mode = #tpu.pipeline_mode<synchronous>, transform_indices = @transform_14, window_bounds = array<i64: 1, 64>}, {pipeline_mode = #tpu.pipeline_mode<synchronous>, transform_indices = @transform_15, window_bounds = array<i64: 64, 128>}, {pipeline_mode = #tpu.pipeline_mode<synchronous>, transform_indices = @transform_16, window_bounds = array<i64: 1, 128>}, {transform_indices = @transform_17, window_bounds = array<i64: 64, 128>}]} {
    %c0 = arith.constant 0 : index
    %c0_0 = arith.constant 0 : index
    %0 = vector.load %arg1[%c0, %c0_0] : memref<64x2xf32, #tpu.memory_space<vmem>>, vector<64x2xf32>
    %c0_1 = arith.constant 0 : index
    %c0_2 = arith.constant 0 : index
    %1 = vector.load %arg2[%c0_1, %c0_2] : memref<2x64xf32, #tpu.memory_space<vmem>>, vector<2x64xf32>
    %2 = vector.extract_strided_slice %0 {offsets = [0, 0], sizes = [64, 1], strides = [1, 1]} : vector<64x2xf32> to vector<64x1xf32>
    %3 = vector.extract_strided_slice %1 {offsets = [0, 0], sizes = [1, 64], strides = [1, 1]} : vector<2x64xf32> to vector<1x64xf32>
    %4 = vector.broadcast %2 : vector<64x1xf32> to vector<64x64xf32>
    %5 = vector.broadcast %3 : vector<1x64xf32> to vector<64x64xf32>
    %6 = arith.mulf %4, %5 : vector<64x64xf32>
    %7 = vector.extract_strided_slice %0 {offsets = [0, 1], sizes = [64, 1], strides = [1, 1]} : vector<64x2xf32> to vector<64x1xf32>
    %8 = vector.extract_strided_slice %1 {offsets = [1, 0], sizes = [1, 64], strides = [1, 1]} : vector<2x64xf32> to vector<1x64xf32>
    %9 = vector.broadcast %7 : vector<64x1xf32> to vector<64x64xf32>
    %10 = vector.broadcast %8 : vector<1x64xf32> to vector<64x64xf32>
    %11 = arith.mulf %9, %10 : vector<64x64xf32>
    %12 = arith.addf %6, %11 : vector<64x64xf32>
    %c0_3 = arith.constant 0 : index
    %c0_4 = arith.constant 0 : index
    %13 = vector.load %arg3[%c0_3, %c0_4] : memref<1x64xf32, #tpu.memory_space<vmem>>, vector<1x64xf32>
    %14 = vector.broadcast %13 : vector<1x64xf32> to vector<64x64xf32>
    %15 = arith.addf %12, %14 : vector<64x64xf32>
    %c0_5 = arith.constant 0 : index
    %c0_6 = arith.constant 0 : index
    %16 = vector.load %arg4[%c0_5, %c0_6] : memref<64x64xf32, #tpu.memory_space<vmem>>, vector<64x64xf32>
    %cst = arith.constant dense<0.000000e+00> : vector<64x64xf32>
    %17 = tpu.matmul %15, %16, %cst {dimension_numbers = #tpu.dot_dimension_numbers<[1], [0], [0], [1], [0, 0, 1, 1], [], []>} : vector<64x64xf32>, vector<64x64xf32>, vector<64x64xf32> -> vector<64x64xf32>
    %c0_7 = arith.constant 0 : index
    %c0_8 = arith.constant 0 : index
    %18 = vector.load %arg5[%c0_7, %c0_8] : memref<1x64xf32, #tpu.memory_space<vmem>>, vector<1x64xf32>
    %19 = vector.broadcast %18 : vector<1x64xf32> to vector<64x64xf32>
    %20 = arith.addf %17, %19 : vector<64x64xf32>
    %21 = arith.addf %15, %20 : vector<64x64xf32>
    %c0_9 = arith.constant 0 : index
    %c0_10 = arith.constant 0 : index
    %22 = vector.load %arg6[%c0_9, %c0_10] : memref<1x64xf32, #tpu.memory_space<vmem>>, vector<1x64xf32>
    %c0_11 = arith.constant 0 : index
    %c0_12 = arith.constant 0 : index
    %23 = vector.load %arg7[%c0_11, %c0_12] : memref<1x64xf32, #tpu.memory_space<vmem>>, vector<1x64xf32>
    %cst_13 = arith.constant dense<0.000000e+00> : vector<64xf32>
    %24 = vector.multi_reduction <add>, %21, %cst_13 [1] : vector<64x64xf32> to vector<64xf32>
    %25 = vector.shape_cast %24 : vector<64xf32> to vector<64x1xf32>
    %26 = arith.mulf %21, %21 : vector<64x64xf32>
    %cst_14 = arith.constant dense<0.000000e+00> : vector<64xf32>
    %27 = vector.multi_reduction <add>, %26, %cst_14 [1] : vector<64x64xf32> to vector<64xf32>
    %28 = vector.shape_cast %27 : vector<64xf32> to vector<64x1xf32>
    %cst_15 = arith.constant 1.562500e-02 : f32
    %29 = vector.broadcast %cst_15 : f32 to vector<64x1xf32>
    %30 = arith.mulf %25, %29 : vector<64x1xf32>
    %cst_16 = arith.constant 1.562500e-02 : f32
    %31 = vector.broadcast %cst_16 : f32 to vector<64x1xf32>
    %32 = arith.mulf %28, %31 : vector<64x1xf32>
    %33 = arith.mulf %30, %30 : vector<64x1xf32>
    %34 = arith.subf %32, %33 : vector<64x1xf32>
    %35 = vector.broadcast %30 : vector<64x1xf32> to vector<64x64xf32>
    %36 = arith.subf %21, %35 : vector<64x64xf32>
    %cst_17 = arith.constant 9.99999974E-6 : f32
    %37 = vector.broadcast %cst_17 : f32 to vector<64x1xf32>
    %38 = arith.addf %34, %37 : vector<64x1xf32>
    %39 = math.rsqrt %38 : vector<64x1xf32>
    %40 = vector.broadcast %39 : vector<64x1xf32> to vector<64x64xf32>
    %41 = arith.mulf %36, %40 : vector<64x64xf32>
    %42 = vector.broadcast %22 : vector<1x64xf32> to vector<64x64xf32>
    %43 = arith.mulf %41, %42 : vector<64x64xf32>
    %44 = vector.broadcast %23 : vector<1x64xf32> to vector<64x64xf32>
    %45 = arith.addf %43, %44 : vector<64x64xf32>
    %46 = arith.truncf %45 : vector<64x64xf32> to vector<64x64xbf16>
    %c0_18 = arith.constant 0 : index
    %c0_19 = arith.constant 0 : index
    %47 = vector.load %arg8[%c0_18, %c0_19] : memref<64x2048xbf16, #tpu.memory_space<vmem>>, vector<64x2048xbf16>
    %cst_20 = arith.constant dense<0.000000e+00> : vector<64x2048xf32>
    %48 = tpu.matmul %46, %47, %cst_20 {dimension_numbers = #tpu.dot_dimension_numbers<[1], [0], [0], [1], [0, 0, 1, 1], [], []>} : vector<64x64xbf16>, vector<64x2048xbf16>, vector<64x2048xf32> -> vector<64x2048xf32>
    %c0_21 = arith.constant 0 : index
    %c0_22 = arith.constant 0 : index
    %49 = vector.load %arg9[%c0_21, %c0_22] : memref<1x2048xf32, #tpu.memory_space<vmem>>, vector<1x2048xf32>
    %50 = vector.broadcast %49 : vector<1x2048xf32> to vector<64x2048xf32>
    %51 = arith.addf %48, %50 : vector<64x2048xf32>
    %cst_23 = arith.constant 0.000000e+00 : f32
    %52 = vector.broadcast %cst_23 : f32 to vector<64x2048xf32>
    %53 = arith.maximumf %51, %52 : vector<64x2048xf32>
    %54 = arith.truncf %53 : vector<64x2048xf32> to vector<64x2048xbf16>
    %c0_24 = arith.constant 0 : index
    %c0_25 = arith.constant 0 : index
    %55 = vector.load %arg10[%c0_24, %c0_25] : memref<2048x64xbf16, #tpu.memory_space<vmem>>, vector<2048x64xbf16>
    %cst_26 = arith.constant dense<0.000000e+00> : vector<64x64xf32>
    %56 = tpu.matmul %54, %55, %cst_26 {dimension_numbers = #tpu.dot_dimension_numbers<[1], [0], [0], [1], [0, 0, 1, 1], [], []>} : vector<64x2048xbf16>, vector<2048x64xbf16>, vector<64x64xf32> -> vector<64x64xf32>
    %c0_27 = arith.constant 0 : index
    %c0_28 = arith.constant 0 : index
    %57 = vector.load %arg11[%c0_27, %c0_28] : memref<1x64xf32, #tpu.memory_space<vmem>>, vector<1x64xf32>
    %58 = vector.broadcast %57 : vector<1x64xf32> to vector<64x64xf32>
    %59 = arith.addf %56, %58 : vector<64x64xf32>
    %60 = arith.addf %45, %59 : vector<64x64xf32>
    %c0_29 = arith.constant 0 : index
    %c0_30 = arith.constant 0 : index
    %61 = vector.load %arg12[%c0_29, %c0_30] : memref<1x64xf32, #tpu.memory_space<vmem>>, vector<1x64xf32>
    %c0_31 = arith.constant 0 : index
    %c0_32 = arith.constant 0 : index
    %62 = vector.load %arg13[%c0_31, %c0_32] : memref<1x64xf32, #tpu.memory_space<vmem>>, vector<1x64xf32>
    %cst_33 = arith.constant dense<0.000000e+00> : vector<64xf32>
    %63 = vector.multi_reduction <add>, %60, %cst_33 [1] : vector<64x64xf32> to vector<64xf32>
    %64 = vector.shape_cast %63 : vector<64xf32> to vector<64x1xf32>
    %65 = arith.mulf %60, %60 : vector<64x64xf32>
    %cst_34 = arith.constant dense<0.000000e+00> : vector<64xf32>
    %66 = vector.multi_reduction <add>, %65, %cst_34 [1] : vector<64x64xf32> to vector<64xf32>
    %67 = vector.shape_cast %66 : vector<64xf32> to vector<64x1xf32>
    %cst_35 = arith.constant 1.562500e-02 : f32
    %68 = vector.broadcast %cst_35 : f32 to vector<64x1xf32>
    %69 = arith.mulf %64, %68 : vector<64x1xf32>
    %cst_36 = arith.constant 1.562500e-02 : f32
    %70 = vector.broadcast %cst_36 : f32 to vector<64x1xf32>
    %71 = arith.mulf %67, %70 : vector<64x1xf32>
    %72 = arith.mulf %69, %69 : vector<64x1xf32>
    %73 = arith.subf %71, %72 : vector<64x1xf32>
    %74 = vector.broadcast %69 : vector<64x1xf32> to vector<64x64xf32>
    %75 = arith.subf %60, %74 : vector<64x64xf32>
    %cst_37 = arith.constant 9.99999974E-6 : f32
    %76 = vector.broadcast %cst_37 : f32 to vector<64x1xf32>
    %77 = arith.addf %73, %76 : vector<64x1xf32>
    %78 = math.rsqrt %77 : vector<64x1xf32>
    %79 = vector.broadcast %78 : vector<64x1xf32> to vector<64x64xf32>
    %80 = arith.mulf %75, %79 : vector<64x64xf32>
    %81 = vector.broadcast %61 : vector<1x64xf32> to vector<64x64xf32>
    %82 = arith.mulf %80, %81 : vector<64x64xf32>
    %83 = vector.broadcast %62 : vector<1x64xf32> to vector<64x64xf32>
    %84 = arith.addf %82, %83 : vector<64x64xf32>
    %c0_38 = arith.constant 0 : index
    %c0_39 = arith.constant 0 : index
    %85 = vector.load %arg14[%c0_38, %c0_39] : memref<1x64xf32, #tpu.memory_space<vmem>>, vector<1x64xf32>
    %c0_40 = arith.constant 0 : index
    %c0_41 = arith.constant 0 : index
    %86 = vector.load %arg15[%c0_40, %c0_41] : memref<1x64xf32, #tpu.memory_space<vmem>>, vector<1x64xf32>
    %cst_42 = arith.constant dense<0.000000e+00> : vector<64xf32>
    %87 = vector.multi_reduction <add>, %84, %cst_42 [1] : vector<64x64xf32> to vector<64xf32>
    %88 = vector.shape_cast %87 : vector<64xf32> to vector<64x1xf32>
    %89 = arith.mulf %84, %84 : vector<64x64xf32>
    %cst_43 = arith.constant dense<0.000000e+00> : vector<64xf32>
    %90 = vector.multi_reduction <add>, %89, %cst_43 [1] : vector<64x64xf32> to vector<64xf32>
    %91 = vector.shape_cast %90 : vector<64xf32> to vector<64x1xf32>
    %cst_44 = arith.constant 1.562500e-02 : f32
    %92 = vector.broadcast %cst_44 : f32 to vector<64x1xf32>
    %93 = arith.mulf %88, %92 : vector<64x1xf32>
    %cst_45 = arith.constant 1.562500e-02 : f32
    %94 = vector.broadcast %cst_45 : f32 to vector<64x1xf32>
    %95 = arith.mulf %91, %94 : vector<64x1xf32>
    %96 = arith.mulf %93, %93 : vector<64x1xf32>
    %97 = arith.subf %95, %96 : vector<64x1xf32>
    %98 = vector.broadcast %93 : vector<64x1xf32> to vector<64x64xf32>
    %99 = arith.subf %84, %98 : vector<64x64xf32>
    %cst_46 = arith.constant 9.99999974E-6 : f32
    %100 = vector.broadcast %cst_46 : f32 to vector<64x1xf32>
    %101 = arith.addf %97, %100 : vector<64x1xf32>
    %102 = math.rsqrt %101 : vector<64x1xf32>
    %103 = vector.broadcast %102 : vector<64x1xf32> to vector<64x64xf32>
    %104 = arith.mulf %99, %103 : vector<64x64xf32>
    %105 = vector.broadcast %85 : vector<1x64xf32> to vector<64x64xf32>
    %106 = arith.mulf %104, %105 : vector<64x64xf32>
    %107 = vector.broadcast %86 : vector<1x64xf32> to vector<64x64xf32>
    %108 = arith.addf %106, %107 : vector<64x64xf32>
    %c0_47 = arith.constant 0 : index
    %c0_48 = arith.constant 0 : index
    %109 = vector.load %arg16[%c0_47, %c0_48] : memref<64x128xf32, #tpu.memory_space<vmem>>, vector<64x128xf32>
    %cst_49 = arith.constant dense<0.000000e+00> : vector<64x128xf32>
    %110 = tpu.matmul %108, %109, %cst_49 {dimension_numbers = #tpu.dot_dimension_numbers<[1], [0], [0], [1], [0, 0, 1, 1], [], []>} : vector<64x64xf32>, vector<64x128xf32>, vector<64x128xf32> -> vector<64x128xf32>
    %c0_50 = arith.constant 0 : index
    %c0_51 = arith.constant 0 : index
    %111 = vector.load %arg17[%c0_50, %c0_51] : memref<1x128xf32, #tpu.memory_space<vmem>>, vector<1x128xf32>
    %112 = vector.broadcast %111 : vector<1x128xf32> to vector<64x128xf32>
    %113 = arith.addf %110, %112 : vector<64x128xf32>
    %c0_52 = arith.constant 0 : index
    %c0_53 = arith.constant 0 : index
    %114 = vector.load %arg18[%c0_52, %c0_53] : memref<64x128xf32, #tpu.memory_space<vmem>>, vector<64x128xf32>
    tpu.vector_store %arg18[%c0_52, %c0_53], %113 {strides = array<i32>} : memref<64x128xf32, #tpu.memory_space<vmem>>, vector<64x128xf32>,
    return
  }
  func.func @transform_0(%arg0: i32) -> (i32, i32) {
    %c0_i32 = arith.constant 0 : i32
    %c0_i32_0 = arith.constant 0 : i32
    return %arg0, %c0_i32 : i32, i32
  }
  func.func @transform_1(%arg0: i32) -> (i32, i32) {
    %c0_i32 = arith.constant 0 : i32
    %c0_i32_0 = arith.constant 0 : i32
    %c0_i32_1 = arith.constant 0 : i32
    return %c0_i32, %c0_i32_0 : i32, i32
  }
  func.func @transform_2(%arg0: i32) -> (i32, i32) {
    %c0_i32 = arith.constant 0 : i32
    %c0_i32_0 = arith.constant 0 : i32
    %c0_i32_1 = arith.constant 0 : i32
    return %c0_i32, %c0_i32_0 : i32, i32
  }
  func.func @transform_3(%arg0: i32) -> (i32, i32) {
    %c0_i32 = arith.constant 0 : i32
    %c0_i32_0 = arith.constant 0 : i32
    %c0_i32_1 = arith.constant 0 : i32
    return %c0_i32, %c0_i32_0 : i32, i32
  }
  func.func @transform_4(%arg0: i32) -> (i32, i32) {
    %c0_i32 = arith.constant 0 : i32
    %c0_i32_0 = arith.constant 0 : i32
    %c0_i32_1 = arith.constant 0 : i32
    return %c0_i32, %c0_i32_0 : i32, i32
  }
  func.func @transform_5(%arg0: i32) -> (i32, i32) {
    %c0_i32 = arith.constant 0 : i32
    %c0_i32_0 = arith.constant 0 : i32
    %c0_i32_1 = arith.constant 0 : i32
    return %c0_i32, %c0_i32_0 : i32, i32
  }
  func.func @transform_6(%arg0: i32) -> (i32, i32) {
    %c0_i32 = arith.constant 0 : i32
    %c0_i32_0 = arith.constant 0 : i32
    %c0_i32_1 = arith.constant 0 : i32
    return %c0_i32, %c0_i32_0 : i32, i32
  }
  func.func @transform_7(%arg0: i32) -> (i32, i32) {
    %c0_i32 = arith.constant 0 : i32
    %c0_i32_0 = arith.constant 0 : i32
    %c0_i32_1 = arith.constant 0 : i32
    return %c0_i32, %c0_i32_0 : i32, i32
  }
  func.func @transform_8(%arg0: i32) -> (i32, i32) {
    %c0_i32 = arith.constant 0 : i32
    %c0_i32_0 = arith.constant 0 : i32
    %c0_i32_1 = arith.constant 0 : i32
    return %c0_i32, %c0_i32_0 : i32, i32
  }
  func.func @transform_9(%arg0: i32) -> (i32, i32) {
    %c0_i32 = arith.constant 0 : i32
    %c0_i32_0 = arith.constant 0 : i32
    %c0_i32_1 = arith.constant 0 : i32
    return %c0_i32, %c0_i32_0 : i32, i32
  }
  func.func @transform_10(%arg0: i32) -> (i32, i32) {
    %c0_i32 = arith.constant 0 : i32
    %c0_i32_0 = arith.constant 0 : i32
    %c0_i32_1 = arith.constant 0 : i32
    return %c0_i32, %c0_i32_0 : i32, i32
  }
  func.func @transform_11(%arg0: i32) -> (i32, i32) {
    %c0_i32 = arith.constant 0 : i32
    %c0_i32_0 = arith.constant 0 : i32
    %c0_i32_1 = arith.constant 0 : i32
    return %c0_i32, %c0_i32_0 : i32, i32
  }
  func.func @transform_12(%arg0: i32) -> (i32, i32) {
    %c0_i32 = arith.constant 0 : i32
    %c0_i32_0 = arith.constant 0 : i32
    %c0_i32_1 = arith.constant 0 : i32
    return %c0_i32, %c0_i32_0 : i32, i32
  }
  func.func @transform_13(%arg0: i32) -> (i32, i32) {
    %c0_i32 = arith.constant 0 : i32
    %c0_i32_0 = arith.constant 0 : i32
    %c0_i32_1 = arith.constant 0 : i32
    return %c0_i32, %c0_i32_0 : i32, i32
  }
  func.func @transform_14(%arg0: i32) -> (i32, i32) {
    %c0_i32 = arith.constant 0 : i32
    %c0_i32_0 = arith.constant 0 : i32
    %c0_i32_1 = arith.constant 0 : i32
    return %c0_i32, %c0_i32_0 : i32, i32
  }
  func.func @transform_15(%arg0: i32) -> (i32, i32) {
    %c0_i32 = arith.constant 0 : i32
    %c0_i32_0 = arith.constant 0 : i32
    %c0_i32_1 = arith.constant 0 : i32
    return %c0_i32, %c0_i32_0 : i32, i32
  }
  func.func @transform_16(%arg0: i32) -> (i32, i32) {
    %c0_i32 = arith.constant 0 : i32
    %c0_i32_0 = arith.constant 0 : i32
    %c0_i32_1 = arith.constant 0 : i32
    return %c0_i32, %c0_i32_0 : i32, i32
  }
  func.func @transform_17(%arg0: i32) -> (i32, i32) {
    %c0_i32 = arith.constant 0 : i32
    %c0_i32_0 = arith.constant 0 : i32
    return %arg0, %c0_i32 : i32, i32
  }
}

</mosaic_0001>

<bundles_post_ra>
// kernel: tpu_custom_call.1
= control target key start
LH: loop header
LB: loop body
LE: loop exit
PB: predicated region body
PF: predicated region fallthrough
CT: control target
= control target key end

     0   :  { %s6247_s0 = inlined_call_operand.vmem [shape: f32[64,2], index: 0, kind: input, shape index: {}]   ;;  %s6248_s1 = inlined_call_operand.vmem [shape: f32[2,64], index: 1, kind: input, shape index: {}]   ;;  %s6249_s2 = inlined_call_operand.vmem [shape: f32[1,64], index: 2, kind: input, shape index: {}]   ;;  %s6250_s3 = inlined_call_operand.vmem [shape: f32[64,64], index: 3, kind: input, shape index: {}]   ;;  %s6251_s4 = inlined_call_operand.vmem [shape: f32[1,64], index: 4, kind: input, shape index: {}]   ;;  %s6252_s5 = inlined_call_operand.vmem [shape: f32[1,64], index: 5, kind: input, shape index: {}]   ;;  %s6253_s6 = inlined_call_operand.vmem [shape: f32[1,64], index: 6, kind: input, shape index: {}]   ;;  %s6254_s7 = inlined_call_operand.vmem [shape: bf16[64,2048], index: 7, kind: input, shape index: {}]   ;;  %s6255_s8 = inlined_call_operand.vmem [shape: f32[1,2048], index: 8, kind: input, shape index: {}]   ;;  %s6256_s9 = inlined_call_operand.vmem [shape: bf16[2048,64], index: 9, kind: input, shape index: {}]   ;;  %s6257_s10 = inlined_call_operand.vmem [shape: f32[1,64], index: 10, kind: input, shape index: {}]   ;;  %s6258_s11 = inlined_call_operand.vmem [shape: f32[1,64], index: 11, kind: input, shape index: {}]   ;;  %s6259_s12 = inlined_call_operand.vmem [shape: f32[1,64], index: 12, kind: input, shape index: {}]   ;;  %s6260_s13 = inlined_call_operand.vmem [shape: f32[1,64], index: 13, kind: input, shape index: {}]   ;;  %s6261_s14 = inlined_call_operand.vmem [shape: f32[1,64], index: 14, kind: input, shape index: {}]   ;;  %s6262_s15 = inlined_call_operand.vmem [shape: f32[64,128], index: 15, kind: input, shape index: {}]   ;;  %s6263_s16 = inlined_call_operand.vmem [shape: f32[1,128], index: 16, kind: input, shape index: {}]   ;;  %s6264_s17 = inlined_call_operand.hbm [shape: f32[64,128], index: 17, kind: output, shape index: {}]  }
   0x1   :  { %6266 = sst [smem:[#allocation5_spill]] %s6247_s0 }
   0x2   :  { %6267 = sst [smem:[#allocation6_spill]] %s6248_s1 }
   0x3   :  { %s6268_s26 = sld [smem:[#allocation5_spill]]  ;;  %v4676_v2 = vmov 0   ;;  %v186_v3 = vld [vmem:[%s6250_s3] sm:$0xff]  ;;  %v187_v4 = vld [vmem:[%s6250_s3 + $0x8] sm:$0xff]  ;;  %v188_v5 = vld [vmem:[%s6250_s3 + $0x10] sm:$0xff]  ;;  %v4677_v8 = vmov 1  }
   0x4   :  { %4473 = vset.pattern.permute.xlu1 %v4676_v2  ;;  %4471 = vset.pattern.permute.xlu0 %v4676_v2  ;;  %v4434_v6 = vpack.c.bf16 %v187_v4, %v186_v3  ;;  %v189_v7 = vld [vmem:[%s6250_s3 + $0x18] sm:$0xff]  ;;  %v190_v11 = vld [vmem:[%s6250_s3 + $0x20] sm:$0xff]  ;;  %v191_v12 = vld [vmem:[%s6250_s3 + $0x28] sm:$0xff] }
   0x5   :  { %1005 = vmatprep.mubr.bf16.mxu1 %v4676_v2  ;;  %v4438_v10 = vpack.c.bf16 %v189_v7, %v188_v5  ;;  %v192_v13 = vld [vmem:[%s6250_s3 + $0x30] sm:$0xff]  ;;  %v193_v14 = vld [vmem:[%s6250_s3 + $0x38] sm:$0xff]  ;;  %v4442_v15 = vpack.c.bf16 %v191_v12, %v190_v11 }
   0x6   :  { %4435 = vmatprep.subr.bf16.mxu0 %v4434_v6  ;;  %v4446_v18 = vpack.c.bf16 %v193_v14, %v192_v13 }
   0x7   :  { %4437 = vmatpush3.bf16.msra.mxu0 %v4434_v6 }
   0x8   :  { %4439 = vmatprep.subr.bf16.mxu0 %v4438_v10 }
   0x9   :  { %v59_v0 = vld [vmem:[%s6268_s26 + $0x8] sm:$0xff]  ;;  %v58_v1 = vld [vmem:[%s6268_s26] sm:$0xff]  ;;  %v60_v9 = vld [vmem:[%s6268_s26 + $0x10] sm:$0xff] }
   0xa   :  { %74 = vperm.xlu1 %4473, %v59_v0   ;;  %69 = vperm.xlu0 %4471, %v58_v1   ;;  %v61_v16 = vld [vmem:[%s6268_s26 + $0x18] sm:$0xff]  ;;  %v62_v17 = vld [vmem:[%s6268_s26 + $0x20] sm:$0xff]  ;;  %v63_v19 = vld [vmem:[%s6268_s26 + $0x28] sm:$0xff] }
   0xb   :  { %4441 = vmatpush3.bf16.msra.mxu0 %v4438_v10  ;;  %v64_v20 = vld [vmem:[%s6268_s26 + $0x30] sm:$0xff]  ;;  %v65_v21 = vld [vmem:[%s6268_s26 + $0x38] sm:$0xff] }
   0xc   :  { %4443 = vmatprep.subr.bf16.mxu0 %v4442_v15 }
   0xe   :  { %4474 = vset.pattern.permute.xlu1 %v4677_v8  ;;  %4472 = vset.pattern.permute.xlu0 %v4677_v8 }
   0xf   :  { %124 = vperm.xlu1 %4474, %v59_v0   ;;  %120 = vperm.xlu0 %4472, %v58_v1  }
  0x10   :  { %4445 = vmatpush3.bf16.msra.mxu0 %v4442_v15 }
  0x11   :  { %4447 = vmatprep.subr.bf16.mxu0 %v4446_v18 }
  0x13   :  { %4475 = vset.pattern.permute.xlu1 %v4676_v2  ;;  %128 = vperm.xlu0 %4472, %v60_v9  }
  0x14   :  { %79 = vperm.xlu1 %4475, %v60_v9   ;;  %4449 = vmatpush3.bf16.msra.mxu0 %v4446_v18 }
  0x17   :  { %132 = vperm.xlu0 %4472, %v61_v16  }
  0x18   :  { %84 = vperm.xlu1 %4475, %v61_v16  }
  0x1b   :  { %136 = vperm.xlu0 %4472, %v62_v17  }
  0x1c   :  { %89 = vperm.xlu1 %4475, %v62_v17  }
  0x1f   :  { %140 = vperm.xlu0 %4472, %v63_v19  }
  0x20   :  { %94 = vperm.xlu1 %4475, %v63_v19  }
  0x23   :  { %144 = vperm.xlu0 %4472, %v64_v20  }
  0x24   :  { %99 = vperm.xlu1 %4475, %v64_v20  }
  0x27   :  { %148 = vperm.xlu0 %4472, %v65_v21  }
  0x28   :  { %104 = vperm.xlu1 %4475, %v65_v21  }
  0x29   :  { %22 = vsyncpa [#allocation3], 0  ;;  %v107_v22 = vlaneseq  ;;  %s6269_s0 = sld [smem:[#allocation6_spill]]  ;;  %v3776_v37 = vld [vmem:[%s6249_s2] ss:$0 sm:$0xff]  ;;  %vm201_vm0 = vcmask 523264  }
  0x2a   :  { %v3777_v15 = vld [vmem:[%s6251_s4] ss:$0 sm:$0xff]  ;;  %s4678_s2 = smov [#allocation2]  }
  0x2b   :  { %v4823_v23 = vshrl.u32 %v107_v22, 7 }
  0x2d   :  { %v4826_v24 = vsub.s32 0, %v4823_v23  ;;  %v4829_v25 = vsub.s32 1, %v4823_v23 }
  0x2f   :  { %v66_v26 = vld [vmem:[%s6269_s0] sm:$0x3] }
  0x30   :  { %v110_v29 = vrot.slane %v66_v26, %v4826_v24  ;;  %v154_v30 = vrot.slane %v66_v26, %v4829_v25 }
  0x89   :  { %v75_v27 = vpop.permute.xlu1 %74  ;;  %v70_v28 = vpop.permute.xlu0 %69 }
  0x8a   :  { %v112_v33 = vmul.f32 %v110_v29, %v75_v27  ;;  %v111_v34 = vmul.f32 %v110_v29, %v70_v28 }
  0x8e   :  { %v125_v31 = vpop.permute.xlu1 %124  ;;  %v121_v32 = vpop.permute.xlu0 %120 }
  0x8f   :  { %v156_v35 = vmul.f32 %v154_v30, %v125_v31  ;;  %v155_v36 = vmul.f32 %v154_v30, %v121_v32 }
  0x91   :  { %v164_v38 = vadd.f32 %v156_v35, %v112_v33  ;;  %v163_v39 = vadd.f32 %v155_v36, %v111_v34 }
  0x92   :  { %v129_v40 = vpop.permute.xlu0 %128 }
  0x93   :  { %v179_v41 = vadd.f32 %v3776_v37, %v164_v38  ;;  %v157_v42 = vmul.f32 %v154_v30, %v129_v40  ;;  %v80_v43 = vpop.permute.xlu1 %79  ;;  %v178_v44 = vadd.f32 %v3776_v37, %v163_v39 }
  0x94   :  { %v113_v45 = vmul.f32 %v110_v29, %v80_v43 }
  0x95   :  { %4394 = vmatprep.mubr.msk.f32.mxu0 %vm201_vm0, %v178_v44 }
  0x96   :  { %v165_v46 = vadd.f32 %v157_v42, %v113_v45  ;;  %4395 = vmatmul.mubr.msk.f32.vlgmr.msra.gmra.mrb[0].mxu0 %vm201_vm0, %v179_v41  ;;  %v133_v47 = vpop.permute.xlu0 %132 }
  0x97   :  { %v158_v48 = vmul.f32 %v154_v30, %v133_v47  ;;  %v85_v49 = vpop.permute.xlu1 %84 }
  0x98   :  { %v180_v50 = vadd.f32 %v3776_v37, %v165_v46  ;;  %v114_v51 = vmul.f32 %v110_v29, %v85_v49 }
  0x9a   :  { %v166_v52 = vadd.f32 %v158_v48, %v114_v51  ;;  %4397 = vmatprep.mubr.msk.f32.mxu0 %vm201_vm0, %v180_v50  ;;  %v137_v53 = vpop.permute.xlu0 %136 }
  0x9b   :  { %v159_v54 = vmul.f32 %v154_v30, %v137_v53  ;;  %v90_v55 = vpop.permute.xlu1 %89 }
  0x9c   :  { %v181_v56 = vadd.f32 %v3776_v37, %v166_v52  ;;  %v115_v57 = vmul.f32 %v110_v29, %v90_v55 }
  0x9e   :  { %v167_v58 = vadd.f32 %v159_v54, %v115_v57  ;;  %4398 = vmatmul.mubr.msk.f32.gmra.mrb[2].mxu0 %vm201_vm0, %v181_v56  ;;  %v141_v59 = vpop.permute.xlu0 %140 }
  0x9f   :  { %v160_v60 = vmul.f32 %v154_v30, %v141_v59  ;;  %v95_v61 = vpop.permute.xlu1 %94 }
  0xa0   :  { %v182_v62 = vadd.f32 %v3776_v37, %v167_v58  ;;  %v116_v63 = vmul.f32 %v110_v29, %v95_v61 }
  0xa2   :  { %v168_v0 = vadd.f32 %v160_v60, %v116_v63  ;;  %4400 = vmatprep.mubr.msk.f32.mxu0 %vm201_vm0, %v182_v62  ;;  %v145_v1 = vpop.permute.xlu0 %144 }
  0xa3   :  { %v161_v3 = vmul.f32 %v154_v30, %v145_v1  ;;  %v100_v4 = vpop.permute.xlu1 %99  ;;  %v493_v1 = vld [vmem:[%s6254_s7] sm:$0xff] }
  0xa4   :  { %v183_v5 = vadd.f32 %v3776_v37, %v168_v0  ;;  %v117_v6 = vmul.f32 %v110_v29, %v100_v4  ;;  %v494_v4 = vld [vmem:[%s6254_s7 + $0x8] sm:$0xff] }
  0xa6   :  { %v169_v7 = vadd.f32 %v161_v3, %v117_v6  ;;  %4401 = vmatmul.mubr.msk.f32.gmra.mrb[4].mxu0 %vm201_vm0, %v183_v5  ;;  %v149_v8 = vpop.permute.xlu0 %148  ;;  %v501_v3 = vld [vmem:[%s6254_s7 + $0x40] sm:$0xff] }
  0xa7   :  { %v162_v9 = vmul.f32 %v154_v30, %v149_v8  ;;  %v105_v10 = vpop.permute.xlu1 %104  ;;  %v3789_v6 = vcombine.high %v493_v1, %v501_v3 }
  0xa8   :  { %v184_v11 = vadd.f32 %v3776_v37, %v169_v7  ;;  %v118_v12 = vmul.f32 %v110_v29, %v105_v10  ;;  %v502_v7 = vld [vmem:[%s6254_s7 + $0x48] sm:$0xff] }
  0xa9   :  { %v3790_v10 = vcombine.low %v494_v4, %v502_v7  ;;  %973 = vmatprep.subr.bf16.mxu1 %v3789_v6 }
  0xaa   :  { %v170_v13 = vadd.f32 %v162_v9, %v118_v12  ;;  %4403 = vmatprep.mubr.msk.f32.mxu0 %vm201_vm0, %v184_v11  ;;  %v3788_v9 = vcombine.low %v493_v1, %v501_v3  ;;  %v509_v12 = vld [vmem:[%s6254_s7 + $0x80] sm:$0xff] }
  0xac   :  { %v185_v14 = vadd.f32 %v3776_v37, %v170_v13  ;;  %v517_v13 = vld [vmem:[%s6254_s7 + $0xc0] sm:$0xff]  ;;  %974 = vmatpush1.bf16.msra.mxu1 %v3788_v9 }
  0xae   :  { %4404 = vmatmul.mubr.msk.f32.gmra.mrb[6].mxu0 %vm201_vm0, %v185_v14 }
  0xaf   :  { %1078 = vmatprep.mubr.bf16.mxu0 %v4676_v2 }
 0x169   :  { %v4396_v16 = vpop.f32.mrb[0].mxu0 }
 0x16a   :  { %v298_v17 = vadd.f32 %v4396_v16, %v3777_v15  ;;  %v292_v18 = vpop.f32.mrb[1].mxu0  ;;  %v518_v16 = vld [vmem:[%s6254_s7 + $0xc8] sm:$0xff] }
 0x16b   :  { %v293_v19 = vadd.f32 %v3777_v15, %v292_v18 }
 0x16c   :  { %v4851_v20 = vadd.f32 %v298_v17, %v179_v41  ;;  %v3804_v17 = vcombine.low %v509_v12, %v517_v13 }
 0x16d   :  { %v4853_v21 = vadd.f32 %v293_v19, %v178_v44 }
 0x16e   :  { %v344_v22 = vsel %vm201_vm0, %v4851_v20, 0.0  ;;  %v366_v28 = vmul.f32 %v4851_v20, %v4851_v20 }
 0x16f   :  { %345 = vadd.xlane.f32.xlu0 %v344_v22  ;;  %v341_v26 = vsel %vm201_vm0, %v4853_v21, 0.0  ;;  %v365_v27 = vmul.f32 %v4853_v21, %v4853_v21  ;;  %v525_v22 = vld [vmem:[%s6254_s7 + $0x100] sm:$0xff] }
 0x170   :  { %342 = vadd.xlane.f32.xlu1 %v341_v26  ;;  %v376_v34 = vsel %vm201_vm0, %v366_v28, 0.0  ;;  %v533_v26 = vld [vmem:[%s6254_s7 + $0x140] sm:$0xff] }
 0x171   :  { %v4399_v29 = vpop.f32.mrb[2].mxu0  ;;  %v373_v30 = vsel %vm201_vm0, %v365_v27, 0.0  ;;  %v526_v27 = vld [vmem:[%s6254_s7 + $0x108] sm:$0xff]  ;;  %v3821_v28 = vcombine.high %v525_v22, %v533_v26 }
 0x172   :  { %v308_v31 = vadd.f32 %v4399_v29, %v3777_v15  ;;  %v302_v32 = vpop.f32.mrb[3].mxu0  ;;  %v534_v29 = vld [vmem:[%s6254_s7 + $0x148] sm:$0xff] }
 0x173   :  { %v303_v33 = vadd.f32 %v3777_v15, %v302_v32  ;;  %374 = vadd.xlane.f32.xlu0 %v373_v30  ;;  %v3820_v30 = vcombine.low %v525_v22, %v533_v26  ;;  %v3823_v32 = vcombine.high %v526_v27, %v534_v29 }
 0x174   :  { %v4865_v35 = vadd.f32 %v308_v31, %v181_v56  ;;  %377 = vadd.xlane.f32.xlu1 %v376_v34  ;;  %v3822_v31 = vcombine.low %v526_v27, %v534_v29  ;;  %v549_v34 = vld [vmem:[%s6254_s7 + $0x1c0] sm:$0xff] }
 0x175   :  { %v4867_v36 = vadd.f32 %v303_v33, %v180_v50  ;;  %v541_v33 = vld [vmem:[%s6254_s7 + $0x180] sm:$0xff] }
 0x176   :  { %v350_v37 = vsel %vm201_vm0, %v4865_v35, 0.0  ;;  %v368_v39 = vmul.f32 %v4865_v35, %v4865_v35 }
 0x177   :  { %v347_v38 = vsel %vm201_vm0, %v4867_v36, 0.0  ;;  %v367_v40 = vmul.f32 %v4867_v36, %v4867_v36 }
 0x178   :  { %351 = vadd.xlane.f32.xlu1 %v350_v37  ;;  %348 = vadd.xlane.f32.xlu0 %v347_v38  ;;  %v382_v45 = vsel %vm201_vm0, %v368_v39, 0.0  ;;  %v542_v37 = vld [vmem:[%s6254_s7 + $0x188] sm:$0xff]  ;;  %v3837_v38 = vcombine.high %v541_v33, %v549_v34 }
 0x179   :  { %v4402_v41 = vpop.f32.mrb[4].mxu0  ;;  %v379_v46 = vsel %vm201_vm0, %v367_v40, 0.0  ;;  %v550_v39 = vld [vmem:[%s6254_s7 + $0x1c8] sm:$0xff]  ;;  %v3836_v40 = vcombine.low %v541_v33, %v549_v34 }
 0x17a   :  { %v318_v42 = vadd.f32 %v4402_v41, %v3777_v15  ;;  %v312_v43 = vpop.f32.mrb[5].mxu0  ;;  %v3838_v41 = vcombine.low %v542_v37, %v550_v39 }
 0x17b   :  { %v313_v44 = vadd.f32 %v3777_v15, %v312_v43  ;;  %v4958_v43 = vld [vmem:[%s6254_s7 + $0x10] sm:$0xff] }
 0x17c   :  { %v4879_v47 = vadd.f32 %v318_v42, %v183_v5  ;;  %383 = vadd.xlane.f32.xlu1 %v382_v45  ;;  %380 = vadd.xlane.f32.xlu0 %v379_v46  ;;  %v3839_v42 = vcombine.high %v542_v37, %v550_v39  ;;  %v4968_v45 = vld [vmem:[%s6254_s7 + $0x18] sm:$0xff] }
 0x17d   :  { %v4881_v48 = vadd.f32 %v313_v44, %v182_v62  ;;  %v4963_v44 = vld [vmem:[%s6254_s7 + $0x50] sm:$0xff] }
 0x17e   :  { %v356_v49 = vsel %vm201_vm0, %v4879_v47, 0.0  ;;  %v370_v51 = vmul.f32 %v4879_v47, %v4879_v47  ;;  %v3793_v46 = vcombine.high %v4958_v43, %v4963_v44 }
 0x17f   :  { %v353_v50 = vsel %vm201_vm0, %v4881_v48, 0.0  ;;  %v369_v52 = vmul.f32 %v4881_v48, %v4881_v48 }
 0x180   :  { %357 = vadd.xlane.f32.xlu1 %v356_v49  ;;  %354 = vadd.xlane.f32.xlu0 %v353_v50  ;;  %v388_v57 = vsel %vm201_vm0, %v370_v51, 0.0  ;;  %v4975_v49 = vld [vmem:[%s6254_s7 + $0x58] sm:$0xff]  ;;  %v3792_v50 = vcombine.low %v4958_v43, %v4963_v44  ;;  %v543_v44 = vld [vmem:[%s6254_s7 + $0x190] sm:$0xff] }
 0x181   :  { %v4405_v53 = vpop.f32.mrb[6].mxu0  ;;  %v385_v58 = vsel %vm201_vm0, %v369_v52, 0.0  ;;  %v3794_v51 = vcombine.low %v4968_v45, %v4975_v49  ;;  %v3795_v52 = vcombine.high %v4968_v45, %v4975_v49  ;;  %v551_v49 = vld [vmem:[%s6254_s7 + $0x1d0] sm:$0xff] }
 0x182   :  { %v328_v54 = vadd.f32 %v4405_v53, %v3777_v15  ;;  %v322_v55 = vpop.f32.mrb[7].mxu0 }
 0x183   :  { %v323_v56 = vadd.f32 %v3777_v15, %v322_v55  ;;  %v3805_v15 = vcombine.high %v509_v12, %v517_v13 }
 0x184   :  { %v4893_v59 = vadd.f32 %v328_v54, %v185_v14  ;;  %389 = vadd.xlane.f32.xlu1 %v388_v57  ;;  %386 = vadd.xlane.f32.xlu0 %v385_v58  ;;  %v510_v14 = vld [vmem:[%s6254_s7 + $0x88] sm:$0xff] }
 0x185   :  { %v4895_v60 = vadd.f32 %v323_v56, %v184_v11  ;;  %v3791_v11 = vcombine.high %v494_v4, %v502_v7  ;;  %v3806_v18 = vcombine.low %v510_v14, %v518_v16  ;;  %v3807_v19 = vcombine.high %v510_v14, %v518_v16  ;;  %975 = vmatprep.subr.bf16.mxu1 %v3805_v15 }
 0x186   :  { %v362_v61 = vsel %vm201_vm0, %v4893_v59, 0.0  ;;  %v372_v62 = vmul.f32 %v4893_v59, %v4893_v59  ;;  %976 = vmatpush1.bf16.msra.mxu1 %v3804_v17 }
 0x187   :  { %v359_v63 = vsel %vm201_vm0, %v4895_v60, 0.0  ;;  %v371_v0 = vmul.f32 %v4895_v60, %v4895_v60  ;;  %1046 = vmatprep.subr.bf16.mxu0 %v3791_v11  ;;  %977 = vmatprep.subr.bf16.mxu1 %v3821_v28 }
 0x188   :  { %363 = vadd.xlane.f32.xlu1 %v362_v61  ;;  %360 = vadd.xlane.f32.xlu0 %v359_v63  ;;  %v394_v5 = vsel %vm201_vm0, %v372_v62, 0.0 }
 0x189   :  { %v391_v8 = vsel %vm201_vm0, %v371_v0, 0.0  ;;  %1047 = vmatpush1.bf16.msra.mxu0 %v3790_v10 }
 0x18a   :  { %1048 = vmatprep.subr.bf16.mxu0 %v3807_v19  ;;  %978 = vmatpush1.bf16.msra.mxu1 %v3820_v30 }
 0x18b   :  { %979 = vmatprep.subr.bf16.mxu1 %v3837_v38 }
 0x18c   :  { %395 = vadd.xlane.f32.xlu1 %v394_v5  ;;  %392 = vadd.xlane.f32.xlu0 %v391_v8 }
 0x18d   :  { %1049 = vmatpush1.bf16.msra.mxu0 %v3806_v18 }
 0x18e   :  { %1050 = vmatprep.subr.bf16.mxu0 %v3823_v32  ;;  %980 = vmatpush1.bf16.msra.mxu1 %v3836_v40  ;;  %v5000_v32 = vld [vmem:[%s6252_s5] ss:$0 sm:$0xff] }
 0x18f   :  { %1119 = vmatprep.subr.bf16.mxu1 %v3793_v46 }
 0x191   :  { %1051 = vmatpush1.bf16.msra.mxu0 %v3822_v31 }
 0x192   :  { %1052 = vmatprep.subr.bf16.mxu0 %v3839_v42 }
 0x195   :  { %1053 = vmatpush1.bf16.msra.mxu0 %v3838_v41 }
 0x196   :  { %1192 = vmatprep.subr.bf16.mxu0 %v3795_v52 }
 0x1fc   :  { %v346_v53 = vpop.xlane.xlu0 %345 }
 0x1fd   :  { %v343_v54 = vpop.xlane.xlu1 %342  ;;  %v398_v55 = vmul.f32 0.015625, %v346_v53 }
 0x1fe   :  { %v397_v56 = vmul.f32 0.015625, %v343_v54  ;;  %v511_v54 = vld [vmem:[%s6254_s7 + $0x90] sm:$0xff] }
 0x1ff   :  { %v414_v63 = vmul.f32 %v398_v55, %v398_v55  ;;  %v430_v31 = vsub.f32 %v4851_v20, %v398_v55  ;;  %v5009_v20 = vld [vmem:[%s6253_s6] ss:$0 sm:$0xff] }
 0x200   :  { %v413_v57 = vmul.f32 %v397_v56, %v397_v56  ;;  %v375_v58 = vpop.xlane.xlu0 %374  ;;  %v429_v29 = vsub.f32 %v4853_v21, %v397_v56 }
 0x201   :  { %v405_v61 = vmul.f32 0.015625, %v375_v58  ;;  %v378_v62 = vpop.xlane.xlu1 %377  ;;  %v519_v58 = vld [vmem:[%s6254_s7 + $0xd0] sm:$0xff] }
 0x202   :  { %v406_v0 = vmul.f32 0.015625, %v378_v62  ;;  %v520_v62 = vld [vmem:[%s6254_s7 + $0xd8] sm:$0xff] }
 0x203   :  { %v421_v1 = vsub.f32 %v405_v61, %v413_v57  ;;  %v512_v61 = vld [vmem:[%s6254_s7 + $0x98] sm:$0xff] }
 0x204   :  { %v422_v3 = vsub.f32 %v406_v0, %v414_v63 }
 0x205   :  { %v437_v4 = vadd.f32 1e-05, %v421_v1  ;;  %v352_v5 = vpop.xlane.xlu1 %351  ;;  %v349_v6 = vpop.xlane.xlu0 %348 }
 0x206   :  { %v438_v7 = vadd.f32 1e-05, %v422_v3  ;;  %v4983_v8 = vmul.f32 0.015625, %v352_v5  ;;  %v4985_v9 = vmul.f32 0.015625, %v349_v6  ;;  %v3809_v6 = vcombine.high %v511_v54, %v519_v58 }
 0x207   :  { %4604 = vrsqrt.f32 %v437_v4 }
 0x208   :  { %4606 = vrsqrt.f32 %v438_v7  ;;  %v416_v12 = vmul.f32 %v4983_v8, %v4983_v8  ;;  %v415_v13 = vmul.f32 %v4985_v9, %v4985_v9  ;;  %v3811_v7 = vcombine.high %v512_v61, %v520_v62 }
 0x209   :  { %v384_v10 = vpop.xlane.xlu1 %383  ;;  %v381_v11 = vpop.xlane.xlu0 %380 }
 0x20a   :  { %v408_v14 = vmul.f32 0.015625, %v384_v10  ;;  %v407_v15 = vmul.f32 0.015625, %v381_v11  ;;  %v432_v11 = vsub.f32 %v4865_v35, %v4983_v8  ;;  %v528_v8 = vld [vmem:[%s6254_s7 + $0x118] sm:$0xff] }
 0x20c   :  { %v424_v16 = vsub.f32 %v408_v14, %v416_v12  ;;  %v423_v17 = vsub.f32 %v407_v15, %v415_v13  ;;  %v431_v12 = vsub.f32 %v4867_v36, %v4985_v9  ;;  %v5046_v15 = vld [vmem:[%s6254_s7 + $0x110] sm:$0xff]  ;;  %v536_v9 = vld [vmem:[%s6254_s7 + $0x158] sm:$0xff] }
 0x20d   :  { %v358_v18 = vpop.xlane.xlu1 %357  ;;  %v355_v19 = vpop.xlane.xlu0 %354  ;;  %v535_v36 = vld [vmem:[%s6254_s7 + $0x150] sm:$0xff] }
 0x20e   :  { %v440_v22 = vadd.f32 1e-05, %v424_v16  ;;  %v439_v26 = vadd.f32 1e-05, %v423_v17  ;;  %v4991_v27 = vmul.f32 0.015625, %v358_v18  ;;  %v4993_v28 = vmul.f32 0.015625, %v355_v19 }
 0x210   :  { %4608 = vrsqrt.f32 %v440_v22  ;;  %v418_v33 = vmul.f32 %v4991_v27, %v4991_v27  ;;  %v417_v21 = vmul.f32 %v4993_v28, %v4993_v28 }
 0x211   :  { %v4605_v30 = vpop.eup %4604  ;;  %4610 = vrsqrt.f32 %v439_v26  ;;  %v390_v34 = vpop.xlane.xlu1 %389 }
 0x212   :  { %v387_v37 = vpop.xlane.xlu0 %386  ;;  %v4607_v38 = vpop.eup %4606  ;;  %v453_v39 = vmul.f32 %v4605_v30, %v429_v29  ;;  %v410_v40 = vmul.f32 0.015625, %v390_v34  ;;  %v3808_v29 = vcombine.low %v511_v54, %v519_v58  ;;  %v3810_v30 = vcombine.low %v512_v61, %v520_v62  ;;  %v506_v62 = vld [vmem:[%s6254_s7 + $0x68] sm:$0xff] }
 0x213   :  { %v409_v41 = vmul.f32 0.015625, %v387_v37  ;;  %v454_v42 = vmul.f32 %v4607_v38, %v430_v31  ;;  %v3825_v38 = vcombine.high %v5046_v15, %v535_v36  ;;  %v3824_v54 = vcombine.low %v5046_v15, %v535_v36 }
 0x214   :  { %v467_v46 = vmul.f32 %v5000_v32, %v453_v39  ;;  %v426_v52 = vsub.f32 %v410_v40, %v418_v33  ;;  %v3827_v39 = vcombine.high %v528_v8, %v536_v9  ;;  %v3841_v58 = vcombine.high %v543_v44, %v551_v49 }
 0x215   :  { %v425_v53 = vsub.f32 %v409_v41, %v417_v21  ;;  %v468_v55 = vmul.f32 %v5000_v32, %v454_v42  ;;  %v364_v56 = vpop.xlane.xlu1 %363  ;;  %v434_v42 = vsub.f32 %v4879_v47, %v4991_v27  ;;  %v497_v47 = vld [vmem:[%s6254_s7 + $0x20] sm:$0xff] }
 0x216   :  { %v361_v57 = vpop.xlane.xlu0 %360  ;;  %v5026_v63 = vadd.f32 %v5009_v20, %v467_v46  ;;  %v442_v0 = vadd.f32 1e-05, %v426_v52  ;;  %v5028_v3 = vmul.f32 0.015625, %v364_v56 }
 0x217   :  { %v441_v1 = vadd.f32 1e-05, %v425_v53  ;;  %v5031_v4 = vadd.f32 %v5009_v20, %v468_v55  ;;  %v5033_v5 = vmul.f32 0.015625, %v361_v57  ;;  %v433_v53 = vsub.f32 %v4881_v48, %v4993_v28  ;;  %v505_v48 = vld [vmem:[%s6254_s7 + $0x60] sm:$0xff]  ;;  %v498_v28 = vld [vmem:[%s6254_s7 + $0x28] sm:$0xff] }
 0x218   :  { %4612 = vrsqrt.f32 %v442_v0  ;;  %v420_v17 = vmul.f32 %v5028_v3, %v5028_v3  ;;  %v3826_v55 = vcombine.low %v528_v8, %v536_v9  ;;  %v436_v15 = vsub.f32 %v4893_v59, %v5028_v3  ;;  %v514_v9 = vld [vmem:[%s6254_s7 + $0xa8] sm:$0xff] }
 0x219   :  { %v5037_v10 = vpack.c.bf16 %v5031_v4, %v5026_v63  ;;  %4614 = vrsqrt.f32 %v441_v1  ;;  %v396_v13 = vpop.xlane.xlu1 %395  ;;  %v419_v18 = vmul.f32 %v5033_v5, %v5033_v5 }
 0x21a   :  { %v393_v14 = vpop.xlane.xlu0 %392  ;;  %v4609_v16 = vpop.eup %4608  ;;  %v412_v19 = vmul.f32 0.015625, %v396_v13  ;;  %v3799_v13 = vcombine.high %v498_v28, %v506_v62 }
 0x21b   :  { %v411_v35 = vmul.f32 0.015625, %v393_v14  ;;  %v4611_v22 = vpop.eup %4610  ;;  %v456_v26 = vmul.f32 %v4609_v16, %v432_v11  ;;  %3852 = vmatmul.mubr.msk.bf16.vlgmr.msra.gmra.mrb[0].mxu1 %vm201_vm0, %v5037_v10  ;;  %3856 = vmatmul.mubr.msk.bf16.vlgmr.msra.gmra.mrb[8].mxu0 %vm201_vm0, %v5037_v10 }
 0x21c   :  { %v455_v31 = vmul.f32 %v4611_v22, %v431_v12  ;;  %v428_v33 = vsub.f32 %v412_v19, %v420_v17  ;;  %1120 = vmatpush1.bf16.msra.mxu1 %v3792_v50  ;;  %1193 = vmatpush1.bf16.msra.mxu0 %v3794_v51  ;;  %v544_v50 = vld [vmem:[%s6254_s7 + $0x198] sm:$0xff]  ;;  %v3797_v12 = vcombine.high %v497_v47, %v505_v48  ;;  %v522_v22 = vld [vmem:[%s6254_s7 + $0xe8] sm:$0xff] }
 0x21d   :  { %v427_v34 = vsub.f32 %v411_v35, %v419_v18  ;;  %v470_v37 = vmul.f32 %v5000_v32, %v456_v26  ;;  %1015 = vmatprep.mubr.bf16.mxu1 %v4676_v2  ;;  %1088 = vmatprep.mubr.bf16.mxu0 %v4676_v2  ;;  %v552_v51 = vld [vmem:[%s6254_s7 + $0x1d8] sm:$0xff]  ;;  %v435_v18 = vsub.f32 %v4895_v60, %v5033_v5 }
 0x21e   :  { %v469_v21 = vmul.f32 %v5000_v32, %v455_v31  ;;  %v444_v40 = vadd.f32 1e-05, %v428_v33  ;;  %1121 = vmatprep.subr.bf16.mxu1 %v3809_v6  ;;  %1194 = vmatprep.subr.bf16.mxu0 %v3811_v7  ;;  %v3843_v61 = vcombine.high %v544_v50, %v552_v51  ;;  %v3840_v6 = vcombine.low %v543_v44, %v551_v49  ;;  %v545_v44 = vld [vmem:[%s6254_s7 + $0x1a0] sm:$0xff] }
 0x21f   :  { %v443_v41 = vadd.f32 1e-05, %v427_v34  ;;  %v5077_v43 = vadd.f32 %v5009_v20, %v470_v37  ;;  %v3842_v7 = vcombine.low %v544_v50, %v552_v51  ;;  %v3796_v26 = vcombine.low %v497_v47, %v505_v48  ;;  %v537_v34 = vld [vmem:[%s6254_s7 + $0x160] sm:$0xff]  ;;  %v530_v37 = vld [vmem:[%s6254_s7 + $0x128] sm:$0xff] }
 0x220   :  { %v5083_v45 = vadd.f32 %v5009_v20, %v469_v21  ;;  %4616 = vrsqrt.f32 %v444_v40  ;;  %1122 = vmatpush1.bf16.msra.mxu1 %v3808_v29  ;;  %1195 = vmatpush1.bf16.msra.mxu0 %v3810_v30  ;;  %v3798_v29 = vcombine.low %v498_v28, %v506_v62  ;;  %v529_v30 = vld [vmem:[%s6254_s7 + $0x120] sm:$0xff]  ;;  %v3815_v33 = vcombine.high %v514_v9, %v522_v22  ;;  %v546_v50 = vld [vmem:[%s6254_s7 + $0x1a8] sm:$0xff]  ;;  %v515_v28 = vld [vmem:[%s6254_s7 + $0xb0] sm:$0xff] }
 0x221   :  { %4618 = vrsqrt.f32 %v443_v41  ;;  %1123 = vmatprep.subr.bf16.mxu1 %v3825_v38  ;;  %1196 = vmatprep.subr.bf16.mxu0 %v3827_v39  ;;  %v538_v38 = vld [vmem:[%s6254_s7 + $0x168] sm:$0xff]  ;;  %v3814_v21 = vcombine.low %v514_v9, %v522_v22  ;;  %v3829_v40 = vcombine.high %v529_v30, %v537_v34  ;;  %v553_v49 = vld [vmem:[%s6254_s7 + $0x1e0] sm:$0xff]  ;;  %v523_v62 = vld [vmem:[%s6254_s7 + $0xf0] sm:$0xff] }
 0x222   :  { %v4613_v46 = vpop.eup %4612  ;;  %v5098_v52 = vpack.c.bf16 %v5077_v43, %v5083_v45  ;;  %v3831_v41 = vcombine.high %v530_v37, %v538_v38  ;;  %v554_v51 = vld [vmem:[%s6254_s7 + $0x1e8] sm:$0xff]  ;;  %v548_v9 = vld [vmem:[%s6254_s7 + $0x1b8] sm:$0xff] }
 0x223   :  { %v4615_v56 = vpop.eup %4614  ;;  %v458_v57 = vmul.f32 %v4613_v46, %v434_v42  ;;  %v3828_v42 = vcombine.low %v529_v30, %v537_v34  ;;  %v3830_v46 = vcombine.low %v530_v37, %v538_v38  ;;  %v3846_v47 = vcombine.low %v546_v50, %v554_v51  ;;  %v556_v22 = vld [vmem:[%s6254_s7 + $0x1f8] sm:$0xff]  ;;  %v4476_v37 = vld [vmem:[%s6256_s9 + $0x40] sm:$0xff]  }
 0x224   :  { %v457_v27 = vmul.f32 %v4615_v56, %v433_v53  ;;  %3853 = vmatmul.mubr.msk.bf16.gmra.mrb[4].mxu1 %vm201_vm0, %v5098_v52  ;;  %3857 = vmatmul.mubr.msk.bf16.gmra.mrb[12].mxu0 %vm201_vm0, %v5098_v52  ;;  %v3845_v53 = vcombine.high %v545_v44, %v553_v49  ;;  %v507_v56 = vld [vmem:[%s6254_s7 + $0x70] sm:$0xff]  ;;  %v3850_v34 = vcombine.low %v548_v9, %v556_v22  ;;  %v4478_v38 = vld [vmem:[%s6256_s9 + $0xc0] sm:$0xff]  }
 0x225   :  { %v472_v0 = vmul.f32 %v5000_v32, %v458_v57  ;;  %1025 = vmatprep.mubr.bf16.mxu1 %v4676_v2  ;;  %1098 = vmatprep.mubr.bf16.mxu0 %v4676_v2  ;;  %v500_v57 = vld [vmem:[%s6254_s7 + $0x38] sm:$0xff] }
 0x226   :  { %v471_v1 = vmul.f32 %v5000_v32, %v457_v27  ;;  %1124 = vmatpush1.bf16.msra.mxu1 %v3824_v54  ;;  %1197 = vmatpush1.bf16.msra.mxu0 %v3826_v55  ;;  %v3847_v54 = vcombine.high %v546_v50, %v554_v51  ;;  %v499_v55 = vld [vmem:[%s6254_s7 + $0x30] sm:$0xff] }
 0x227   :  { %v5124_v11 = vadd.f32 %v5009_v20, %v472_v0  ;;  %1125 = vmatprep.subr.bf16.mxu1 %v3841_v58  ;;  %1198 = vmatprep.subr.bf16.mxu0 %v3843_v61  ;;  %v508_v58 = vld [vmem:[%s6254_s7 + $0x78] sm:$0xff]  ;;  %v3844_v61 = vcombine.low %v545_v44, %v553_v49  ;;  %v3801_v27 = vcombine.high %v499_v55, %v507_v56  ;;  %v4481_v44 = vld [vmem:[%s6256_s9 + $0x8] sm:$0xff]   ;;  %v4486_v50 = vld [vmem:[%s6256_s9 + $0xd0] sm:$0xff]  }
 0x228   :  { %v5127_v14 = vadd.f32 %v5009_v20, %v471_v1  ;;  %v3803_v48 = vcombine.high %v500_v57, %v508_v58  ;;  %v516_v0 = vld [vmem:[%s6254_s7 + $0xb8] sm:$0xff]  ;;  %v4483_v49 = vld [vmem:[%s6256_s9 + $0x88] sm:$0xff]   ;;  %v4485_v51 = vld [vmem:[%s6256_s9 + $0x10] sm:$0xff]  }
 0x229   :  { %v524_v1 = vld [vmem:[%s6254_s7 + $0xf8] sm:$0xff] }
 0x22a   :  { %v4617_v16 = vpop.eup %4616  ;;  %v5133_v17 = vpack.c.bf16 %v5124_v11, %v5127_v14  ;;  %1126 = vmatpush1.bf16.msra.mxu1 %v3840_v6  ;;  %1199 = vmatpush1.bf16.msra.mxu0 %v3842_v7  ;;  %v3800_v6 = vcombine.low %v499_v55, %v507_v56  ;;  %v3802_v7 = vcombine.low %v500_v57, %v508_v58  ;;  %v4491_v55 = vld [vmem:[%s6256_s9 + $0x98] sm:$0xff]   ;;  %v4494_v56 = vld [vmem:[%s6256_s9 + $0xe0] sm:$0xff]  }
 0x22b   :  { %v4619_v19 = vpop.eup %4618  ;;  %v460_v35 = vmul.f32 %v4617_v16, %v436_v15  ;;  %1265 = vmatprep.subr.bf16.mxu1 %v3797_v12  ;;  %1338 = vmatprep.subr.bf16.mxu0 %v3799_v13  ;;  %v531_v12 = vld [vmem:[%s6254_s7 + $0x130] sm:$0xff]  ;;  %v3817_v13 = vcombine.high %v515_v28, %v523_v62  ;;  %v3819_v15 = vcombine.high %v516_v0, %v524_v1  ;;  %v4493_v57 = vld [vmem:[%s6256_s9 + $0x20] sm:$0xff]  }
 0x22c   :  { %v459_v36 = vmul.f32 %v4619_v19, %v435_v18  ;;  %3854 = vmatmul.mubr.msk.bf16.gmra.mrb[8].mxu1 %vm201_vm0, %v5133_v17  ;;  %3858 = vmatmul.mubr.msk.bf16.gmra.mrb[16].mxu0 %vm201_vm0, %v5133_v17  ;;  %v539_v16 = vld [vmem:[%s6254_s7 + $0x170] sm:$0xff]  ;;  %v532_v18 = vld [vmem:[%s6254_s7 + $0x138] sm:$0xff]  ;;  %v4495_v58 = vld [vmem:[%s6256_s9 + $0xa0] sm:$0xff]  }
 0x22d   :  { %v474_v59 = vmul.f32 %v5000_v32, %v460_v35  ;;  %1035 = vmatprep.mubr.bf16.mxu1 %v4676_v2  ;;  %1108 = vmatprep.mubr.bf16.mxu0 %v4676_v2  ;;  %v540_v19 = vld [vmem:[%s6254_s7 + $0x178] sm:$0xff]  ;;  %v3816_v35 = vcombine.low %v515_v28, %v523_v62  ;;  %v4501_v28 = vld [vmem:[%s6256_s9 + $0x30] sm:$0xff]  }
 0x22e   :  { %v473_v60 = vmul.f32 %v5000_v32, %v459_v36  ;;  %v513_v32 = vld [vmem:[%s6254_s7 + $0xa0] sm:$0xff]  ;;  %v3818_v36 = vcombine.low %v516_v0, %v524_v1  ;;  %v4503_v62 = vld [vmem:[%s6256_s9 + $0xb0] sm:$0xff]   ;;  %v4504_v0 = vld [vmem:[%s6256_s9 + $0x78] sm:$0xff]  }
 0x22f   :  { %v5146_v3 = vadd.f32 %v5009_v20, %v474_v59  ;;  %v3833_v59 = vcombine.high %v531_v12, %v539_v16  ;;  %v4506_v1 = vld [vmem:[%s6256_s9 + $0xf8] sm:$0xff]  }
 0x230   :  { %v5149_v5 = vadd.f32 %v5009_v20, %v473_v60  ;;  %v521_v20 = vld [vmem:[%s6254_s7 + $0xe0] sm:$0xff]  ;;  %v3835_v60 = vcombine.high %v532_v18, %v540_v19 }
 0x231   :  { %v3813_v31 = vcombine.high %v513_v32, %v521_v20  ;;  %v3812_v39 = vcombine.low %v513_v32, %v521_v20  ;;  %v547_v32 = vld [vmem:[%s6254_s7 + $0x1b0] sm:$0xff] }
 0x232   :  { %v5153_v8 = vpack.c.bf16 %v5146_v3, %v5149_v5  ;;  %v555_v20 = vld [vmem:[%s6254_s7 + $0x1f0] sm:$0xff] }
 0x233   :  { %v3849_v30 = vcombine.high %v547_v32, %v555_v20 }
 0x234   :  { %3855 = vmatmul.mubr.msk.bf16.gmra.mrb[12].mxu1 %vm201_vm0, %v5153_v8  ;;  %3859 = vmatmul.mubr.msk.bf16.gmra.mrb[20].mxu0 %vm201_vm0, %v5153_v8 }
 0x235   :  { %1151 = vmatprep.mubr.bf16.mxu1 %v4676_v2  ;;  %1224 = vmatprep.mubr.bf16.mxu0 %v4676_v2 }
 0x23c   :  { %3860 = vmatmul.mubr.msk.bf16.vlgmr.msra.gmra.mrb[16].mxu1 %vm201_vm0, %v5037_v10  ;;  %3864 = vmatmul.mubr.msk.bf16.vlgmr.msra.gmra.mrb[24].mxu0 %vm201_vm0, %v5037_v10 }
 0x23d   :  { %1266 = vmatpush1.bf16.msra.mxu1 %v3796_v26  ;;  %1339 = vmatpush1.bf16.msra.mxu0 %v3798_v29  ;;  %v3832_v26 = vcombine.low %v531_v12, %v539_v16  ;;  %v3834_v29 = vcombine.low %v532_v18, %v540_v19  ;;  %v4508_v12 = vld [vmem:[%s6256_s9 + $0x140] sm:$0xff]   ;;  %v575_v16 = vsub.s32 3, %v4823_v23 }
 0x23e   :  { %1161 = vmatprep.mubr.bf16.mxu1 %v4676_v2  ;;  %1234 = vmatprep.mubr.bf16.mxu0 %v4676_v2 }
 0x23f   :  { %1267 = vmatprep.subr.bf16.mxu1 %v3813_v31  ;;  %1340 = vmatprep.subr.bf16.mxu0 %v3815_v33  ;;  %v3851_v31 = vcombine.high %v548_v9, %v556_v22  ;;  %v3848_v33 = vcombine.low %v547_v32, %v555_v20 }
 0x241   :  { %1268 = vmatpush1.bf16.msra.mxu1 %v3812_v39  ;;  %1341 = vmatpush1.bf16.msra.mxu0 %v3814_v21  ;;  %v4477_v39 = vld [vmem:[%s6256_s9] sm:$0xff]  }
 0x242   :  { %1269 = vmatprep.subr.bf16.mxu1 %v3829_v40  ;;  %1342 = vmatprep.subr.bf16.mxu0 %v3831_v41  ;;  %v4479_v21 = vld [vmem:[%s6256_s9 + $0x80] sm:$0xff]   ;;  %v4480_v40 = vld [vmem:[%s6256_s9 + $0x48] sm:$0xff]  }
 0x243   :  { %v4482_v41 = vld [vmem:[%s6256_s9 + $0xc8] sm:$0xff]  }
 0x244   :  { %3861 = vmatmul.mubr.msk.bf16.gmra.mrb[20].mxu1 %vm201_vm0, %v5098_v52  ;;  %3865 = vmatmul.mubr.msk.bf16.gmra.mrb[28].mxu0 %vm201_vm0, %v5098_v52 }
 0x245   :  { %1171 = vmatprep.mubr.bf16.mxu1 %v4676_v2  ;;  %1244 = vmatprep.mubr.bf16.mxu0 %v4676_v2 }
 0x246   :  { %1270 = vmatpush1.bf16.msra.mxu1 %v3828_v42  ;;  %1343 = vmatpush1.bf16.msra.mxu0 %v3830_v46  ;;  %v4487_v42 = vld [vmem:[%s6256_s9 + $0x90] sm:$0xff]   ;;  %v4488_v46 = vld [vmem:[%s6256_s9 + $0x58] sm:$0xff]  }
 0x247   :  { %1271 = vmatprep.subr.bf16.mxu1 %v3845_v53  ;;  %1344 = vmatprep.subr.bf16.mxu0 %v3847_v54  ;;  %v4490_v53 = vld [vmem:[%s6256_s9 + $0xd8] sm:$0xff]  }
 0x248   :  { %v4489_v54 = vld [vmem:[%s6256_s9 + $0x18] sm:$0xff]  }
 0x24a   :  { %1272 = vmatpush1.bf16.msra.mxu1 %v3844_v61  ;;  %1345 = vmatpush1.bf16.msra.mxu0 %v3846_v47  ;;  %v4496_v61 = vld [vmem:[%s6256_s9 + $0x68] sm:$0xff]  }
 0x24b   :  { %1411 = vmatprep.subr.bf16.mxu1 %v3801_v27  ;;  %1484 = vmatprep.subr.bf16.mxu0 %v3803_v48  ;;  %v4498_v47 = vld [vmem:[%s6256_s9 + $0xe8] sm:$0xff]  }
 0x24c   :  { %3862 = vmatmul.mubr.msk.bf16.gmra.mrb[24].mxu1 %vm201_vm0, %v5133_v17  ;;  %3866 = vmatmul.mubr.msk.bf16.gmra.mrb[32].mxu0 %vm201_vm0, %v5133_v17  ;;  %v4497_v27 = vld [vmem:[%s6256_s9 + $0x28] sm:$0xff]  }
 0x24d   :  { %1181 = vmatprep.mubr.bf16.mxu1 %v4676_v2  ;;  %1254 = vmatprep.mubr.bf16.mxu0 %v4676_v2  ;;  %v4499_v48 = vld [vmem:[%s6256_s9 + $0xa8] sm:$0xff]  }
 0x254   :  { %3863 = vmatmul.mubr.msk.bf16.gmra.mrb[28].mxu1 %vm201_vm0, %v5153_v8  ;;  %3867 = vmatmul.mubr.msk.bf16.gmra.mrb[36].mxu0 %vm201_vm0, %v5153_v8 }
 0x255   :  { %1297 = vmatprep.mubr.bf16.mxu1 %v4676_v2  ;;  %1370 = vmatprep.mubr.bf16.mxu0 %v4676_v2 }
 0x25c   :  { %3868 = vmatmul.mubr.msk.bf16.vlgmr.msra.gmra.mrb[32].mxu1 %vm201_vm0, %v5037_v10  ;;  %3872 = vmatmul.mubr.msk.bf16.vlgmr.msra.gmra.mrb[40].mxu0 %vm201_vm0, %v5037_v10 }
 0x25d   :  { %1412 = vmatpush1.bf16.msra.mxu1 %v3800_v6  ;;  %1485 = vmatpush1.bf16.msra.mxu0 %v3802_v7  ;;  %v4505_v6 = vld [vmem:[%s6256_s9 + $0x38] sm:$0xff]  }
 0x25e   :  { %1307 = vmatprep.mubr.bf16.mxu1 %v4676_v2  ;;  %1380 = vmatprep.mubr.bf16.mxu0 %v4676_v2  ;;  %v4507_v7 = vld [vmem:[%s6256_s9 + $0xb8] sm:$0xff]  }
 0x25f   :  { %1413 = vmatprep.subr.bf16.mxu1 %v3817_v13  ;;  %1486 = vmatprep.subr.bf16.mxu0 %v3819_v15  ;;  %v571_v13 = vsub.s32 2, %v4823_v23  ;;  %v5421_v15 = vld [vmem:[%s6255_s8] sm:$0xff] }
 0x260   :  { %v5426_v18 = vrot.slane %v5421_v15, %v4826_v24 }
 0x261   :  { %1414 = vmatpush1.bf16.msra.mxu1 %v3816_v35  ;;  %1487 = vmatpush1.bf16.msra.mxu0 %v3818_v36  ;;  %v5431_v19 = vrot.slane %v5421_v15, %v571_v13  ;;  %v5435_v35 = vrot.slane %v5421_v15, %v4829_v25  ;;  %v5440_v36 = vrot.slane %v5421_v15, %v575_v16 }
 0x262   :  { %1415 = vmatprep.subr.bf16.mxu1 %v3833_v59  ;;  %1488 = vmatprep.subr.bf16.mxu0 %v3835_v60 }
 0x264   :  { %3869 = vmatmul.mubr.msk.bf16.gmra.mrb[36].mxu1 %vm201_vm0, %v5098_v52  ;;  %3873 = vmatmul.mubr.msk.bf16.gmra.mrb[44].mxu0 %vm201_vm0, %v5098_v52 }
 0x265   :  { %1317 = vmatprep.mubr.bf16.mxu1 %v4676_v2  ;;  %1390 = vmatprep.mubr.bf16.mxu0 %v4676_v2 }
 0x266   :  { %1416 = vmatpush1.bf16.msra.mxu1 %v3832_v26  ;;  %1489 = vmatpush1.bf16.msra.mxu0 %v3834_v29 }
 0x267   :  { %1417 = vmatprep.subr.bf16.mxu1 %v3849_v30  ;;  %1490 = vmatprep.subr.bf16.mxu0 %v3851_v31 }
 0x26a   :  { %1418 = vmatpush1.bf16.msra.mxu1 %v3848_v33  ;;  %1491 = vmatpush1.bf16.msra.mxu0 %v3850_v34 }
 0x26b   :  { %4042 = vmatprep.subr.bf16.mxu1 %v4476_v37  ;;  %4082 = vmatprep.subr.bf16.mxu0 %v4478_v38 }
 0x26c   :  { %3870 = vmatmul.mubr.msk.bf16.gmra.mrb[40].mxu1 %vm201_vm0, %v5133_v17  ;;  %3874 = vmatmul.mubr.msk.bf16.gmra.mrb[48].mxu0 %vm201_vm0, %v5133_v17 }
 0x26d   :  { %1327 = vmatprep.mubr.bf16.mxu1 %v4676_v2  ;;  %1400 = vmatprep.mubr.bf16.mxu0 %v4676_v2 }
 0x274   :  { %3871 = vmatmul.mubr.msk.bf16.gmra.mrb[44].mxu1 %vm201_vm0, %v5153_v8  ;;  %3875 = vmatmul.mubr.msk.bf16.gmra.mrb[52].mxu0 %vm201_vm0, %v5153_v8 }
 0x275   :  { %1443 = vmatprep.mubr.bf16.mxu1 %v4676_v2  ;;  %1516 = vmatprep.mubr.bf16.mxu0 %v4676_v2 }
 0x27c   :  { %3876 = vmatmul.mubr.msk.bf16.vlgmr.msra.gmra.mrb[48].mxu1 %vm201_vm0, %v5037_v10  ;;  %3880 = vmatmul.mubr.msk.bf16.vlgmr.msra.gmra.mrb[56].mxu0 %vm201_vm0, %v5037_v10  ;;  %v4484_v10 = vld [vmem:[%s6256_s9 + $0x50] sm:$0xff]  }
 0x27d   :  { %1453 = vmatprep.mubr.bf16.mxu1 %v4676_v2  ;;  %1526 = vmatprep.mubr.bf16.mxu0 %v4676_v2 }
 0x27e   :  { %4043 = vmatpush3.bf16.msra.mxu1 %v4477_v39  ;;  %4083 = vmatpush3.bf16.msra.mxu0 %v4479_v21 }
 0x27f   :  { %4044 = vmatprep.subr.bf16.mxu1 %v4480_v40  ;;  %4084 = vmatprep.subr.bf16.mxu0 %v4482_v41 }
 0x282   :  { %4045 = vmatpush3.bf16.msra.mxu1 %v4481_v44  ;;  %4085 = vmatpush3.bf16.msra.mxu0 %v4483_v49 }
 0x283   :  { %4046 = vmatprep.subr.bf16.mxu1 %v4484_v10  ;;  %4086 = vmatprep.subr.bf16.mxu0 %v4486_v50 }
 0x284   :  { %3877 = vmatmul.mubr.msk.bf16.gmra.mrb[52].mxu1 %vm201_vm0, %v5098_v52  ;;  %3881 = vmatmul.mubr.msk.bf16.gmra.mrb[60].mxu0 %vm201_vm0, %v5098_v52  ;;  %v4492_v52 = vld [vmem:[%s6256_s9 + $0x60] sm:$0xff]  }
 0x285   :  { %1463 = vmatprep.mubr.bf16.mxu1 %v4676_v2  ;;  %1536 = vmatprep.mubr.bf16.mxu0 %v4676_v2 }
 0x286   :  { %4047 = vmatpush3.bf16.msra.mxu1 %v4485_v51  ;;  %4087 = vmatpush3.bf16.msra.mxu0 %v4487_v42 }
 0x287   :  { %4048 = vmatprep.subr.bf16.mxu1 %v4488_v46  ;;  %4088 = vmatprep.subr.bf16.mxu0 %v4490_v53 }
 0x28a   :  { %4049 = vmatpush3.bf16.msra.mxu1 %v4489_v54  ;;  %4089 = vmatpush3.bf16.msra.mxu0 %v4491_v55 }
 0x28b   :  { %4050 = vmatprep.subr.bf16.mxu1 %v4492_v52  ;;  %4090 = vmatprep.subr.bf16.mxu0 %v4494_v56  ;;  %v4509_v52 = vld [vmem:[%s6256_s9 + $0x100] sm:$0xff]  }
 0x28c   :  { %3878 = vmatmul.mubr.msk.bf16.gmra.mrb[56].mxu1 %vm201_vm0, %v5133_v17  ;;  %3882 = vmatmul.mubr.msk.bf16.gmra.mrb[64].mxu0 %vm201_vm0, %v5133_v17  ;;  %v4500_v17 = vld [vmem:[%s6256_s9 + $0x70] sm:$0xff]   ;;  %v4511_v56 = vld [vmem:[%s6256_s9 + $0x180] sm:$0xff]  }
 0x28d   :  { %1473 = vmatprep.mubr.bf16.mxu1 %v4676_v2  ;;  %1546 = vmatprep.mubr.bf16.mxu0 %v4676_v2  ;;  %v4502_v2 = vld [vmem:[%s6256_s9 + $0xf0] sm:$0xff]  }
 0x28e   :  { %4051 = vmatpush3.bf16.msra.mxu1 %v4493_v57  ;;  %4091 = vmatpush3.bf16.msra.mxu0 %v4495_v58 }
 0x28f   :  { %4052 = vmatprep.subr.bf16.mxu1 %v4496_v61  ;;  %4092 = vmatprep.subr.bf16.mxu0 %v4498_v47  ;;  %v4512_v61 = vld [vmem:[%s6256_s9 + $0x148] sm:$0xff]  }
 0x290   :  { %v4514_v47 = vld [vmem:[%s6256_s9 + $0x1c8] sm:$0xff]  }
 0x292   :  { %4053 = vmatpush3.bf16.msra.mxu1 %v4497_v27  ;;  %4093 = vmatpush3.bf16.msra.mxu0 %v4499_v48 }
 0x293   :  { %4054 = vmatprep.subr.bf16.mxu1 %v4500_v17  ;;  %4094 = vmatprep.subr.bf16.mxu0 %v4502_v2 }
 0x294   :  { %3879 = vmatmul.mubr.msk.bf16.gmra.mrb[60].mxu1 %vm201_vm0, %v5153_v8  ;;  %3883 = vmatmul.mubr.msk.bf16.gmra.mrb[68].mxu0 %vm201_vm0, %v5153_v8  ;;  %v4510_v8 = vld [vmem:[%s6256_s9 + $0x1c0] sm:$0xff]  }
 0x296   :  { %4055 = vmatpush3.bf16.msra.mxu1 %v4501_v28  ;;  %4095 = vmatpush3.bf16.msra.mxu0 %v4503_v62 }
 0x297   :  { %4056 = vmatprep.subr.bf16.mxu1 %v4504_v0  ;;  %4096 = vmatprep.subr.bf16.mxu0 %v4506_v1 }
 0x29a   :  { %4057 = vmatpush3.bf16.msra.mxu1 %v4505_v6  ;;  %4097 = vmatpush3.bf16.msra.mxu0 %v4507_v7 }
 0x29b   :  { %4122 = vmatprep.subr.bf16.mxu1 %v4508_v12  ;;  %4162 = vmatprep.subr.bf16.mxu0 %v4510_v8 }
 0x2ee   :  { %v1007_v59 = vpop.f32.mrb[0].mxu1  ;;  %v1080_v60 = vpop.f32.mrb[8].mxu0 }
 0x2ef   :  { %v1008_v32 = vadd.f32 %v1007_v59, %v5426_v18  ;;  %v1081_v20 = vadd.f32 %v1080_v60, %v5431_v19  ;;  %v1009_v9 = vpop.f32.mrb[1].mxu1  ;;  %v1082_v22 = vpop.f32.mrb[9].mxu0  ;;  %v4513_v59 = vld [vmem:[%s6256_s9 + $0x108] sm:$0xff]  }
 0x2f0   :  { %v1010_v26 = vadd.f32 %v1009_v9, %v5435_v35  ;;  %v1083_v29 = vadd.f32 %v1082_v22, %v5440_v36  ;;  %v1011_v30 = vpop.f32.mrb[2].mxu1  ;;  %v1084_v31 = vpop.f32.mrb[10].mxu0  ;;  %v4515_v60 = vld [vmem:[%s6256_s9 + $0x188] sm:$0xff]   ;;  %v4516_v9 = vld [vmem:[%s6256_s9 + $0x150] sm:$0xff]  }
 0x2f1   :  { %v1012_v33 = vadd.f32 %v1011_v30, %v5426_v18  ;;  %v1085_v34 = vadd.f32 %v1084_v31, %v5431_v19  ;;  %v1013_v37 = vpop.f32.mrb[3].mxu1  ;;  %v1086_v38 = vpop.f32.mrb[11].mxu0  ;;  %v1557_v40 = vmax.f32 %v1008_v32, 0.0  ;;  %v1559_v41 = vmax.f32 %v1081_v20, 0.0  ;;  %v4518_v22 = vld [vmem:[%s6256_s9 + $0x1d0] sm:$0xff]  }
 0x2f2   :  { %v1014_v39 = vadd.f32 %v1013_v37, %v5435_v35  ;;  %v1087_v21 = vadd.f32 %v1086_v38, %v5440_v36  ;;  %v1558_v10 = vmax.f32 %v1010_v26, 0.0  ;;  %v1560_v50 = vmax.f32 %v1083_v29, 0.0 }
 0x2f3   :  { %v1573_v44 = vmax.f32 %v1012_v33, 0.0  ;;  %v1575_v49 = vmax.f32 %v1085_v34, 0.0 }
 0x2f4   :  { %v1574_v51 = vmax.f32 %v1014_v39, 0.0  ;;  %v1576_v42 = vmax.f32 %v1087_v21, 0.0 }
 0x2f5   :  { %v1685_v46 = vpack.c.bf16 %v1573_v44, %v1557_v40  ;;  %v1687_v53 = vpack.c.bf16 %v1575_v49, %v1559_v41 }
 0x2f6   :  { %v1686_v54 = vpack.c.bf16 %v1574_v51, %v1558_v10  ;;  %v1688_v55 = vpack.c.bf16 %v1576_v42, %v1560_v50  ;;  %v4517_v10 = vld [vmem:[%s6256_s9 + $0x110] sm:$0xff]  }
 0x2f7   :  { %v1017_v57 = vpop.f32.mrb[4].mxu1  ;;  %v1090_v58 = vpop.f32.mrb[12].mxu0  ;;  %v4519_v50 = vld [vmem:[%s6256_s9 + $0x190] sm:$0xff]  }
 0x2f8   :  { %v1018_v27 = vadd.f32 %v1017_v57, %v5426_v18  ;;  %v1091_v48 = vadd.f32 %v1090_v58, %v5431_v19  ;;  %v1019_v17 = vpop.f32.mrb[5].mxu1  ;;  %v1092_v2 = vpop.f32.mrb[13].mxu0  ;;  %2812 = vmatprep.mubr.bf16.mxu1 %v1686_v54  ;;  %2877 = vmatprep.mubr.bf16.mxu0 %v1688_v55  ;;  %v4520_v54 = vld [vmem:[%s6256_s9 + $0x158] sm:$0xff]  }
 0x2f9   :  { %v1020_v28 = vadd.f32 %v1019_v17, %v5435_v35  ;;  %v1093_v62 = vadd.f32 %v1092_v2, %v5440_v36  ;;  %v1021_v0 = vpop.f32.mrb[6].mxu1  ;;  %v1094_v1 = vpop.f32.mrb[14].mxu0  ;;  %2813 = vmatmul.mubr.bf16.vlgmr.msra.gmra.mrb[64].mxu1 %v1685_v46  ;;  %2878 = vmatmul.mubr.bf16.vlgmr.msra.gmra.mrb[72].mxu0 %v1687_v53  ;;  %v4522_v55 = vld [vmem:[%s6256_s9 + $0x1d8] sm:$0xff]  }
 0x2fa   :  { %v1022_v6 = vadd.f32 %v1021_v0, %v5426_v18  ;;  %v1095_v7 = vadd.f32 %v1094_v1, %v5431_v19  ;;  %v1023_v12 = vpop.f32.mrb[7].mxu1  ;;  %v1096_v8 = vpop.f32.mrb[15].mxu0  ;;  %4123 = vmatpush3.bf16.msra.mxu1 %v4509_v52  ;;  %4163 = vmatpush3.bf16.msra.mxu0 %v4511_v56  ;;  %v1589_v26 = vmax.f32 %v1018_v27, 0.0  ;;  %v1591_v29 = vmax.f32 %v1091_v48, 0.0 }
 0x2fb   :  { %v1024_v32 = vadd.f32 %v1023_v12, %v5435_v35  ;;  %v1097_v20 = vadd.f32 %v1096_v8, %v5440_v36  ;;  %4124 = vmatprep.subr.bf16.mxu1 %v4512_v61  ;;  %4164 = vmatprep.subr.bf16.mxu0 %v4514_v47  ;;  %v1590_v33 = vmax.f32 %v1020_v28, 0.0  ;;  %v1592_v34 = vmax.f32 %v1093_v62, 0.0  ;;  %v4521_v28 = vld [vmem:[%s6256_s9 + $0x118] sm:$0xff]  }
 0x2fc   :  { %v1605_v30 = vmax.f32 %v1022_v6, 0.0  ;;  %v1607_v31 = vmax.f32 %v1095_v7, 0.0  ;;  %v4523_v62 = vld [vmem:[%s6256_s9 + $0x198] sm:$0xff]   ;;  %v579_v0 = vsub.s32 4, %v4823_v23  ;;  %v587_v1 = vsub.s32 6, %v4823_v23 }
 0x2fd   :  { %v1606_v37 = vmax.f32 %v1024_v32, 0.0  ;;  %v1608_v38 = vmax.f32 %v1097_v20, 0.0 }
 0x2fe   :  { %v1701_v39 = vpack.c.bf16 %v1605_v30, %v1589_v26  ;;  %v1703_v21 = vpack.c.bf16 %v1607_v31, %v1591_v29  ;;  %4125 = vmatpush3.bf16.msra.mxu1 %v4513_v59  ;;  %4165 = vmatpush3.bf16.msra.mxu0 %v4515_v60  ;;  %v4524_v59 = vld [vmem:[%s6256_s9 + $0x160] sm:$0xff]   ;;  %v583_v30 = vsub.s32 5, %v4823_v23 }
 0x2ff   :  { %v1702_v40 = vpack.c.bf16 %v1606_v37, %v1590_v33  ;;  %v1704_v41 = vpack.c.bf16 %v1608_v38, %v1592_v34  ;;  %v1027_v44 = vpop.f32.mrb[8].mxu1  ;;  %v1100_v49 = vpop.f32.mrb[16].mxu0  ;;  %4126 = vmatprep.subr.bf16.mxu1 %v4516_v9  ;;  %4166 = vmatprep.subr.bf16.mxu0 %v4518_v22  ;;  %v4526_v60 = vld [vmem:[%s6256_s9 + $0x1e0] sm:$0xff]  }
 0x300   :  { %v1028_v51 = vadd.f32 %v1027_v44, %v5426_v18  ;;  %v1101_v42 = vadd.f32 %v1100_v49, %v5431_v19  ;;  %v1029_v46 = vpop.f32.mrb[9].mxu1  ;;  %v1102_v53 = vpop.f32.mrb[17].mxu0  ;;  %v4525_v38 = vld [vmem:[%s6256_s9 + $0x120] sm:$0xff]  }
 0x301   :  { %v1030_v52 = vadd.f32 %v1029_v46, %v5435_v35  ;;  %v1103_v56 = vadd.f32 %v1102_v53, %v5440_v36  ;;  %v1031_v57 = vpop.f32.mrb[10].mxu1  ;;  %v1104_v58 = vpop.f32.mrb[18].mxu0  ;;  %2820 = vmatprep.mubr.bf16.mxu1 %v1702_v40  ;;  %2885 = vmatprep.mubr.bf16.mxu0 %v1704_v41 }
 0x302   :  { %v1032_v61 = vadd.f32 %v1031_v57, %v5426_v18  ;;  %v1105_v47 = vadd.f32 %v1104_v58, %v5431_v19  ;;  %v1033_v27 = vpop.f32.mrb[11].mxu1  ;;  %v1106_v48 = vpop.f32.mrb[19].mxu0  ;;  %2821 = vmatmul.mubr.bf16.gmra.mrb[68].mxu1 %v1701_v39  ;;  %2886 = vmatmul.mubr.bf16.gmra.mrb[76].mxu0 %v1703_v21  ;;  %v1621_v6 = vmax.f32 %v1028_v51, 0.0  ;;  %v1623_v7 = vmax.f32 %v1101_v42, 0.0  ;;  %v4527_v39 = vld [vmem:[%s6256_s9 + $0x1a0] sm:$0xff]  }
 0x303   :  { %v1034_v17 = vadd.f32 %v1033_v27, %v5435_v35  ;;  %v1107_v2 = vadd.f32 %v1106_v48, %v5440_v36  ;;  %4127 = vmatpush3.bf16.msra.mxu1 %v4517_v10  ;;  %4167 = vmatpush3.bf16.msra.mxu0 %v4519_v50  ;;  %v1622_v32 = vmax.f32 %v1030_v52, 0.0  ;;  %v1624_v20 = vmax.f32 %v1103_v56, 0.0  ;;  %v4528_v10 = vld [vmem:[%s6256_s9 + $0x168] sm:$0xff]  }
 0x304   :  { %v1637_v12 = vmax.f32 %v1032_v61, 0.0  ;;  %v1639_v8 = vmax.f32 %v1105_v47, 0.0  ;;  %4128 = vmatprep.subr.bf16.mxu1 %v4520_v54  ;;  %4168 = vmatprep.subr.bf16.mxu0 %v4522_v55  ;;  %v591_v21 = vsub.s32 7, %v4823_v23  ;;  %v4530_v50 = vld [vmem:[%s6256_s9 + $0x1e8] sm:$0xff]   ;;  %v5535_v51 = vrot.slane %v5421_v15, %v579_v0 }
 0x305   :  { %v1638_v9 = vmax.f32 %v1034_v17, 0.0  ;;  %v1640_v22 = vmax.f32 %v1107_v2, 0.0  ;;  %v5542_v55 = vrot.slane %v5421_v15, %v587_v1  ;;  %v5549_v61 = vrot.slane %v5421_v15, %v583_v30 }
 0x306   :  { %v1717_v26 = vpack.c.bf16 %v1637_v12, %v1621_v6  ;;  %v1719_v29 = vpack.c.bf16 %v1639_v8, %v1623_v7  ;;  %v5562_v48 = vrot.slane %v5421_v15, %v591_v21 }
 0x307   :  { %v1718_v31 = vpack.c.bf16 %v1638_v9, %v1622_v32  ;;  %v1720_v33 = vpack.c.bf16 %v1640_v22, %v1624_v20  ;;  %4129 = vmatpush3.bf16.msra.mxu1 %v4521_v28  ;;  %v1037_v34 = vpop.f32.mrb[12].mxu1  ;;  %v1110_v37 = vpop.f32.mrb[20].mxu0  ;;  %4169 = vmatpush3.bf16.msra.mxu0 %v4523_v62  ;;  %v4534_v62 = vld [vmem:[%s6256_s9 + $0x1f0] sm:$0xff]  }
 0x308   :  { %v1038_v40 = vadd.f32 %v1037_v34, %v5426_v18  ;;  %v1111_v41 = vadd.f32 %v1110_v37, %v5431_v19  ;;  %v1039_v44 = vpop.f32.mrb[13].mxu1  ;;  %v1112_v49 = vpop.f32.mrb[21].mxu0  ;;  %4130 = vmatprep.subr.bf16.mxu1 %v4524_v59  ;;  %4170 = vmatprep.subr.bf16.mxu0 %v4526_v60  ;;  %v4533_v22 = vld [vmem:[%s6256_s9 + $0x130] sm:$0xff]   ;;  %v4536_v37 = vld [vmem:[%s6256_s9 + $0x178] sm:$0xff]  }
 0x309   :  { %v1040_v42 = vadd.f32 %v1039_v44, %v5435_v35  ;;  %v1113_v46 = vadd.f32 %v1112_v49, %v5440_v36  ;;  %v1041_v53 = vpop.f32.mrb[14].mxu1  ;;  %v1114_v54 = vpop.f32.mrb[22].mxu0  ;;  %2828 = vmatprep.mubr.bf16.mxu1 %v1718_v31  ;;  %2893 = vmatprep.mubr.bf16.mxu0 %v1720_v33 }
 0x30a   :  { %v1042_v52 = vadd.f32 %v1041_v53, %v5426_v18  ;;  %v1115_v56 = vadd.f32 %v1114_v54, %v5431_v19  ;;  %v1043_v57 = vpop.f32.mrb[15].mxu1  ;;  %v1116_v58 = vpop.f32.mrb[23].mxu0  ;;  %2829 = vmatmul.mubr.bf16.gmra.mrb[72].mxu1 %v1717_v26  ;;  %2894 = vmatmul.mubr.bf16.gmra.mrb[80].mxu0 %v1719_v29  ;;  %v4529_v18 = vld [vmem:[%s6256_s9 + $0x128] sm:$0xff]   ;;  %v1653_v17 = vmax.f32 %v1038_v40, 0.0  ;;  %v1655_v2 = vmax.f32 %v1111_v41, 0.0  ;;  %v4535_v26 = vld [vmem:[%s6256_s9 + $0x1b0] sm:$0xff]  }
 0x30b   :  { %v1044_v47 = vadd.f32 %v1043_v57, %v5435_v35  ;;  %v1117_v27 = vadd.f32 %v1116_v58, %v5440_v36  ;;  %4131 = vmatpush3.bf16.msra.mxu1 %v4525_v38  ;;  %4171 = vmatpush3.bf16.msra.mxu0 %v4527_v39  ;;  %v4531_v19 = vld [vmem:[%s6256_s9 + $0x1a8] sm:$0xff]   ;;  %v4532_v36 = vld [vmem:[%s6256_s9 + $0x170] sm:$0xff]   ;;  %v1654_v6 = vmax.f32 %v1040_v42, 0.0  ;;  %v1656_v7 = vmax.f32 %v1113_v46, 0.0  ;;  %v4538_v38 = vld [vmem:[%s6256_s9 + $0x1f8] sm:$0xff]  }
 0x30c   :  { %v1669_v35 = vmax.f32 %v1042_v52, 0.0  ;;  %v1671_v28 = vmax.f32 %v1115_v56, 0.0  ;;  %4132 = vmatprep.subr.bf16.mxu1 %v4528_v10  ;;  %4172 = vmatprep.subr.bf16.mxu0 %v4530_v50  ;;  %v4537_v54 = vld [vmem:[%s6256_s9 + $0x138] sm:$0xff]  }
 0x30d   :  { %v1670_v12 = vmax.f32 %v1044_v47, 0.0  ;;  %v1672_v8 = vmax.f32 %v1117_v27, 0.0  ;;  %v4539_v52 = vld [vmem:[%s6256_s9 + $0x1b8] sm:$0xff]   ;;  %v4540_v27 = vld [vmem:[%s6256_s9 + $0x240] sm:$0xff]  }
 0x30e   :  { %v1733_v15 = vpack.c.bf16 %v1669_v35, %v1653_v17  ;;  %v1735_v59 = vpack.c.bf16 %v1671_v28, %v1655_v2 }
 0x30f   :  { %v1734_v60 = vpack.c.bf16 %v1670_v12, %v1654_v6  ;;  %v1736_v32 = vpack.c.bf16 %v1672_v8, %v1656_v7  ;;  %4133 = vmatpush3.bf16.msra.mxu1 %v4529_v18  ;;  %v1153_v20 = vpop.f32.mrb[16].mxu1  ;;  %v1226_v9 = vpop.f32.mrb[24].mxu0  ;;  %4173 = vmatpush3.bf16.msra.mxu0 %v4531_v19  ;;  %v4542_v18 = vld [vmem:[%s6256_s9 + $0x2c0] sm:$0xff]  }
 0x310   :  { %v1154_v29 = vadd.f32 %v1153_v20, %v5535_v51  ;;  %v1227_v31 = vadd.f32 %v1226_v9, %v5542_v55  ;;  %v1155_v33 = vpop.f32.mrb[17].mxu1  ;;  %v1228_v34 = vpop.f32.mrb[25].mxu0  ;;  %4134 = vmatprep.subr.bf16.mxu1 %v4532_v36  ;;  %4174 = vmatprep.subr.bf16.mxu0 %v4534_v62  ;;  %v4541_v8 = vld [vmem:[%s6256_s9 + $0x200] sm:$0xff]   ;;  %v4544_v9 = vld [vmem:[%s6256_s9 + $0x248] sm:$0xff]  }
 0x311   :  { %v1156_v39 = vadd.f32 %v1155_v33, %v5549_v61  ;;  %v1229_v40 = vadd.f32 %v1228_v34, %v5562_v48  ;;  %v1157_v41 = vpop.f32.mrb[18].mxu1  ;;  %v1230_v44 = vpop.f32.mrb[26].mxu0  ;;  %2836 = vmatprep.mubr.bf16.mxu1 %v1734_v60  ;;  %2901 = vmatprep.mubr.bf16.mxu0 %v1736_v32 }
 0x312   :  { %v1158_v49 = vadd.f32 %v1157_v41, %v5535_v51  ;;  %v1231_v10 = vadd.f32 %v1230_v44, %v5542_v55  ;;  %v1159_v50 = vpop.f32.mrb[19].mxu1  ;;  %v1232_v42 = vpop.f32.mrb[27].mxu0  ;;  %2837 = vmatmul.mubr.bf16.gmra.mrb[76].mxu1 %v1733_v15  ;;  %2902 = vmatmul.mubr.bf16.gmra.mrb[84].mxu0 %v1735_v59  ;;  %v1561_v56 = vmax.f32 %v1154_v29, 0.0  ;;  %v1563_v57 = vmax.f32 %v1227_v31, 0.0  ;;  %v4543_v15 = vld [vmem:[%s6256_s9 + $0x280] sm:$0xff]   ;;  %v4545_v44 = vld [vmem:[%s6256_s9 + $0x208] sm:$0xff]  }
 0x313   :  { %v1160_v46 = vadd.f32 %v1159_v50, %v5549_v61  ;;  %v1233_v53 = vadd.f32 %v1232_v42, %v5562_v48  ;;  %4135 = vmatpush3.bf16.msra.mxu1 %v4533_v22  ;;  %4175 = vmatpush3.bf16.msra.mxu0 %v4535_v26  ;;  %v1562_v19 = vmax.f32 %v1156_v39, 0.0  ;;  %v1564_v17 = vmax.f32 %v1229_v40, 0.0  ;;  %v4546_v22 = vld [vmem:[%s6256_s9 + $0x2c8] sm:$0xff]  }
 0x314   :  { %v1577_v58 = vmax.f32 %v1158_v49, 0.0  ;;  %v1579_v47 = vmax.f32 %v1231_v10, 0.0  ;;  %4136 = vmatprep.subr.bf16.mxu1 %v4536_v37  ;;  %4176 = vmatprep.subr.bf16.mxu0 %v4538_v38  ;;  %v4547_v49 = vld [vmem:[%s6256_s9 + $0x288] sm:$0xff]  }
 0x315   :  { %v1578_v2 = vmax.f32 %v1160_v46, 0.0  ;;  %v1580_v35 = vmax.f32 %v1233_v53, 0.0  ;;  %v4548_v53 = vld [vmem:[%s6256_s9 + $0x250] sm:$0xff]  }
 0x316   :  { %v1689_v28 = vpack.c.bf16 %v1577_v58, %v1561_v56  ;;  %v1691_v36 = vpack.c.bf16 %v1579_v47, %v1563_v57 }
 0x317   :  { %v1690_v62 = vpack.c.bf16 %v1578_v2, %v1562_v19  ;;  %v1692_v6 = vpack.c.bf16 %v1580_v35, %v1564_v17  ;;  %4137 = vmatpush3.bf16.msra.mxu1 %v4537_v54  ;;  %v1163_v7 = vpop.f32.mrb[20].mxu1  ;;  %v1236_v12 = vpop.f32.mrb[28].mxu0  ;;  %4177 = vmatpush3.bf16.msra.mxu0 %v4539_v52  ;;  %v4550_v54 = vld [vmem:[%s6256_s9 + $0x2d0] sm:$0xff]  }
 0x318   :  { %v1164_v59 = vadd.f32 %v1163_v7, %v5535_v51  ;;  %v1237_v60 = vadd.f32 %v1236_v12, %v5542_v55  ;;  %v1165_v32 = vpop.f32.mrb[21].mxu1  ;;  %v1238_v20 = vpop.f32.mrb[29].mxu0  ;;  %4202 = vmatprep.subr.bf16.mxu1 %v4540_v27  ;;  %4242 = vmatprep.subr.bf16.mxu0 %v4542_v18  ;;  %v4549_v35 = vld [vmem:[%s6256_s9 + $0x210] sm:$0xff]   ;;  %v4552_v12 = vld [vmem:[%s6256_s9 + $0x258] sm:$0xff]  }
 0x319   :  { %v1166_v26 = vadd.f32 %v1165_v32, %v5549_v61  ;;  %v1239_v29 = vadd.f32 %v1238_v20, %v5562_v48  ;;  %v1167_v31 = vpop.f32.mrb[22].mxu1  ;;  %v1240_v33 = vpop.f32.mrb[30].mxu0  ;;  %2942 = vmatprep.mubr.bf16.mxu1 %v1690_v62  ;;  %3007 = vmatprep.mubr.bf16.mxu0 %v1692_v6 }
 0x31a   :  { %v1168_v34 = vadd.f32 %v1167_v31, %v5535_v51  ;;  %v1241_v37 = vadd.f32 %v1240_v33, %v5542_v55  ;;  %v1169_v38 = vpop.f32.mrb[23].mxu1  ;;  %v1242_v39 = vpop.f32.mrb[31].mxu0  ;;  %2943 = vmatmul.mubr.bf16.vlgmr.msra.gmra.mrb[80].mxu1 %v1689_v28  ;;  %3008 = vmatmul.mubr.bf16.vlgmr.msra.gmra.mrb[88].mxu0 %v1691_v36  ;;  %v1593_v10 = vmax.f32 %v1164_v59, 0.0  ;;  %v1595_v50 = vmax.f32 %v1237_v60, 0.0  ;;  %v4551_v28 = vld [vmem:[%s6256_s9 + $0x290] sm:$0xff]   ;;  %v4553_v33 = vld [vmem:[%s6256_s9 + $0x218] sm:$0xff]  }
 0x31b   :  { %v1170_v40 = vadd.f32 %v1169_v38, %v5549_v61  ;;  %v1243_v41 = vadd.f32 %v1242_v39, %v5562_v48  ;;  %4203 = vmatpush3.bf16.msra.mxu1 %v4541_v8  ;;  %4243 = vmatpush3.bf16.msra.mxu0 %v4543_v15  ;;  %v1594_v52 = vmax.f32 %v1166_v26, 0.0  ;;  %v1596_v56 = vmax.f32 %v1239_v29, 0.0  ;;  %v4554_v8 = vld [vmem:[%s6256_s9 + $0x2d8] sm:$0xff]  }
 0x31c   :  { %v1609_v42 = vmax.f32 %v1168_v34, 0.0  ;;  %v1611_v46 = vmax.f32 %v1241_v37, 0.0  ;;  %4204 = vmatprep.subr.bf16.mxu1 %v4544_v9  ;;  %4244 = vmatprep.subr.bf16.mxu0 %v4546_v22  ;;  %v4555_v34 = vld [vmem:[%s6256_s9 + $0x298] sm:$0xff]  }
 0x31d   :  { %v1610_v57 = vmax.f32 %v1170_v40, 0.0  ;;  %v1612_v58 = vmax.f32 %v1243_v41, 0.0  ;;  %v4556_v41 = vld [vmem:[%s6256_s9 + $0x260] sm:$0xff]  }
 0x31e   :  { %v1705_v47 = vpack.c.bf16 %v1609_v42, %v1593_v10  ;;  %v1707_v27 = vpack.c.bf16 %v1611_v46, %v1595_v50  ;;  %v5669_v46 = vld [vmem:[%s6255_s8 + $0x8] sm:$0xff] }
 0x31f   :  { %v1706_v18 = vpack.c.bf16 %v1610_v57, %v1594_v52  ;;  %v1708_v19 = vpack.c.bf16 %v1612_v58, %v1596_v56  ;;  %4205 = vmatpush3.bf16.msra.mxu1 %v4545_v44  ;;  %v1173_v17 = vpop.f32.mrb[24].mxu1  ;;  %v1246_v2 = vpop.f32.mrb[32].mxu0  ;;  %4245 = vmatpush3.bf16.msra.mxu0 %v4547_v49  ;;  %v4558_v44 = vld [vmem:[%s6256_s9 + $0x2e0] sm:$0xff]  }
 0x320   :  { %v1174_v36 = vadd.f32 %v1173_v17, %v5535_v51  ;;  %v1247_v62 = vadd.f32 %v1246_v2, %v5542_v55  ;;  %v1175_v6 = vpop.f32.mrb[25].mxu1  ;;  %v1248_v7 = vpop.f32.mrb[33].mxu0  ;;  %4206 = vmatprep.subr.bf16.mxu1 %v4548_v53  ;;  %4246 = vmatprep.subr.bf16.mxu0 %v4550_v54 }
 0x321   :  { %v1176_v15 = vadd.f32 %v1175_v6, %v5549_v61  ;;  %v1249_v59 = vadd.f32 %v1248_v7, %v5562_v48  ;;  %v1177_v60 = vpop.f32.mrb[26].mxu1  ;;  %v1250_v32 = vpop.f32.mrb[34].mxu0  ;;  %2950 = vmatprep.mubr.bf16.mxu1 %v1706_v18  ;;  %3015 = vmatprep.mubr.bf16.mxu0 %v1708_v19 }
 0x322   :  { %v1178_v20 = vadd.f32 %v1177_v60, %v5535_v51  ;;  %v1251_v9 = vadd.f32 %v1250_v32, %v5542_v55  ;;  %v1179_v22 = vpop.f32.mrb[27].mxu1  ;;  %v1252_v26 = vpop.f32.mrb[35].mxu0  ;;  %2951 = vmatmul.mubr.bf16.gmra.mrb[84].mxu1 %v1705_v47  ;;  %3016 = vmatmul.mubr.bf16.gmra.mrb[92].mxu0 %v1707_v27  ;;  %v1625_v37 = vmax.f32 %v1174_v36, 0.0  ;;  %v1627_v38 = vmax.f32 %v1247_v62, 0.0  ;;  %v4557_v47 = vld [vmem:[%s6256_s9 + $0x220] sm:$0xff]  }
 0x323   :  { %v1180_v29 = vadd.f32 %v1179_v22, %v5549_v61  ;;  %v1253_v31 = vadd.f32 %v1252_v26, %v5562_v48  ;;  %4207 = vmatpush3.bf16.msra.mxu1 %v4549_v35  ;;  %4247 = vmatpush3.bf16.msra.mxu0 %v4551_v28  ;;  %v1626_v49 = vmax.f32 %v1176_v15, 0.0  ;;  %v1628_v10 = vmax.f32 %v1249_v59, 0.0  ;;  %v4559_v27 = vld [vmem:[%s6256_s9 + $0x2a0] sm:$0xff]   ;;  %v4560_v35 = vld [vmem:[%s6256_s9 + $0x268] sm:$0xff]  }
 0x324   :  { %v1641_v39 = vmax.f32 %v1178_v20, 0.0  ;;  %v1643_v40 = vmax.f32 %v1251_v9, 0.0  ;;  %4208 = vmatprep.subr.bf16.mxu1 %v4552_v12  ;;  %4248 = vmatprep.subr.bf16.mxu0 %v4554_v8  ;;  %v4562_v28 = vld [vmem:[%s6256_s9 + $0x2e8] sm:$0xff]   ;;  %v5687_v36 = vrot.slane %v5669_v46, %v4826_v24  ;;  %v5694_v8 = vrot.slane %v5669_v46, %v571_v13 }
 0x325   :  { %v1642_v50 = vmax.f32 %v1180_v29, 0.0  ;;  %v1644_v42 = vmax.f32 %v1253_v31, 0.0  ;;  %v5700_v32 = vrot.slane %v5669_v46, %v4829_v25  ;;  %v4561_v13 = vld [vmem:[%s6256_s9 + $0x228] sm:$0xff]   ;;  %v4566_v29 = vld [vmem:[%s6256_s9 + $0x2f0] sm:$0xff]  }
 0x326   :  { %v1721_v53 = vpack.c.bf16 %v1641_v39, %v1625_v37  ;;  %v1723_v54 = vpack.c.bf16 %v1643_v40, %v1627_v38 }
 0x327   :  { %v1722_v52 = vpack.c.bf16 %v1642_v50, %v1626_v49  ;;  %v1724_v56 = vpack.c.bf16 %v1644_v42, %v1628_v10  ;;  %4209 = vmatpush3.bf16.msra.mxu1 %v4553_v33  ;;  %v1183_v57 = vpop.f32.mrb[28].mxu1  ;;  %v1256_v58 = vpop.f32.mrb[36].mxu0  ;;  %4249 = vmatpush3.bf16.msra.mxu0 %v4555_v34  ;;  %v4565_v49 = vld [vmem:[%s6256_s9 + $0x230] sm:$0xff]  }
 0x328   :  { %v1184_v18 = vadd.f32 %v1183_v57, %v5535_v51  ;;  %v1257_v19 = vadd.f32 %v1256_v58, %v5542_v55  ;;  %v1185_v17 = vpop.f32.mrb[29].mxu1  ;;  %v1258_v2 = vpop.f32.mrb[37].mxu0  ;;  %4210 = vmatprep.subr.bf16.mxu1 %v4556_v41  ;;  %4250 = vmatprep.subr.bf16.mxu0 %v4558_v44  ;;  %v4567_v10 = vld [vmem:[%s6256_s9 + $0x2b0] sm:$0xff]  }
 0x329   :  { %v1186_v62 = vadd.f32 %v1185_v17, %v5549_v61  ;;  %v1259_v6 = vadd.f32 %v1258_v2, %v5562_v48  ;;  %v1187_v7 = vpop.f32.mrb[30].mxu1  ;;  %v1260_v12 = vpop.f32.mrb[38].mxu0  ;;  %2958 = vmatprep.mubr.bf16.mxu1 %v1722_v52  ;;  %3023 = vmatprep.mubr.bf16.mxu0 %v1724_v56  ;;  %v4568_v52 = vld [vmem:[%s6256_s9 + $0x278] sm:$0xff]  }
 0x32a   :  { %v1188_v15 = vadd.f32 %v1187_v7, %v5535_v51  ;;  %v1261_v59 = vadd.f32 %v1260_v12, %v5542_v55  ;;  %v1189_v60 = vpop.f32.mrb[31].mxu1  ;;  %v1262_v24 = vpop.f32.mrb[39].mxu0  ;;  %2959 = vmatmul.mubr.bf16.gmra.mrb[88].mxu1 %v1721_v53  ;;  %3024 = vmatmul.mubr.bf16.gmra.mrb[96].mxu0 %v1723_v54  ;;  %v4563_v51 = vld [vmem:[%s6256_s9 + $0x2a8] sm:$0xff]   ;;  %v5713_v55 = vrot.slane %v5669_v46, %v575_v16  ;;  %v1657_v25 = vmax.f32 %v1184_v18, 0.0  ;;  %v4570_v56 = vld [vmem:[%s6256_s9 + $0x2f8] sm:$0xff]  }
 0x32b   :  { %v1190_v20 = vadd.f32 %v1189_v60, %v5549_v61  ;;  %v1263_v9 = vadd.f32 %v1262_v24, %v5562_v48  ;;  %4211 = vmatpush3.bf16.msra.mxu1 %v4557_v47  ;;  %4251 = vmatpush3.bf16.msra.mxu0 %v4559_v27  ;;  %v1659_v22 = vmax.f32 %v1257_v19, 0.0  ;;  %v4564_v48 = vld [vmem:[%s6256_s9 + $0x270] sm:$0xff]   ;;  %v1658_v31 = vmax.f32 %v1186_v62, 0.0  ;;  %v4569_v62 = vld [vmem:[%s6256_s9 + $0x238] sm:$0xff]   ;;  %v4572_v60 = vld [vmem:[%s6256_s9 + $0x340] sm:$0xff]  }
 0x32c   :  { %v1673_v61 = vmax.f32 %v1188_v15, 0.0  ;;  %v1675_v26 = vmax.f32 %v1261_v59, 0.0  ;;  %4212 = vmatprep.subr.bf16.mxu1 %v4560_v35  ;;  %4252 = vmatprep.subr.bf16.mxu0 %v4562_v28  ;;  %v1660_v33 = vmax.f32 %v1259_v6, 0.0  ;;  %v4571_v6 = vld [vmem:[%s6256_s9 + $0x2b8] sm:$0xff]   ;;  %v4574_v24 = vld [vmem:[%s6256_s9 + $0x3c0] sm:$0xff]  }
 0x32d   :  { %v1674_v34 = vmax.f32 %v1190_v20, 0.0  ;;  %v1676_v37 = vmax.f32 %v1263_v9, 0.0 }
 0x32e   :  { %v1737_v16 = vpack.c.bf16 %v1673_v61, %v1657_v25  ;;  %v1739_v38 = vpack.c.bf16 %v1675_v26, %v1659_v22 }
 0x32f   :  { %v1738_v39 = vpack.c.bf16 %v1674_v34, %v1658_v31  ;;  %v1740_v40 = vpack.c.bf16 %v1676_v37, %v1660_v33  ;;  %4213 = vmatpush3.bf16.msra.mxu1 %v4561_v13  ;;  %v1299_v41 = vpop.f32.mrb[32].mxu1  ;;  %v1372_v44 = vpop.f32.mrb[40].mxu0  ;;  %4253 = vmatpush3.bf16.msra.mxu0 %v4563_v51  ;;  %v4573_v31 = vld [vmem:[%s6256_s9 + $0x300] sm:$0xff]  }
 0x330   :  { %v1300_v50 = vadd.f32 %v1299_v41, %v5687_v36  ;;  %v1373_v42 = vadd.f32 %v1372_v44, %v5694_v8  ;;  %v1301_v53 = vpop.f32.mrb[33].mxu1  ;;  %v1374_v54 = vpop.f32.mrb[41].mxu0  ;;  %4214 = vmatprep.subr.bf16.mxu1 %v4564_v48  ;;  %4254 = vmatprep.subr.bf16.mxu0 %v4566_v29  ;;  %v4575_v33 = vld [vmem:[%s6256_s9 + $0x380] sm:$0xff]  }
 0x331   :  { %v1302_v57 = vadd.f32 %v1301_v53, %v5700_v32  ;;  %v1375_v58 = vadd.f32 %v1374_v54, %v5713_v55  ;;  %v1303_v47 = vpop.f32.mrb[34].mxu1  ;;  %v1376_v27 = vpop.f32.mrb[42].mxu0  ;;  %2966 = vmatprep.mubr.bf16.mxu1 %v1738_v39  ;;  %3031 = vmatprep.mubr.bf16.mxu0 %v1740_v40  ;;  %v4576_v39 = vld [vmem:[%s6256_s9 + $0x348] sm:$0xff]  }
 0x332   :  { %v1304_v18 = vadd.f32 %v1303_v47, %v5687_v36  ;;  %v1377_v19 = vadd.f32 %v1376_v27, %v5694_v8  ;;  %v1305_v17 = vpop.f32.mrb[35].mxu1  ;;  %v1378_v2 = vpop.f32.mrb[43].mxu0  ;;  %2967 = vmatmul.mubr.bf16.gmra.mrb[92].mxu1 %v1737_v16  ;;  %3032 = vmatmul.mubr.bf16.gmra.mrb[100].mxu0 %v1739_v38  ;;  %v1565_v7 = vmax.f32 %v1300_v50, 0.0  ;;  %v1567_v12 = vmax.f32 %v1373_v42, 0.0  ;;  %v4578_v40 = vld [vmem:[%s6256_s9 + $0x3c8] sm:$0xff]  }
 0x333   :  { %v1306_v35 = vadd.f32 %v1305_v17, %v5700_v32  ;;  %v1379_v28 = vadd.f32 %v1378_v2, %v5713_v55  ;;  %4215 = vmatpush3.bf16.msra.mxu1 %v4565_v49  ;;  %4255 = vmatpush3.bf16.msra.mxu0 %v4567_v10  ;;  %v1566_v20 = vmax.f32 %v1302_v57, 0.0  ;;  %v1568_v9 = vmax.f32 %v1375_v58, 0.0  ;;  %v4577_v57 = vld [vmem:[%s6256_s9 + $0x308] sm:$0xff]   ;;  %v4580_v17 = vld [vmem:[%s6256_s9 + $0x350] sm:$0xff]  }
 0x334   :  { %v1581_v15 = vmax.f32 %v1304_v18, 0.0  ;;  %v1583_v59 = vmax.f32 %v1377_v19, 0.0  ;;  %4216 = vmatprep.subr.bf16.mxu1 %v4568_v52  ;;  %4256 = vmatprep.subr.bf16.mxu0 %v4570_v56  ;;  %v4579_v58 = vld [vmem:[%s6256_s9 + $0x388] sm:$0xff]   ;;  %v4582_v2 = vld [vmem:[%s6256_s9 + $0x3d0] sm:$0xff]  }
 0x335   :  { %v1582_v13 = vmax.f32 %v1306_v35, 0.0  ;;  %v1584_v51 = vmax.f32 %v1379_v28, 0.0 }
 0x336   :  { %v1693_v25 = vpack.c.bf16 %v1581_v15, %v1565_v7  ;;  %v1695_v22 = vpack.c.bf16 %v1583_v59, %v1567_v12 }
 0x337   :  { %v1694_v61 = vpack.c.bf16 %v1582_v13, %v1566_v20  ;;  %v1696_v26 = vpack.c.bf16 %v1584_v51, %v1568_v9  ;;  %4217 = vmatpush3.bf16.msra.mxu1 %v4569_v62  ;;  %v1309_v48 = vpop.f32.mrb[36].mxu1  ;;  %v1382_v29 = vpop.f32.mrb[44].mxu0  ;;  %4257 = vmatpush3.bf16.msra.mxu0 %v4571_v6  ;;  %v4581_v20 = vld [vmem:[%s6256_s9 + $0x310] sm:$0xff]  }
 0x338   :  { %v1310_v34 = vadd.f32 %v1309_v48, %v5687_v36  ;;  %v1383_v37 = vadd.f32 %v1382_v29, %v5694_v8  ;;  %v1311_v16 = vpop.f32.mrb[37].mxu1  ;;  %v1384_v38 = vpop.f32.mrb[45].mxu0  ;;  %4282 = vmatprep.subr.bf16.mxu1 %v4572_v60  ;;  %4322 = vmatprep.subr.bf16.mxu0 %v4574_v24  ;;  %v4583_v9 = vld [vmem:[%s6256_s9 + $0x390] sm:$0xff]  }
 0x339   :  { %v1312_v41 = vadd.f32 %v1311_v16, %v5700_v32  ;;  %v1385_v44 = vadd.f32 %v1384_v38, %v5713_v55  ;;  %v1313_v49 = vpop.f32.mrb[38].mxu1  ;;  %v1386_v10 = vpop.f32.mrb[46].mxu0  ;;  %3072 = vmatprep.mubr.bf16.mxu1 %v1694_v61  ;;  %3137 = vmatprep.mubr.bf16.mxu0 %v1696_v26  ;;  %v4584_v61 = vld [vmem:[%s6256_s9 + $0x358] sm:$0xff]  }
 0x33a   :  { %v1314_v50 = vadd.f32 %v1313_v49, %v5687_v36  ;;  %v1387_v42 = vadd.f32 %v1386_v10, %v5694_v8  ;;  %v1315_v53 = vpop.f32.mrb[39].mxu1  ;;  %v1388_v54 = vpop.f32.mrb[47].mxu0  ;;  %3073 = vmatmul.mubr.bf16.vlgmr.msra.gmra.mrb[96].mxu1 %v1693_v25  ;;  %3138 = vmatmul.mubr.bf16.vlgmr.msra.gmra.mrb[104].mxu0 %v1695_v22  ;;  %v1597_v47 = vmax.f32 %v1310_v34, 0.0  ;;  %v1599_v27 = vmax.f32 %v1383_v37, 0.0  ;;  %v4586_v26 = vld [vmem:[%s6256_s9 + $0x3d8] sm:$0xff]  }
 0x33b   :  { %v1316_v52 = vadd.f32 %v1315_v53, %v5700_v32  ;;  %v1389_v56 = vadd.f32 %v1388_v54, %v5713_v55  ;;  %4283 = vmatpush3.bf16.msra.mxu1 %v4573_v31  ;;  %4323 = vmatpush3.bf16.msra.mxu0 %v4575_v33  ;;  %v1598_v35 = vmax.f32 %v1312_v41, 0.0  ;;  %v1600_v28 = vmax.f32 %v1385_v44, 0.0  ;;  %v4585_v41 = vld [vmem:[%s6256_s9 + $0x318] sm:$0xff]   ;;  %v4588_v53 = vld [vmem:[%s6256_s9 + $0x360] sm:$0xff]  }
 0x33c   :  { %v1613_v18 = vmax.f32 %v1314_v50, 0.0  ;;  %v1615_v19 = vmax.f32 %v1387_v42, 0.0  ;;  %4284 = vmatprep.subr.bf16.mxu1 %v4576_v39  ;;  %4324 = vmatprep.subr.bf16.mxu0 %v4578_v40  ;;  %v4587_v44 = vld [vmem:[%s6256_s9 + $0x398] sm:$0xff]   ;;  %v4590_v54 = vld [vmem:[%s6256_s9 + $0x3e0] sm:$0xff]  }
 0x33d   :  { %v1614_v62 = vmax.f32 %v1316_v52, 0.0  ;;  %v1616_v6 = vmax.f32 %v1389_v56, 0.0 }
 0x33e   :  { %v1709_v7 = vpack.c.bf16 %v1613_v18, %v1597_v47  ;;  %v1711_v12 = vpack.c.bf16 %v1615_v19, %v1599_v27 }
 0x33f   :  { %v1710_v15 = vpack.c.bf16 %v1614_v62, %v1598_v35  ;;  %v1712_v59 = vpack.c.bf16 %v1616_v6, %v1600_v28  ;;  %4285 = vmatpush3.bf16.msra.mxu1 %v4577_v57  ;;  %v1319_v60 = vpop.f32.mrb[40].mxu1  ;;  %v1392_v24 = vpop.f32.mrb[48].mxu0  ;;  %4325 = vmatpush3.bf16.msra.mxu0 %v4579_v58  ;;  %v4589_v35 = vld [vmem:[%s6256_s9 + $0x320] sm:$0xff]  }
 0x340   :  { %v1320_v13 = vadd.f32 %v1319_v60, %v5687_v36  ;;  %v1393_v51 = vadd.f32 %v1392_v24, %v5694_v8  ;;  %v1321_v25 = vpop.f32.mrb[41].mxu1  ;;  %v1394_v22 = vpop.f32.mrb[49].mxu0  ;;  %4286 = vmatprep.subr.bf16.mxu1 %v4580_v17  ;;  %4326 = vmatprep.subr.bf16.mxu0 %v4582_v2  ;;  %v4591_v28 = vld [vmem:[%s6256_s9 + $0x3a0] sm:$0xff]   ;;  %v5834_v60 = vrot.slane %v5669_v46, %v579_v0 }
 0x341   :  { %v1322_v48 = vadd.f32 %v1321_v25, %v5700_v32  ;;  %v1395_v29 = vadd.f32 %v1394_v22, %v5713_v55  ;;  %v1323_v31 = vpop.f32.mrb[42].mxu1  ;;  %v1396_v33 = vpop.f32.mrb[50].mxu0  ;;  %3080 = vmatprep.mubr.bf16.mxu1 %v1710_v15  ;;  %3145 = vmatprep.mubr.bf16.mxu0 %v1712_v59  ;;  %v4592_v15 = vld [vmem:[%s6256_s9 + $0x368] sm:$0xff]  }
 0x342   :  { %v1324_v34 = vadd.f32 %v1323_v31, %v5687_v36  ;;  %v1397_v37 = vadd.f32 %v1396_v33, %v5694_v8  ;;  %v1325_v16 = vpop.f32.mrb[43].mxu1  ;;  %v1398_v38 = vpop.f32.mrb[51].mxu0  ;;  %3081 = vmatmul.mubr.bf16.gmra.mrb[100].mxu1 %v1709_v7  ;;  %3146 = vmatmul.mubr.bf16.gmra.mrb[108].mxu0 %v1711_v12  ;;  %v1629_v49 = vmax.f32 %v1320_v13, 0.0  ;;  %v1631_v10 = vmax.f32 %v1393_v51, 0.0  ;;  %v4594_v59 = vld [vmem:[%s6256_s9 + $0x3e8] sm:$0xff]  }
 0x343   :  { %v1326_v39 = vadd.f32 %v1325_v16, %v5700_v32  ;;  %v1399_v40 = vadd.f32 %v1398_v38, %v5713_v55  ;;  %4287 = vmatpush3.bf16.msra.mxu1 %v4581_v20  ;;  %4327 = vmatpush3.bf16.msra.mxu0 %v4583_v9  ;;  %v1630_v52 = vmax.f32 %v1322_v48, 0.0  ;;  %v1632_v56 = vmax.f32 %v1395_v29, 0.0 }
 0x344   :  { %v1645_v50 = vmax.f32 %v1324_v34, 0.0  ;;  %v1647_v42 = vmax.f32 %v1397_v37, 0.0  ;;  %4288 = vmatprep.subr.bf16.mxu1 %v4584_v61  ;;  %4328 = vmatprep.subr.bf16.mxu0 %v4586_v26  ;;  %v5841_v51 = vrot.slane %v5669_v46, %v587_v1  ;;  %v5848_v26 = vrot.slane %v5669_v46, %v583_v30  ;;  %v4593_v1 = vld [vmem:[%s6256_s9 + $0x328] sm:$0xff]   ;;  %v4598_v34 = vld [vmem:[%s6256_s9 + $0x3f0] sm:$0xff]  }
 0x345   :  { %v1646_v57 = vmax.f32 %v1326_v39, 0.0  ;;  %v1648_v58 = vmax.f32 %v1399_v40, 0.0 }
 0x346   :  { %v1725_v47 = vpack.c.bf16 %v1645_v50, %v1629_v49  ;;  %v1727_v27 = vpack.c.bf16 %v1647_v42, %v1631_v10  ;;  %v4597_v49 = vld [vmem:[%s6256_s9 + $0x330] sm:$0xff]  }
 0x347   :  { %v1726_v18 = vpack.c.bf16 %v1646_v57, %v1630_v52  ;;  %v1728_v19 = vpack.c.bf16 %v1648_v58, %v1632_v56  ;;  %4289 = vmatpush3.bf16.msra.mxu1 %v4585_v41  ;;  %v1329_v17 = vpop.f32.mrb[44].mxu1  ;;  %v1402_v2 = vpop.f32.mrb[52].mxu0  ;;  %4329 = vmatpush3.bf16.msra.mxu0 %v4587_v44  ;;  %v4599_v10 = vld [vmem:[%s6256_s9 + $0x3b0] sm:$0xff]   ;;  %v4600_v52 = vld [vmem:[%s6256_s9 + $0x378] sm:$0xff]  }
 0x348   :  { %v1330_v62 = vadd.f32 %v1329_v17, %v5687_v36  ;;  %v1403_v6 = vadd.f32 %v1402_v2, %v5694_v8  ;;  %v1331_v7 = vpop.f32.mrb[45].mxu1  ;;  %v1404_v12 = vpop.f32.mrb[53].mxu0  ;;  %4290 = vmatprep.subr.bf16.mxu1 %v4588_v53  ;;  %4330 = vmatprep.subr.bf16.mxu0 %v4590_v54  ;;  %v4602_v56 = vld [vmem:[%s6256_s9 + $0x3f8] sm:$0xff]  }
 0x349   :  { %v1332_v24 = vadd.f32 %v1331_v7, %v5700_v32  ;;  %v1405_v20 = vadd.f32 %v1404_v12, %v5713_v55  ;;  %v1333_v9 = vpop.f32.mrb[46].mxu1  ;;  %v1406_v13 = vpop.f32.mrb[54].mxu0  ;;  %3088 = vmatprep.mubr.bf16.mxu1 %v1726_v18  ;;  %3153 = vmatprep.mubr.bf16.mxu0 %v1728_v19 }
 0x34a   :  { %v1334_v25 = vadd.f32 %v1333_v9, %v5687_v36  ;;  %v1407_v22 = vadd.f32 %v1406_v13, %v5694_v8  ;;  %v1335_v61 = vpop.f32.mrb[47].mxu1  ;;  %v1408_v0 = vpop.f32.mrb[55].mxu0  ;;  %3089 = vmatmul.mubr.bf16.gmra.mrb[104].mxu1 %v1725_v47  ;;  %3154 = vmatmul.mubr.bf16.gmra.mrb[112].mxu0 %v1727_v27  ;;  %v4595_v36 = vld [vmem:[%s6256_s9 + $0x3a8] sm:$0xff]   ;;  %v5861_v8 = vrot.slane %v5669_v46, %v591_v21  ;;  %v1661_v30 = vmax.f32 %v1330_v62, 0.0  ;;  %v4601_v62 = vld [vmem:[%s6256_s9 + $0x338] sm:$0xff]  }
 0x34b   :  { %v1336_v48 = vadd.f32 %v1335_v61, %v5700_v32  ;;  %v1409_v29 = vadd.f32 %v1408_v0, %v5713_v55  ;;  %4291 = vmatpush3.bf16.msra.mxu1 %v4589_v35  ;;  %4331 = vmatpush3.bf16.msra.mxu0 %v4591_v28  ;;  %v1663_v31 = vmax.f32 %v1403_v6, 0.0  ;;  %v4596_v55 = vld [vmem:[%s6256_s9 + $0x370] sm:$0xff]   ;;  %v1662_v37 = vmax.f32 %v1332_v24, 0.0  ;;  %v4603_v6 = vld [vmem:[%s6256_s9 + $0x3b8] sm:$0xff]  }
 0x34c   :  { %v1677_v32 = vmax.f32 %v1334_v25, 0.0  ;;  %v1679_v33 = vmax.f32 %v1407_v22, 0.0  ;;  %4292 = vmatprep.subr.bf16.mxu1 %v4592_v15  ;;  %4332 = vmatprep.subr.bf16.mxu0 %v4594_v59  ;;  %v1664_v16 = vmax.f32 %v1405_v20, 0.0 }
 0x34d   :  { %v1678_v23 = vmax.f32 %v1336_v48, 0.0  ;;  %v1680_v38 = vmax.f32 %v1409_v29, 0.0 }
 0x34e   :  { %v1741_v21 = vpack.c.bf16 %v1677_v32, %v1661_v30  ;;  %v1743_v46 = vpack.c.bf16 %v1679_v33, %v1663_v31 }
 0x34f   :  { %v1742_v39 = vpack.c.bf16 %v1678_v23, %v1662_v37  ;;  %v1744_v40 = vpack.c.bf16 %v1680_v38, %v1664_v16  ;;  %4293 = vmatpush3.bf16.msra.mxu1 %v4593_v1  ;;  %v1445_v41 = vpop.f32.mrb[48].mxu1  ;;  %v1518_v44 = vpop.f32.mrb[56].mxu0  ;;  %4333 = vmatpush3.bf16.msra.mxu0 %v4595_v36 }
 0x350   :  { %v1446_v50 = vadd.f32 %v1445_v41, %v5834_v60  ;;  %v1519_v42 = vadd.f32 %v1518_v44, %v5841_v51  ;;  %v1447_v53 = vpop.f32.mrb[49].mxu1  ;;  %v1520_v54 = vpop.f32.mrb[57].mxu0  ;;  %4294 = vmatprep.subr.bf16.mxu1 %v4596_v55  ;;  %4334 = vmatprep.subr.bf16.mxu0 %v4598_v34 }
 0x351   :  { %v1448_v57 = vadd.f32 %v1447_v53, %v5848_v26  ;;  %v1521_v58 = vadd.f32 %v1520_v54, %v5861_v8  ;;  %v1449_v47 = vpop.f32.mrb[50].mxu1  ;;  %v1522_v27 = vpop.f32.mrb[58].mxu0  ;;  %3096 = vmatprep.mubr.bf16.mxu1 %v1742_v39  ;;  %3161 = vmatprep.mubr.bf16.mxu0 %v1744_v40 }
 0x352   :  { %v1450_v18 = vadd.f32 %v1449_v47, %v5834_v60  ;;  %v1523_v19 = vadd.f32 %v1522_v27, %v5841_v51  ;;  %v1451_v17 = vpop.f32.mrb[51].mxu1  ;;  %v1524_v2 = vpop.f32.mrb[59].mxu0  ;;  %3097 = vmatmul.mubr.bf16.gmra.mrb[108].mxu1 %v1741_v21  ;;  %3162 = vmatmul.mubr.bf16.gmra.mrb[116].mxu0 %v1743_v46  ;;  %v1569_v7 = vmax.f32 %v1446_v50, 0.0  ;;  %v1571_v12 = vmax.f32 %v1519_v42, 0.0 }
 0x353   :  { %v1452_v35 = vadd.f32 %v1451_v17, %v5848_v26  ;;  %v1525_v28 = vadd.f32 %v1524_v2, %v5861_v8  ;;  %4295 = vmatpush3.bf16.msra.mxu1 %v4597_v49  ;;  %4335 = vmatpush3.bf16.msra.mxu0 %v4599_v10  ;;  %v1570_v24 = vmax.f32 %v1448_v57, 0.0  ;;  %v1572_v20 = vmax.f32 %v1521_v58, 0.0 }
 0x354   :  { %v1585_v15 = vmax.f32 %v1450_v18, 0.0  ;;  %v1587_v59 = vmax.f32 %v1523_v19, 0.0  ;;  %4296 = vmatprep.subr.bf16.mxu1 %v4600_v52  ;;  %4336 = vmatprep.subr.bf16.mxu0 %v4602_v56 }
 0x355   :  { %v1586_v9 = vmax.f32 %v1452_v35, 0.0  ;;  %v1588_v13 = vmax.f32 %v1525_v28, 0.0 }
 0x356   :  { %v1697_v25 = vpack.c.bf16 %v1585_v15, %v1569_v7  ;;  %v1699_v22 = vpack.c.bf16 %v1587_v59, %v1571_v12 }
 0x357   :  { %v1698_v61 = vpack.c.bf16 %v1586_v9, %v1570_v24  ;;  %v1700_v0 = vpack.c.bf16 %v1588_v13, %v1572_v20  ;;  %4297 = vmatpush3.bf16.msra.mxu1 %v4601_v62  ;;  %v1455_v48 = vpop.f32.mrb[52].mxu1  ;;  %v1528_v29 = vpop.f32.mrb[60].mxu0  ;;  %4337 = vmatpush3.bf16.msra.mxu0 %v4603_v6 }
 0x358   :  { %v1456_v1 = vadd.f32 %v1455_v48, %v5834_v60  ;;  %v1529_v36 = vadd.f32 %v1528_v29, %v5841_v51  ;;  %v1457_v30 = vpop.f32.mrb[53].mxu1  ;;  %v1530_v31 = vpop.f32.mrb[61].mxu0 }
 0x359   :  { %v1458_v32 = vadd.f32 %v1457_v30, %v5848_v26  ;;  %v1531_v33 = vadd.f32 %v1530_v31, %v5861_v8  ;;  %v1459_v55 = vpop.f32.mrb[54].mxu1  ;;  %v1532_v34 = vpop.f32.mrb[62].mxu0  ;;  %3202 = vmatprep.mubr.bf16.mxu1 %v1698_v61  ;;  %3267 = vmatprep.mubr.bf16.mxu0 %v1700_v0 }
 0x35a   :  { %v1460_v37 = vadd.f32 %v1459_v55, %v5834_v60  ;;  %v1533_v16 = vadd.f32 %v1532_v34, %v5841_v51  ;;  %v1461_v23 = vpop.f32.mrb[55].mxu1  ;;  %v1534_v38 = vpop.f32.mrb[63].mxu0  ;;  %3203 = vmatmul.mubr.bf16.vlgmr.msra.gmra.mrb[112].mxu1 %v1697_v25  ;;  %3268 = vmatmul.mubr.bf16.vlgmr.msra.gmra.mrb[120].mxu0 %v1699_v22  ;;  %v1601_v39 = vmax.f32 %v1456_v1, 0.0  ;;  %v1603_v40 = vmax.f32 %v1529_v36, 0.0 }
 0x35b   :  { %v1462_v21 = vadd.f32 %v1461_v23, %v5848_v26  ;;  %v1535_v46 = vadd.f32 %v1534_v38, %v5861_v8  ;;  %v1602_v49 = vmax.f32 %v1458_v32, 0.0  ;;  %v1604_v10 = vmax.f32 %v1531_v33, 0.0 }
 0x35c   :  { %v1617_v41 = vmax.f32 %v1460_v37, 0.0  ;;  %v1619_v44 = vmax.f32 %v1533_v16, 0.0 }
 0x35d   :  { %v1618_v50 = vmax.f32 %v1462_v21, 0.0  ;;  %v1620_v42 = vmax.f32 %v1535_v46, 0.0 }
 0x35e   :  { %v1713_v53 = vpack.c.bf16 %v1617_v41, %v1601_v39  ;;  %v1715_v54 = vpack.c.bf16 %v1619_v44, %v1603_v40 }
 0x35f   :  { %v1714_v52 = vpack.c.bf16 %v1618_v50, %v1602_v49  ;;  %v1716_v56 = vpack.c.bf16 %v1620_v42, %v1604_v10  ;;  %v1465_v57 = vpop.f32.mrb[56].mxu1  ;;  %v1538_v58 = vpop.f32.mrb[64].mxu0 }
 0x360   :  { %v1466_v47 = vadd.f32 %v1465_v57, %v5834_v60  ;;  %v1539_v27 = vadd.f32 %v1538_v58, %v5841_v51  ;;  %v1467_v18 = vpop.f32.mrb[57].mxu1  ;;  %v1540_v19 = vpop.f32.mrb[65].mxu0 }
 0x361   :  { %v1468_v17 = vadd.f32 %v1467_v18, %v5848_v26  ;;  %v1541_v2 = vadd.f32 %v1540_v19, %v5861_v8  ;;  %v1469_v35 = vpop.f32.mrb[58].mxu1  ;;  %v1542_v28 = vpop.f32.mrb[66].mxu0  ;;  %3210 = vmatprep.mubr.bf16.mxu1 %v1714_v52  ;;  %3275 = vmatprep.mubr.bf16.mxu0 %v1716_v56 }
 0x362   :  { %v1470_v62 = vadd.f32 %v1469_v35, %v5834_v60  ;;  %v1543_v6 = vadd.f32 %v1542_v28, %v5841_v51  ;;  %v1471_v7 = vpop.f32.mrb[59].mxu1  ;;  %v1544_v12 = vpop.f32.mrb[67].mxu0  ;;  %3211 = vmatmul.mubr.bf16.gmra.mrb[116].mxu1 %v1713_v53  ;;  %3276 = vmatmul.mubr.bf16.gmra.mrb[124].mxu0 %v1715_v54  ;;  %v1633_v24 = vmax.f32 %v1466_v47, 0.0  ;;  %v1635_v20 = vmax.f32 %v1539_v27, 0.0 }
 0x363   :  { %v1472_v15 = vadd.f32 %v1471_v7, %v5848_v26  ;;  %v1545_v59 = vadd.f32 %v1544_v12, %v5861_v8  ;;  %v1634_v25 = vmax.f32 %v1468_v17, 0.0  ;;  %v1636_v22 = vmax.f32 %v1541_v2, 0.0 }
 0x364   :  { %v1649_v9 = vmax.f32 %v1470_v62, 0.0  ;;  %v1651_v13 = vmax.f32 %v1543_v6, 0.0 }
 0x365   :  { %v1650_v61 = vmax.f32 %v1472_v15, 0.0  ;;  %v1652_v0 = vmax.f32 %v1545_v59, 0.0 }
 0x366   :  { %v1729_v48 = vpack.c.bf16 %v1649_v9, %v1633_v24  ;;  %v1731_v29 = vpack.c.bf16 %v1651_v13, %v1635_v20 }
 0x367   :  { %v1730_v1 = vpack.c.bf16 %v1650_v61, %v1634_v25  ;;  %v1732_v36 = vpack.c.bf16 %v1652_v0, %v1636_v22  ;;  %v1475_v30 = vpop.f32.mrb[60].mxu1  ;;  %v1548_v31 = vpop.f32.mrb[68].mxu0 }
 0x368   :  { %v1476_v32 = vadd.f32 %v1475_v30, %v5834_v60  ;;  %v1549_v33 = vadd.f32 %v1548_v31, %v5841_v51  ;;  %v1477_v55 = vpop.f32.mrb[61].mxu1  ;;  %v1550_v34 = vpop.f32.mrb[69].mxu0 }
 0x369   :  { %v1478_v37 = vadd.f32 %v1477_v55, %v5848_v26  ;;  %v1551_v16 = vadd.f32 %v1550_v34, %v5861_v8  ;;  %v1479_v23 = vpop.f32.mrb[62].mxu1  ;;  %v1552_v38 = vpop.f32.mrb[70].mxu0  ;;  %3218 = vmatprep.mubr.bf16.mxu1 %v1730_v1  ;;  %3283 = vmatprep.mubr.bf16.mxu0 %v1732_v36 }
 0x36a   :  { %v1480_v21 = vadd.f32 %v1479_v23, %v5834_v60  ;;  %v1553_v46 = vadd.f32 %v1552_v38, %v5841_v51  ;;  %v1481_v39 = vpop.f32.mrb[63].mxu1  ;;  %v1554_v40 = vpop.f32.mrb[71].mxu0  ;;  %3219 = vmatmul.mubr.bf16.gmra.mrb[120].mxu1 %v1729_v48  ;;  %3284 = vmatmul.mubr.bf16.gmra.mrb[128].mxu0 %v1731_v29  ;;  %v1665_v49 = vmax.f32 %v1476_v32, 0.0  ;;  %v1667_v10 = vmax.f32 %v1549_v33, 0.0 }
 0x36b   :  { %v1482_v41 = vadd.f32 %v1481_v39, %v5848_v26  ;;  %v1555_v44 = vadd.f32 %v1554_v40, %v5861_v8  ;;  %v1666_v53 = vmax.f32 %v1478_v37, 0.0  ;;  %v1668_v54 = vmax.f32 %v1551_v16, 0.0  ;;  %v3884_v8 = vld [vmem:[%s6257_s10] ss:$0 sm:$0xff] }
 0x36c   :  { %v1681_v50 = vmax.f32 %v1480_v21, 0.0  ;;  %v1683_v42 = vmax.f32 %v1553_v46, 0.0 }
 0x36d   :  { %v1682_v52 = vmax.f32 %v1482_v41, 0.0  ;;  %v1684_v56 = vmax.f32 %v1555_v44, 0.0 }
 0x36e   :  { %v1745_v57 = vpack.c.bf16 %v1681_v50, %v1665_v49  ;;  %v1747_v60 = vpack.c.bf16 %v1683_v42, %v1667_v10 }
 0x36f   :  { %v1746_v58 = vpack.c.bf16 %v1682_v52, %v1666_v53  ;;  %v1748_v51 = vpack.c.bf16 %v1684_v56, %v1668_v54 }
 0x371   :  { %3226 = vmatprep.mubr.bf16.mxu1 %v1746_v58  ;;  %3291 = vmatprep.mubr.bf16.mxu0 %v1748_v51 }
 0x372   :  { %3227 = vmatmul.mubr.bf16.gmra.mrb[124].mxu1 %v1745_v57  ;;  %3292 = vmatmul.mubr.bf16.gmra.mrb[132].mxu0 %v1747_v60 }
 0x3cc   :  { %v4058_v47 = vpop.f32.mrb[64].mxu1  ;;  %v4098_v26 = vpop.f32.mrb[72].mxu0 }
 0x3cd   :  { %v4059_v27 = vpop.f32.mrb[65].mxu1  ;;  %v4099_v18 = vpop.f32.mrb[73].mxu0 }
 0x3ce   :  { %v4060_v19 = vadd.f32 %v4059_v27, %v4058_v47  ;;  %v4100_v17 = vadd.f32 %v4099_v18, %v4098_v26  ;;  %v4061_v2 = vpop.f32.mrb[66].mxu1  ;;  %v4101_v35 = vpop.f32.mrb[74].mxu0 }
 0x3cf   :  { %v4062_v28 = vpop.f32.mrb[67].mxu1  ;;  %v4102_v62 = vpop.f32.mrb[75].mxu0 }
 0x3d0   :  { %v2815_v6 = vadd.f32 %v4060_v19, %v3884_v8  ;;  %v4063_v7 = vadd.f32 %v4062_v28, %v4061_v2  ;;  %v4103_v12 = vadd.f32 %v4102_v62, %v4101_v35 }
 0x3d2   :  { %v2880_v15 = vadd.f32 %v4100_v17, %v2815_v6  ;;  %v2818_v59 = vadd.f32 %v4063_v7, %v3884_v8 }
 0x3d4   :  { %v5922_v24 = vadd.f32 %v4103_v12, %v2818_v59 }
 0x3d5   :  { %v4064_v20 = vpop.f32.mrb[68].mxu1  ;;  %v4104_v9 = vpop.f32.mrb[76].mxu0 }
 0x3d6   :  { %v4065_v13 = vpop.f32.mrb[69].mxu1  ;;  %v4105_v25 = vpop.f32.mrb[77].mxu0 }
 0x3d7   :  { %v4066_v22 = vadd.f32 %v4065_v13, %v4064_v20  ;;  %v4106_v61 = vadd.f32 %v4105_v25, %v4104_v9  ;;  %v4067_v0 = vpop.f32.mrb[70].mxu1  ;;  %v4107_v48 = vpop.f32.mrb[78].mxu0 }
 0x3d8   :  { %v4068_v29 = vpop.f32.mrb[71].mxu1  ;;  %v4108_v1 = vpop.f32.mrb[79].mxu0 }
 0x3d9   :  { %v2823_v36 = vadd.f32 %v4066_v22, %v3884_v8  ;;  %v4069_v30 = vadd.f32 %v4068_v29, %v4067_v0  ;;  %v4109_v31 = vadd.f32 %v4108_v1, %v4107_v48 }
 0x3db   :  { %v2888_v32 = vadd.f32 %v4106_v61, %v2823_v36  ;;  %v2826_v33 = vadd.f32 %v4069_v30, %v3884_v8 }
 0x3dd   :  { %v5924_v55 = vadd.f32 %v4109_v31, %v2826_v33  ;;  %v4070_v34 = vpop.f32.mrb[72].mxu1  ;;  %v4110_v37 = vpop.f32.mrb[80].mxu0 }
 0x3de   :  { %v4071_v16 = vpop.f32.mrb[73].mxu1  ;;  %v4111_v23 = vpop.f32.mrb[81].mxu0 }
 0x3df   :  { %v4072_v38 = vadd.f32 %v4071_v16, %v4070_v34  ;;  %v4112_v21 = vadd.f32 %v4111_v23, %v4110_v37  ;;  %v4073_v46 = vpop.f32.mrb[74].mxu1  ;;  %v4113_v39 = vpop.f32.mrb[82].mxu0 }
 0x3e0   :  { %v4074_v40 = vpop.f32.mrb[75].mxu1  ;;  %v4114_v41 = vpop.f32.mrb[83].mxu0 }
 0x3e1   :  { %v2831_v44 = vadd.f32 %v4072_v38, %v3884_v8  ;;  %v4075_v49 = vadd.f32 %v4074_v40, %v4073_v46  ;;  %v4115_v10 = vadd.f32 %v4114_v41, %v4113_v39 }
 0x3e3   :  { %v2896_v50 = vadd.f32 %v4112_v21, %v2831_v44  ;;  %v2834_v42 = vadd.f32 %v4075_v49, %v3884_v8 }
 0x3e5   :  { %v5926_v53 = vadd.f32 %v4115_v10, %v2834_v42  ;;  %v4076_v54 = vpop.f32.mrb[76].mxu1  ;;  %v4116_v52 = vpop.f32.mrb[84].mxu0 }
 0x3e6   :  { %v4077_v56 = vpop.f32.mrb[77].mxu1  ;;  %v4117_v57 = vpop.f32.mrb[85].mxu0 }
 0x3e7   :  { %v4078_v60 = vadd.f32 %v4077_v56, %v4076_v54  ;;  %v4118_v58 = vadd.f32 %v4117_v57, %v4116_v52  ;;  %v4079_v51 = vpop.f32.mrb[78].mxu1  ;;  %v4119_v47 = vpop.f32.mrb[86].mxu0 }
 0x3e8   :  { %v4080_v26 = vpop.f32.mrb[79].mxu1  ;;  %v4120_v27 = vpop.f32.mrb[87].mxu0 }
 0x3e9   :  { %v2839_v18 = vadd.f32 %v4078_v60, %v3884_v8  ;;  %v4081_v19 = vadd.f32 %v4080_v26, %v4079_v51  ;;  %v4121_v17 = vadd.f32 %v4120_v27, %v4119_v47 }
 0x3eb   :  { %v2904_v2 = vadd.f32 %v4118_v58, %v2839_v18  ;;  %v2842_v35 = vadd.f32 %v4081_v19, %v3884_v8 }
 0x3ed   :  { %v5928_v28 = vadd.f32 %v4121_v17, %v2842_v35  ;;  %v4138_v62 = vpop.f32.mrb[80].mxu1  ;;  %v4178_v6 = vpop.f32.mrb[88].mxu0 }
 0x3ee   :  { %v4139_v7 = vpop.f32.mrb[81].mxu1  ;;  %v4179_v12 = vpop.f32.mrb[89].mxu0 }
 0x3ef   :  { %v4140_v59 = vadd.f32 %v4139_v7, %v4138_v62  ;;  %v4180_v20 = vadd.f32 %v4179_v12, %v4178_v6  ;;  %v4141_v9 = vpop.f32.mrb[82].mxu1  ;;  %v4181_v13 = vpop.f32.mrb[90].mxu0 }
 0x3f0   :  { %v4142_v25 = vpop.f32.mrb[83].mxu1  ;;  %v4182_v22 = vpop.f32.mrb[91].mxu0 }
 0x3f1   :  { %v2945_v61 = vadd.f32 %v4140_v59, %v2880_v15  ;;  %v4143_v0 = vadd.f32 %v4142_v25, %v4141_v9  ;;  %v4183_v48 = vadd.f32 %v4182_v22, %v4181_v13 }
 0x3f3   :  { %v3010_v29 = vadd.f32 %v4180_v20, %v2945_v61  ;;  %v2948_v1 = vadd.f32 %v4143_v0, %v5922_v24 }
 0x3f5   :  { %v5931_v36 = vadd.f32 %v4183_v48, %v2948_v1  ;;  %v4144_v8 = vpop.f32.mrb[84].mxu1  ;;  %v4184_v30 = vpop.f32.mrb[92].mxu0 }
 0x3f6   :  { %v4145_v31 = vpop.f32.mrb[85].mxu1  ;;  %v4185_v33 = vpop.f32.mrb[93].mxu0 }
 0x3f7   :  { %v4146_v34 = vadd.f32 %v4145_v31, %v4144_v8  ;;  %v4186_v37 = vadd.f32 %v4185_v33, %v4184_v30  ;;  %v4147_v16 = vpop.f32.mrb[86].mxu1  ;;  %v4187_v23 = vpop.f32.mrb[94].mxu0 }
 0x3f8   :  { %v4148_v38 = vpop.f32.mrb[87].mxu1  ;;  %v4188_v21 = vpop.f32.mrb[95].mxu0 }
 0x3f9   :  { %v2953_v46 = vadd.f32 %v4146_v34, %v2888_v32  ;;  %v4149_v39 = vadd.f32 %v4148_v38, %v4147_v16  ;;  %v4189_v15 = vadd.f32 %v4188_v21, %v4187_v23 }
 0x3fb   :  { %v3018_v40 = vadd.f32 %v4186_v37, %v2953_v46  ;;  %v2956_v41 = vadd.f32 %v4149_v39, %v5924_v55 }
 0x3fd   :  { %v5934_v44 = vadd.f32 %v4189_v15, %v2956_v41  ;;  %v4150_v24 = vpop.f32.mrb[88].mxu1  ;;  %v4190_v49 = vpop.f32.mrb[96].mxu0 }
 0x3fe   :  { %v4151_v10 = vpop.f32.mrb[89].mxu1  ;;  %v4191_v42 = vpop.f32.mrb[97].mxu0 }
 0x3ff   :  { %v4152_v54 = vadd.f32 %v4151_v10, %v4150_v24  ;;  %v4192_v52 = vadd.f32 %v4191_v42, %v4190_v49  ;;  %v4153_v56 = vpop.f32.mrb[90].mxu1  ;;  %v4193_v57 = vpop.f32.mrb[98].mxu0 }
 0x400   :  { %v4154_v60 = vpop.f32.mrb[91].mxu1  ;;  %v4194_v58 = vpop.f32.mrb[99].mxu0 }
 0x401   :  { %v2961_v51 = vadd.f32 %v4152_v54, %v2896_v50  ;;  %v4155_v47 = vadd.f32 %v4154_v60, %v4153_v56  ;;  %v4195_v32 = vadd.f32 %v4194_v58, %v4193_v57 }
 0x403   :  { %v3026_v26 = vadd.f32 %v4192_v52, %v2961_v51  ;;  %v2964_v27 = vadd.f32 %v4155_v47, %v5926_v53 }
 0x405   :  { %v5937_v18 = vadd.f32 %v4195_v32, %v2964_v27  ;;  %v4156_v55 = vpop.f32.mrb[92].mxu1  ;;  %v4196_v19 = vpop.f32.mrb[100].mxu0 }
 0x406   :  { %v4157_v17 = vpop.f32.mrb[93].mxu1  ;;  %v4197_v35 = vpop.f32.mrb[101].mxu0 }
 0x407   :  { %v4158_v62 = vadd.f32 %v4157_v17, %v4156_v55  ;;  %v4198_v6 = vadd.f32 %v4197_v35, %v4196_v19  ;;  %v4159_v7 = vpop.f32.mrb[94].mxu1  ;;  %v4199_v12 = vpop.f32.mrb[102].mxu0 }
 0x408   :  { %v4160_v59 = vpop.f32.mrb[95].mxu1  ;;  %v4200_v20 = vpop.f32.mrb[103].mxu0 }
 0x409   :  { %v2969_v9 = vadd.f32 %v4158_v62, %v2904_v2  ;;  %v4161_v13 = vadd.f32 %v4160_v59, %v4159_v7  ;;  %v4201_v50 = vadd.f32 %v4200_v20, %v4199_v12 }
 0x40b   :  { %v3034_v25 = vadd.f32 %v4198_v6, %v2969_v9  ;;  %v2972_v22 = vadd.f32 %v4161_v13, %v5928_v28 }
 0x40d   :  { %v5940_v61 = vadd.f32 %v4201_v50, %v2972_v22  ;;  %v4218_v53 = vpop.f32.mrb[96].mxu1  ;;  %v4258_v0 = vpop.f32.mrb[104].mxu0 }
 0x40e   :  { %v4219_v48 = vpop.f32.mrb[97].mxu1  ;;  %v4259_v1 = vpop.f32.mrb[105].mxu0 }
 0x40f   :  { %v4220_v8 = vadd.f32 %v4219_v48, %v4218_v53  ;;  %v4260_v30 = vadd.f32 %v4259_v1, %v4258_v0  ;;  %v4221_v31 = vpop.f32.mrb[98].mxu1  ;;  %v4261_v33 = vpop.f32.mrb[106].mxu0 }
 0x410   :  { %v4222_v34 = vpop.f32.mrb[99].mxu1  ;;  %v4262_v37 = vpop.f32.mrb[107].mxu0 }
 0x411   :  { %v3075_v16 = vadd.f32 %v4220_v8, %v3010_v29  ;;  %v4223_v23 = vadd.f32 %v4222_v34, %v4221_v31  ;;  %v4263_v2 = vadd.f32 %v4262_v37, %v4261_v33 }
 0x413   :  { %v3140_v38 = vadd.f32 %v4260_v30, %v3075_v16  ;;  %v3078_v21 = vadd.f32 %v4223_v23, %v5931_v36 }
 0x415   :  { %v5943_v46 = vadd.f32 %v4263_v2, %v3078_v21  ;;  %v4224_v28 = vpop.f32.mrb[100].mxu1  ;;  %v4264_v39 = vpop.f32.mrb[108].mxu0 }
 0x416   :  { %v4225_v15 = vpop.f32.mrb[101].mxu1  ;;  %v4265_v41 = vpop.f32.mrb[109].mxu0 }
 0x417   :  { %v4226_v24 = vadd.f32 %v4225_v15, %v4224_v28  ;;  %v4266_v49 = vadd.f32 %v4265_v41, %v4264_v39  ;;  %v4227_v10 = vpop.f32.mrb[102].mxu1  ;;  %v4267_v42 = vpop.f32.mrb[110].mxu0 }
 0x418   :  { %v4228_v54 = vpop.f32.mrb[103].mxu1  ;;  %v4268_v52 = vpop.f32.mrb[111].mxu0 }
 0x419   :  { %v3083_v56 = vadd.f32 %v4226_v24, %v3018_v40  ;;  %v4229_v57 = vadd.f32 %v4228_v54, %v4227_v10  ;;  %v4269_v29 = vadd.f32 %v4268_v52, %v4267_v42 }
 0x41b   :  { %v5945_v60 = vadd.f32 %v4266_v49, %v3083_v56  ;;  %v3086_v58 = vadd.f32 %v4229_v57, %v5934_v44 }
 0x41d   :  { %v5948_v36 = vadd.f32 %v4269_v29, %v3086_v58  ;;  %v4230_v51 = vpop.f32.mrb[104].mxu1  ;;  %v4270_v47 = vpop.f32.mrb[112].mxu0 }
 0x41e   :  { %v4231_v32 = vpop.f32.mrb[105].mxu1  ;;  %v4271_v27 = vpop.f32.mrb[113].mxu0 }
 0x41f   :  { %v4232_v55 = vadd.f32 %v4231_v32, %v4230_v51  ;;  %v4272_v19 = vadd.f32 %v4271_v27, %v4270_v47  ;;  %v4233_v17 = vpop.f32.mrb[106].mxu1  ;;  %v4273_v35 = vpop.f32.mrb[114].mxu0 }
 0x420   :  { %v4234_v62 = vpop.f32.mrb[107].mxu1  ;;  %v4274_v6 = vpop.f32.mrb[115].mxu0 }
 0x421   :  { %v3091_v7 = vadd.f32 %v4232_v55, %v3026_v26  ;;  %v4235_v40 = vadd.f32 %v4234_v62, %v4233_v17  ;;  %v4275_v12 = vadd.f32 %v4274_v6, %v4273_v35 }
 0x423   :  { %v5950_v59 = vadd.f32 %v4272_v19, %v3091_v7  ;;  %v3094_v20 = vadd.f32 %v4235_v40, %v5937_v18 }
 0x425   :  { %v5953_v44 = vadd.f32 %v4275_v12, %v3094_v20  ;;  %v4236_v9 = vpop.f32.mrb[108].mxu1  ;;  %v4276_v13 = vpop.f32.mrb[116].mxu0 }
 0x426   :  { %v4237_v50 = vpop.f32.mrb[109].mxu1  ;;  %v4277_v22 = vpop.f32.mrb[117].mxu0 }
 0x427   :  { %v4238_v53 = vadd.f32 %v4237_v50, %v4236_v9  ;;  %v4278_v0 = vadd.f32 %v4277_v22, %v4276_v13  ;;  %v4239_v48 = vpop.f32.mrb[110].mxu1  ;;  %v4279_v1 = vpop.f32.mrb[118].mxu0 }
 0x428   :  { %v4240_v8 = vpop.f32.mrb[111].mxu1  ;;  %v4280_v30 = vpop.f32.mrb[119].mxu0 }
 0x429   :  { %v3099_v31 = vadd.f32 %v4238_v53, %v3034_v25  ;;  %v4241_v26 = vadd.f32 %v4240_v8, %v4239_v48  ;;  %v4281_v33 = vadd.f32 %v4280_v30, %v4279_v1 }
 0x42b   :  { %v5955_v34 = vadd.f32 %v4278_v0, %v3099_v31  ;;  %v3102_v37 = vadd.f32 %v4241_v26, %v5940_v61 }
 0x42d   :  { %v5958_v18 = vadd.f32 %v4281_v33, %v3102_v37  ;;  %v4298_v16 = vpop.f32.mrb[112].mxu1  ;;  %v4338_v23 = vpop.f32.mrb[120].mxu0 }
 0x42e   :  { %v4299_v2 = vpop.f32.mrb[113].mxu1  ;;  %v4339_v21 = vpop.f32.mrb[121].mxu0 }
 0x42f   :  { %v4300_v28 = vadd.f32 %v4299_v2, %v4298_v16  ;;  %v4340_v39 = vadd.f32 %v4339_v21, %v4338_v23  ;;  %v4301_v15 = vpop.f32.mrb[114].mxu1  ;;  %v4341_v41 = vpop.f32.mrb[122].mxu0 }
 0x430   :  { %v4302_v24 = vpop.f32.mrb[115].mxu1  ;;  %v4342_v49 = vpop.f32.mrb[123].mxu0 }
 0x431   :  { %v3205_v10 = vadd.f32 %v4300_v28, %v3140_v38  ;;  %v4303_v25 = vadd.f32 %v4302_v24, %v4301_v15  ;;  %v4343_v42 = vadd.f32 %v4342_v49, %v4341_v41 }
 0x433   :  { %v3270_v54 = vadd.f32 %v4340_v39, %v3205_v10  ;;  %v3208_v52 = vadd.f32 %v4303_v25, %v5943_v46 }
 0x435   :  { %v5962_v61 = vadd.f32 %v3270_v54, %v5026_v63  ;;  %v3273_v56 = vadd.f32 %v4343_v42, %v3208_v52  ;;  %v4304_v57 = vpop.f32.mrb[116].mxu1  ;;  %v4344_v29 = vpop.f32.mrb[124].mxu0 }
 0x436   :  { %v4305_v58 = vpop.f32.mrb[117].mxu1  ;;  %v4345_v51 = vpop.f32.mrb[125].mxu0 }
 0x437   :  { %v5965_v47 = vadd.f32 %v3273_v56, %v5031_v4  ;;  %v4306_v32 = vadd.f32 %v4305_v58, %v4304_v57  ;;  %v4346_v27 = vadd.f32 %v4345_v51, %v4344_v29  ;;  %v4307_v55 = vpop.f32.mrb[118].mxu1  ;;  %v4347_v38 = vpop.f32.mrb[126].mxu0  ;;  %v3310_v19 = vsel %vm201_vm0, %v5962_v61, 0.0 }
 0x438   :  { %v4308_v17 = vpop.f32.mrb[119].mxu1  ;;  %v4348_v46 = vpop.f32.mrb[127].mxu0  ;;  %3311 = vadd.xlane.f32.xlu0 %v3310_v19  ;;  %v3334_v63 = vmul.f32 %v5962_v61, %v5962_v61 }
 0x439   :  { %v3213_v35 = vadd.f32 %v4306_v32, %v5945_v60  ;;  %v4309_v62 = vadd.f32 %v4308_v17, %v4307_v55  ;;  %v4349_v6 = vadd.f32 %v4348_v46, %v4347_v38  ;;  %v3313_v4 = vsel %vm201_vm0, %v5965_v47, 0.0 }
 0x43a   :  { %3314 = vadd.xlane.f32.xlu1 %v3313_v4  ;;  %v3335_v7 = vmul.f32 %v5965_v47, %v5965_v47  ;;  %v3342_v20 = vsel %vm201_vm0, %v3334_v63, 0.0 }
 0x43b   :  { %v3278_v40 = vadd.f32 %v4346_v27, %v3213_v35  ;;  %v3216_v12 = vadd.f32 %v4309_v62, %v5948_v36 }
 0x43c   :  { %3343 = vadd.xlane.f32.xlu0 %v3342_v20  ;;  %v3345_v22 = vsel %vm201_vm0, %v3335_v7, 0.0 }
 0x43d   :  { %v5979_v9 = vadd.f32 %v3278_v40, %v5083_v45  ;;  %v3281_v13 = vadd.f32 %v4349_v6, %v3216_v12  ;;  %v4310_v60 = vpop.f32.mrb[120].mxu1  ;;  %v4350_v50 = vpop.f32.mrb[128].mxu0 }
 0x43e   :  { %v4311_v53 = vpop.f32.mrb[121].mxu1  ;;  %v4351_v0 = vpop.f32.mrb[129].mxu0  ;;  %3346 = vadd.xlane.f32.xlu1 %v3345_v22 }
 0x43f   :  { %v5983_v48 = vadd.f32 %v3281_v13, %v5077_v43  ;;  %v4312_v1 = vadd.f32 %v4311_v53, %v4310_v60  ;;  %v4352_v8 = vadd.f32 %v4351_v0, %v4350_v50  ;;  %v4313_v36 = vpop.f32.mrb[122].mxu1  ;;  %v4353_v30 = vpop.f32.mrb[130].mxu0  ;;  %v3316_v31 = vsel %vm201_vm0, %v5979_v9, 0.0 }
 0x440   :  { %v4314_v45 = vpop.f32.mrb[123].mxu1  ;;  %v4354_v26 = vpop.f32.mrb[131].mxu0  ;;  %3317 = vadd.xlane.f32.xlu0 %v3316_v31  ;;  %v3336_v33 = vmul.f32 %v5979_v9, %v5979_v9 }
 0x441   :  { %v3221_v37 = vadd.f32 %v4312_v1, %v5950_v59  ;;  %v4315_v16 = vadd.f32 %v4314_v45, %v4313_v36  ;;  %v4355_v23 = vadd.f32 %v4354_v26, %v4353_v30  ;;  %v3319_v43 = vsel %vm201_vm0, %v5983_v48, 0.0 }
 0x442   :  { %3320 = vadd.xlane.f32.xlu1 %v3319_v43  ;;  %v3337_v2 = vmul.f32 %v5983_v48, %v5983_v48  ;;  %v3348_v39 = vsel %vm201_vm0, %v3336_v33, 0.0 }
 0x443   :  { %v3286_v21 = vadd.f32 %v4352_v8, %v3221_v37  ;;  %v3224_v28 = vadd.f32 %v4315_v16, %v5953_v44 }
 0x444   :  { %3349 = vadd.xlane.f32.xlu0 %v3348_v39  ;;  %v3351_v49 = vsel %vm201_vm0, %v3337_v2, 0.0 }
 0x445   :  { %v5997_v15 = vadd.f32 %v3286_v21, %v5127_v14  ;;  %v3289_v41 = vadd.f32 %v4355_v23, %v3224_v28  ;;  %v4316_v59 = vpop.f32.mrb[124].mxu1  ;;  %v4356_v24 = vpop.f32.mrb[132].mxu0 }
 0x446   :  { %v4317_v10 = vpop.f32.mrb[125].mxu1  ;;  %v4357_v25 = vpop.f32.mrb[133].mxu0  ;;  %3352 = vadd.xlane.f32.xlu1 %v3351_v49 }
 0x447   :  { %v6001_v42 = vadd.f32 %v3289_v41, %v5124_v11  ;;  %v4318_v54 = vadd.f32 %v4317_v10, %v4316_v59  ;;  %v4358_v52 = vadd.f32 %v4357_v25, %v4356_v24  ;;  %v4319_v44 = vpop.f32.mrb[126].mxu1  ;;  %v4359_v56 = vpop.f32.mrb[134].mxu0  ;;  %v3322_v57 = vsel %vm201_vm0, %v5997_v15, 0.0 }
 0x448   :  { %v4320_v14 = vpop.f32.mrb[127].mxu1  ;;  %v4360_v29 = vpop.f32.mrb[135].mxu0  ;;  %3323 = vadd.xlane.f32.xlu0 %v3322_v57  ;;  %v3338_v58 = vmul.f32 %v5997_v15, %v5997_v15 }
 0x449   :  { %v3229_v51 = vadd.f32 %v4318_v54, %v5955_v34  ;;  %v4321_v32 = vadd.f32 %v4320_v14, %v4319_v44  ;;  %v4361_v27 = vadd.f32 %v4360_v29, %v4359_v56  ;;  %v3325_v11 = vsel %vm201_vm0, %v6001_v42, 0.0  ;;  %v6049_v14 = vld [vmem:[%s6258_s11] ss:$0 sm:$0xff] }
 0x44a   :  { %3326 = vadd.xlane.f32.xlu1 %v3325_v11  ;;  %v3339_v55 = vmul.f32 %v6001_v42, %v6001_v42  ;;  %v3354_v17 = vsel %vm201_vm0, %v3338_v58, 0.0 }
 0x44b   :  { %v3294_v38 = vadd.f32 %v4358_v52, %v3229_v51  ;;  %v3232_v19 = vadd.f32 %v4321_v32, %v5958_v18 }
 0x44c   :  { %3355 = vadd.xlane.f32.xlu0 %v3354_v17  ;;  %v3357_v34 = vsel %vm201_vm0, %v3339_v55, 0.0  ;;  %v6057_v55 = vld [vmem:[%s6259_s12] ss:$0 sm:$0xff] }
 0x44d   :  { %v6015_v46 = vadd.f32 %v3294_v38, %v5149_v5  ;;  %v3297_v63 = vadd.f32 %v4361_v27, %v3232_v19 }
 0x44e   :  { %3358 = vadd.xlane.f32.xlu1 %v3357_v34 }
 0x44f   :  { %v6019_v35 = vadd.f32 %v3297_v63, %v5146_v3  ;;  %v3328_v62 = vsel %vm201_vm0, %v6015_v46, 0.0  ;;  %v3340_v6 = vmul.f32 %v6015_v46, %v6015_v46 }
 0x450   :  { %3329 = vadd.xlane.f32.xlu0 %v3328_v62 }
 0x451   :  { %v3331_v18 = vsel %vm201_vm0, %v6019_v35, 0.0  ;;  %v3341_v5 = vmul.f32 %v6019_v35, %v6019_v35  ;;  %v3360_v4 = vsel %vm201_vm0, %v3340_v6, 0.0 }
 0x452   :  { %3332 = vadd.xlane.f32.xlu1 %v3331_v18 }
 0x453   :  { %v3363_v3 = vsel %vm201_vm0, %v3341_v5, 0.0 }
 0x454   :  { %3361 = vadd.xlane.f32.xlu0 %v3360_v4 }
 0x456   :  { %3364 = vadd.xlane.f32.xlu1 %v3363_v3 }
 0x4c5   :  { %v3312_v7 = vpop.xlane.xlu0 %3311 }
 0x4c6   :  { %v3366_v40 = vmul.f32 0.015625, %v3312_v7 }
 0x4c7   :  { %v3315_v12 = vpop.xlane.xlu1 %3314 }
 0x4c8   :  { %v3367_v20 = vmul.f32 0.015625, %v3315_v12  ;;  %v3382_v60 = vmul.f32 %v3366_v40, %v3366_v40  ;;  %v3398_v25 = vsub.f32 %v5962_v61, %v3366_v40 }
 0x4c9   :  { %v3344_v13 = vpop.xlane.xlu0 %3343 }
 0x4ca   :  { %v3374_v50 = vmul.f32 0.015625, %v3344_v13  ;;  %v3383_v53 = vmul.f32 %v3367_v20, %v3367_v20  ;;  %v3399_v29 = vsub.f32 %v5965_v47, %v3367_v20 }
 0x4cb   :  { %v3347_v22 = vpop.xlane.xlu1 %3346 }
 0x4cc   :  { %v3390_v0 = vsub.f32 %v3374_v50, %v3382_v60  ;;  %v3375_v1 = vmul.f32 0.015625, %v3347_v22 }
 0x4cd   :  { %v3318_v8 = vpop.xlane.xlu0 %3317 }
 0x4ce   :  { %v3406_v36 = vadd.f32 1e-05, %v3390_v0  ;;  %v3391_v30 = vsub.f32 %v3375_v1, %v3383_v53  ;;  %v6031_v31 = vmul.f32 0.015625, %v3318_v8 }
 0x4cf   :  { %v3321_v45 = vpop.xlane.xlu1 %3320 }
 0x4d0   :  { %4620 = vrsqrt.f32 %v3406_v36  ;;  %v3407_v26 = vadd.f32 1e-05, %v3391_v30  ;;  %v6033_v33 = vmul.f32 0.015625, %v3321_v45  ;;  %v3384_v16 = vmul.f32 %v6031_v31, %v6031_v31 }
 0x4d1   :  { %v3350_v37 = vpop.xlane.xlu0 %3349  ;;  %v3400_v13 = vsub.f32 %v5979_v9, %v6031_v31 }
 0x4d2   :  { %4622 = vrsqrt.f32 %v3407_v26  ;;  %v3376_v23 = vmul.f32 0.015625, %v3350_v37  ;;  %v3385_v2 = vmul.f32 %v6033_v33, %v6033_v33  ;;  %v3401_v22 = vsub.f32 %v5983_v48, %v6033_v33 }
 0x4d3   :  { %v3353_v43 = vpop.xlane.xlu1 %3352 }
 0x4d4   :  { %v3392_v21 = vsub.f32 %v3376_v23, %v3384_v16  ;;  %v3377_v28 = vmul.f32 0.015625, %v3353_v43 }
 0x4d5   :  { %v3324_v39 = vpop.xlane.xlu0 %3323 }
 0x4d6   :  { %v3408_v41 = vadd.f32 1e-05, %v3392_v21  ;;  %v3393_v59 = vsub.f32 %v3377_v28, %v3385_v2  ;;  %v6039_v24 = vmul.f32 0.015625, %v3324_v39 }
 0x4d7   :  { %v3327_v49 = vpop.xlane.xlu1 %3326 }
 0x4d8   :  { %4624 = vrsqrt.f32 %v3408_v41  ;;  %v3409_v10 = vadd.f32 1e-05, %v3393_v59  ;;  %v6042_v54 = vmul.f32 0.015625, %v3327_v49  ;;  %v3386_v56 = vmul.f32 %v6039_v24, %v6039_v24 }
 0x4d9   :  { %v3356_v52 = vpop.xlane.xlu0 %3355  ;;  %v3402_v21 = vsub.f32 %v5997_v15, %v6039_v24 }
 0x4da   :  { %v4621_v44 = vpop.eup %4620  ;;  %4626 = vrsqrt.f32 %v3409_v10  ;;  %v3378_v57 = vmul.f32 0.015625, %v3356_v52  ;;  %v3387_v61 = vmul.f32 %v6042_v54, %v6042_v54  ;;  %v3403_v49 = vsub.f32 %v6001_v42, %v6042_v54 }
 0x4db   :  { %v3359_v58 = vpop.xlane.xlu1 %3358  ;;  %v3422_v51 = vmul.f32 %v4621_v44, %v3398_v25 }
 0x4dc   :  { %v4623_v32 = vpop.eup %4622  ;;  %v3394_v27 = vsub.f32 %v3378_v57, %v3386_v56  ;;  %v3379_v11 = vmul.f32 0.015625, %v3359_v58 }
 0x4dd   :  { %v3330_v38 = vpop.xlane.xlu0 %3329  ;;  %v3436_v19 = vmul.f32 %v6049_v14, %v3422_v51  ;;  %v3423_v17 = vmul.f32 %v4623_v32, %v3399_v29 }
 0x4de   :  { %v3410_v63 = vadd.f32 1e-05, %v3394_v27  ;;  %v3395_v34 = vsub.f32 %v3379_v11, %v3387_v61  ;;  %v6060_v47 = vmul.f32 0.015625, %v3330_v38 }
 0x4df   :  { %v3333_v62 = vpop.xlane.xlu1 %3332  ;;  %v6063_v6 = vadd.f32 %v6057_v55, %v3436_v19  ;;  %v3437_v18 = vmul.f32 %v6049_v14, %v3423_v17 }
 0x4e0   :  { %4628 = vrsqrt.f32 %v3410_v63  ;;  %v3411_v5 = vadd.f32 1e-05, %v3395_v34  ;;  %v6066_v4 = vmul.f32 0.015625, %v3333_v62  ;;  %v3388_v60 = vmul.f32 %v6060_v47, %v6060_v47 }
 0x4e1   :  { %v3362_v3 = vpop.xlane.xlu0 %3361  ;;  %v3460_v7 = vsel %vm201_vm0, %v6063_v6, 0.0  ;;  %v6071_v40 = vadd.f32 %v6057_v55, %v3437_v18  ;;  %v3484_v12 = vmul.f32 %v6063_v6, %v6063_v6  ;;  %v3404_v29 = vsub.f32 %v6015_v46, %v6060_v47 }
 0x4e2   :  { %v4625_v20 = vpop.eup %4624  ;;  %4630 = vrsqrt.f32 %v3411_v5  ;;  %v3380_v50 = vmul.f32 0.015625, %v3362_v3  ;;  %3461 = vadd.xlane.f32.xlu0 %v3460_v7  ;;  %v3389_v53 = vmul.f32 %v6066_v4, %v6066_v4  ;;  %v3405_v27 = vsub.f32 %v6019_v35, %v6066_v4 }
 0x4e3   :  { %v3365_v0 = vpop.xlane.xlu1 %3364  ;;  %v3463_v1 = vsel %vm201_vm0, %v6071_v40, 0.0  ;;  %v3485_v9 = vmul.f32 %v6071_v40, %v6071_v40  ;;  %v3424_v31 = vmul.f32 %v4625_v20, %v3400_v13  ;;  %v3492_v45 = vsel %vm201_vm0, %v3484_v12, 0.0  ;;  %v3609_v12 = vld [vmem:[%s6262_s15 + $0x8] sm:$0xff] }
 0x4e4   :  { %v4627_v8 = vpop.eup %4626  ;;  %v3396_v36 = vsub.f32 %v3380_v50, %v3388_v60  ;;  %v3381_v30 = vmul.f32 0.015625, %v3365_v0  ;;  %3464 = vadd.xlane.f32.xlu1 %v3463_v1  ;;  %v3610_v60 = vld [vmem:[%s6262_s15 + $0x10] sm:$0xff]  ;;  %v3611_v50 = vld [vmem:[%s6262_s15 + $0x18] sm:$0xff]  ;;  %v3613_v0 = vld [vmem:[%s6262_s15 + $0x28] sm:$0xff] }
 0x4e5   :  { %v3425_v26 = vmul.f32 %v4627_v8, %v3401_v22  ;;  %v3438_v33 = vmul.f32 %v6049_v14, %v3424_v31  ;;  %v3495_v16 = vsel %vm201_vm0, %v3485_v9, 0.0  ;;  %v4454_v22 = vpack.c.bf16 %v3611_v50, %v3610_v60  ;;  %v3614_v8 = vld [vmem:[%s6262_s15 + $0x30] sm:$0xff] }
 0x4e6   :  { %v3412_v37 = vadd.f32 1e-05, %v3396_v36  ;;  %v3397_v48 = vsub.f32 %v3381_v30, %v3389_v53  ;;  %3493 = vadd.xlane.f32.xlu0 %v3492_v45  ;;  %v3612_v53 = vld [vmem:[%s6262_s15 + $0x20] sm:$0xff]  ;;  %v3615_v36 = vld [vmem:[%s6262_s15 + $0x38] sm:$0xff] }
 0x4e7   :  { %v3439_v23 = vmul.f32 %v6049_v14, %v3425_v26  ;;  %v6092_v2 = vadd.f32 %v6057_v55, %v3438_v33  ;;  %v4458_v1 = vpack.c.bf16 %v3613_v0, %v3612_v53  ;;  %v4462_v30 = vpack.c.bf16 %v3615_v36, %v3614_v8 }
 0x4e8   :  { %4632 = vrsqrt.f32 %v3412_v37  ;;  %v3413_v43 = vadd.f32 1e-05, %v3397_v48  ;;  %3496 = vadd.xlane.f32.xlu1 %v3495_v16 }
 0x4e9   :  { %v6097_v28 = vadd.f32 %v6057_v55, %v3439_v23  ;;  %v3466_v41 = vsel %vm201_vm0, %v6092_v2, 0.0  ;;  %v3486_v59 = vmul.f32 %v6092_v2, %v6092_v2 }
 0x4ea   :  { %v4629_v39 = vpop.eup %4628  ;;  %4634 = vrsqrt.f32 %v3413_v43  ;;  %3467 = vadd.xlane.f32.xlu0 %v3466_v41 }
 0x4eb   :  { %v3469_v10 = vsel %vm201_vm0, %v6097_v28, 0.0  ;;  %v3487_v15 = vmul.f32 %v6097_v28, %v6097_v28  ;;  %v3426_v24 = vmul.f32 %v4629_v39, %v3402_v21  ;;  %v3498_v56 = vsel %vm201_vm0, %v3486_v59, 0.0 }
 0x4ec   :  { %v4631_v25 = vpop.eup %4630  ;;  %3470 = vadd.xlane.f32.xlu1 %v3469_v10 }
 0x4ed   :  { %v3440_v52 = vmul.f32 %v6049_v14, %v3426_v24  ;;  %v3427_v44 = vmul.f32 %v4631_v25, %v3403_v49  ;;  %v3501_v57 = vsel %vm201_vm0, %v3487_v15, 0.0 }
 0x4ee   :  { %3499 = vadd.xlane.f32.xlu0 %v3498_v56 }
 0x4ef   :  { %v6113_v42 = vadd.f32 %v6057_v55, %v3440_v52  ;;  %v3441_v54 = vmul.f32 %v6049_v14, %v3427_v44 }
 0x4f0   :  { %3502 = vadd.xlane.f32.xlu1 %v3501_v57 }
 0x4f1   :  { %v3472_v58 = vsel %vm201_vm0, %v6113_v42, 0.0  ;;  %v6121_v51 = vadd.f32 %v6057_v55, %v3441_v54  ;;  %v3488_v61 = vmul.f32 %v6113_v42, %v6113_v42 }
 0x4f2   :  { %v4633_v32 = vpop.eup %4632  ;;  %3473 = vadd.xlane.f32.xlu0 %v3472_v58 }
 0x4f3   :  { %v3475_v11 = vsel %vm201_vm0, %v6121_v51, 0.0  ;;  %v3489_v46 = vmul.f32 %v6121_v51, %v6121_v51  ;;  %v3428_v38 = vmul.f32 %v4633_v32, %v3404_v29  ;;  %v3504_v34 = vsel %vm201_vm0, %v3488_v61, 0.0 }
 0x4f4   :  { %v4635_v19 = vpop.eup %4634  ;;  %3476 = vadd.xlane.f32.xlu1 %v3475_v11 }
 0x4f5   :  { %v3442_v17 = vmul.f32 %v6049_v14, %v3428_v38  ;;  %v3429_v63 = vmul.f32 %v4635_v19, %v3405_v27  ;;  %v3507_v47 = vsel %vm201_vm0, %v3489_v46, 0.0 }
 0x4f6   :  { %3505 = vadd.xlane.f32.xlu0 %v3504_v34 }
 0x4f7   :  { %v6135_v35 = vadd.f32 %v6057_v55, %v3442_v17  ;;  %v3443_v62 = vmul.f32 %v6049_v14, %v3429_v63  ;;  %v3608_v14 = vld [vmem:[%s6262_s15] sm:$0xff] }
 0x4f8   :  { %3508 = vadd.xlane.f32.xlu1 %v3507_v47  ;;  %v6187_v63 = vld [vmem:[%s6260_s13] ss:$0 sm:$0xff] }
 0x4f9   :  { %v3478_v18 = vsel %vm201_vm0, %v6135_v35, 0.0  ;;  %v6141_v5 = vadd.f32 %v6057_v55, %v3443_v62  ;;  %v3490_v4 = vmul.f32 %v6135_v35, %v6135_v35  ;;  %v4450_v55 = vpack.c.bf16 %v3609_v12, %v3608_v14  ;;  %v6197_v12 = vld [vmem:[%s6261_s14] ss:$0 sm:$0xff] }
 0x4fa   :  { %3479 = vadd.xlane.f32.xlu0 %v3478_v18 }
 0x4fb   :  { %v3481_v3 = vsel %vm201_vm0, %v6141_v5, 0.0  ;;  %v3491_v7 = vmul.f32 %v6141_v5, %v6141_v5  ;;  %v3510_v20 = vsel %vm201_vm0, %v3490_v4, 0.0  ;;  %4451 = vmatprep.subr.bf16.mxu1 %v4450_v55 }
 0x4fc   :  { %3482 = vadd.xlane.f32.xlu1 %v3481_v3  ;;  %4453 = vmatpush3.bf16.msra.mxu1 %v4450_v55 }
 0x4fd   :  { %v3513_v13 = vsel %vm201_vm0, %v3491_v7, 0.0  ;;  %4455 = vmatprep.subr.bf16.mxu1 %v4454_v22 }
 0x4fe   :  { %3511 = vadd.xlane.f32.xlu0 %v3510_v20 }
 0x500   :  { %3514 = vadd.xlane.f32.xlu1 %v3513_v13  ;;  %4457 = vmatpush3.bf16.msra.mxu1 %v4454_v22 }
 0x501   :  { %4459 = vmatprep.subr.bf16.mxu1 %v4458_v1 }
 0x504   :  { %4461 = vmatpush3.bf16.msra.mxu1 %v4458_v1 }
 0x505   :  { %4463 = vmatprep.subr.bf16.mxu1 %v4462_v30 }
 0x508   :  { %4465 = vmatpush3.bf16.msra.mxu1 %v4462_v30 }
 0x56f   :  { %v3462_v9 = vpop.xlane.xlu0 %3461 }
 0x570   :  { %v3516_v31 = vmul.f32 0.015625, %v3462_v9 }
 0x571   :  { %v3465_v45 = vpop.xlane.xlu1 %3464 }
 0x572   :  { %v3517_v26 = vmul.f32 0.015625, %v3465_v45  ;;  %v3532_v48 = vmul.f32 %v3516_v31, %v3516_v31  ;;  %v3548_v19 = vsub.f32 %v6063_v6, %v3516_v31 }
 0x573   :  { %v3494_v37 = vpop.xlane.xlu0 %3493 }
 0x574   :  { %v3524_v33 = vmul.f32 0.015625, %v3494_v37  ;;  %v3533_v23 = vmul.f32 %v3517_v26, %v3517_v26  ;;  %v3549_v47 = vsub.f32 %v6071_v40, %v3517_v26 }
 0x575   :  { %v3497_v16 = vpop.xlane.xlu1 %3496 }
 0x576   :  { %v3540_v43 = vsub.f32 %v3524_v33, %v3532_v48  ;;  %v3525_v21 = vmul.f32 0.015625, %v3497_v16 }
 0x577   :  { %v3468_v59 = vpop.xlane.xlu0 %3467 }
 0x578   :  { %v3556_v39 = vadd.f32 1e-05, %v3540_v43  ;;  %v3541_v41 = vsub.f32 %v3525_v21, %v3533_v23  ;;  %v6175_v49 = vmul.f32 0.015625, %v3468_v59 }
 0x579   :  { %v3471_v10 = vpop.xlane.xlu1 %3470 }
 0x57a   :  { %4636 = vrsqrt.f32 %v3556_v39  ;;  %v3557_v15 = vadd.f32 1e-05, %v3541_v41  ;;  %v3519_v24 = vmul.f32 0.015625, %v3471_v10  ;;  %v3534_v52 = vmul.f32 %v6175_v49, %v6175_v49 }
 0x57b   :  { %v3500_v25 = vpop.xlane.xlu0 %3499  ;;  %v3550_v9 = vsub.f32 %v6092_v2, %v6175_v49 }
 0x57c   :  { %4638 = vrsqrt.f32 %v3557_v15  ;;  %v3526_v44 = vmul.f32 0.015625, %v3500_v25  ;;  %v3535_v57 = vmul.f32 %v3519_v24, %v3519_v24  ;;  %v3551_v26 = vsub.f32 %v6097_v28, %v3519_v24 }
 0x57d   :  { %v3503_v56 = vpop.xlane.xlu1 %3502 }
 0x57e   :  { %v3527_v54 = vmul.f32 0.015625, %v3503_v56  ;;  %v3542_v29 = vsub.f32 %v3526_v44, %v3534_v52 }
 0x57f   :  { %v3474_v32 = vpop.xlane.xlu0 %3473 }
 0x580   :  { %v3543_v58 = vsub.f32 %v3527_v54, %v3535_v57  ;;  %v3558_v61 = vadd.f32 1e-05, %v3542_v29  ;;  %v6179_v27 = vmul.f32 0.015625, %v3474_v32 }
 0x581   :  { %v3477_v11 = vpop.xlane.xlu1 %3476 }
 0x582   :  { %v3559_v46 = vadd.f32 1e-05, %v3543_v58  ;;  %v6181_v38 = vmul.f32 0.015625, %v3477_v11  ;;  %4640 = vrsqrt.f32 %v3558_v61  ;;  %v3536_v62 = vmul.f32 %v6179_v27, %v6179_v27 }
 0x583   :  { %v3506_v34 = vpop.xlane.xlu0 %3505  ;;  %v3552_v25 = vsub.f32 %v6113_v42, %v6179_v27 }
 0x584   :  { %v4637_v17 = vpop.eup %4636  ;;  %4642 = vrsqrt.f32 %v3559_v46  ;;  %v3528_v18 = vmul.f32 0.015625, %v3506_v34  ;;  %v3537_v6 = vmul.f32 %v6181_v38, %v6181_v38  ;;  %v3553_v44 = vsub.f32 %v6121_v51, %v6181_v38 }
 0x585   :  { %v3509_v4 = vpop.xlane.xlu1 %3508  ;;  %v3572_v3 = vmul.f32 %v4637_v17, %v3548_v19 }
 0x586   :  { %v4639_v7 = vpop.eup %4638  ;;  %v3529_v14 = vmul.f32 0.015625, %v3509_v4  ;;  %v3544_v20 = vsub.f32 %v3528_v18, %v3536_v62 }
 0x587   :  { %v3573_v55 = vmul.f32 %v4639_v7, %v3549_v47  ;;  %v3586_v40 = vmul.f32 %v6187_v63, %v3572_v3  ;;  %v3480_v60 = vpop.xlane.xlu0 %3479 }
 0x588   :  { %v3545_v13 = vsub.f32 %v3529_v14, %v3537_v6  ;;  %v3560_v22 = vadd.f32 1e-05, %v3544_v20  ;;  %v3522_v53 = vmul.f32 0.015625, %v3480_v60 }
 0x589   :  { %v3587_v50 = vmul.f32 %v6187_v63, %v3573_v55  ;;  %v3483_v0 = vpop.xlane.xlu1 %3482  ;;  %v3600_v1 = vadd.f32 %v6197_v12, %v3586_v40 }
 0x58a   :  { %v3561_v8 = vadd.f32 1e-05, %v3545_v13  ;;  %v3523_v36 = vmul.f32 0.015625, %v3483_v0  ;;  %4644 = vrsqrt.f32 %v3560_v22  ;;  %v3538_v37 = vmul.f32 %v3522_v53, %v3522_v53 }
 0x58b   :  { %4422 = vmatprep.mubr.msk.f32.mxu1 %vm201_vm0, %v3600_v1  ;;  %v3601_v30 = vadd.f32 %v6197_v12, %v3587_v50  ;;  %v3512_v31 = vpop.xlane.xlu0 %3511  ;;  %v3554_v61 = vsub.f32 %v6135_v35, %v3522_v53  ;;  %v4017_v35 = vld [vmem:[%s6263_s16] ss:$0 sm:$0xff]  ;;  %s3765_s16 = sshll.u32 %s4678_s2, 4  ;;  %s3766_s16 = int_to_ptr.vmem [resolvable:$true] %s3765_s16 }
 0x58c   :  { %4646 = vrsqrt.f32 %v3561_v8  ;;  %v4641_v45 = vpop.eup %4640  ;;  %v3530_v48 = vmul.f32 0.015625, %v3512_v31  ;;  %v3539_v23 = vmul.f32 %v3523_v36, %v3523_v36  ;;  %v3555_v51 = vsub.f32 %v6141_v5, %v3523_v36  ;;  %s4652_s9 = scalar_lea.vmem %s3766_s16, 1024  ;;  %p4657_p1 = scmp.lt.s32.totalorder %s3766_s16, %s3766_s16 }
 0x58d   :  { %v3515_v33 = vpop.xlane.xlu1 %3514  ;;  %4423 = vmatmul.mubr.msk.f32.vlgmr.msra.gmra.mrb[128].mxu1 %vm201_vm0, %v3601_v30  ;;  %v3574_v21 = vmul.f32 %v4641_v45, %v3550_v9  ;;  %p4653_p0 = scmp.ne.s32.totalorder %s3766_s16, %s4652_s9  ;;  %p4658_p2 = scmp.lt.s32.totalorder %s4652_s9, %s4652_s9 }
 0x58e   :  { %v4643_v16 = vpop.eup %4642  ;;  %v3531_v43 = vmul.f32 0.015625, %v3515_v33  ;;  %v3546_v39 = vsub.f32 %v3530_v48, %v3538_v37 }
 0x58f   :  { %v3575_v41 = vmul.f32 %v4643_v16, %v3551_v26  ;;  %v3588_v10 = vmul.f32 %v6187_v63, %v3574_v21  ;;  %p4659_p3 = por %p4658_p2, %p4657_p1 }
 0x590   :  { %v3547_v59 = vsub.f32 %v3531_v43, %v3539_v23  ;;  %v3562_v2 = vadd.f32 1e-05, %v3546_v39 }
 0x591   :  { %v3589_v49 = vmul.f32 %v6187_v63, %v3575_v41  ;;  %v3602_v28 = vadd.f32 %v6197_v12, %v3588_v10  ;;  %p4660_p4 = pnand %p4659_p3, %p4653_p0 }
 0x592   :  { %v3563_v15 = vadd.f32 1e-05, %v3547_v59  ;;  %4648 = vrsqrt.f32 %v3562_v2 }
 0x593   :  { %v3603_v24 = vadd.f32 %v6197_v12, %v3589_v49  ;;  %4425 = vmatprep.mubr.msk.f32.mxu1 %vm201_vm0, %v3602_v28 }
 0x594   :  { %4650 = vrsqrt.f32 %v3563_v15  ;;  %v4645_v52 = vpop.eup %4644 }
 0x595   :  { %4426 = vmatmul.mubr.msk.f32.gmra.mrb[130].mxu1 %vm201_vm0, %v3603_v24  ;;  %v3576_v57 = vmul.f32 %v4645_v52, %v3552_v25 }
 0x596   :  { %v4647_v56 = vpop.eup %4646 }
 0x597   :  { %v3577_v54 = vmul.f32 %v4647_v56, %v3553_v44  ;;  %v3590_v29 = vmul.f32 %v6187_v63, %v3576_v57 }
 0x599   :  { %v3591_v58 = vmul.f32 %v6187_v63, %v3577_v54  ;;  %v3604_v32 = vadd.f32 %v6197_v12, %v3590_v29 }
 0x59b   :  { %v3605_v42 = vadd.f32 %v6197_v12, %v3591_v58  ;;  %4428 = vmatprep.mubr.msk.f32.mxu1 %vm201_vm0, %v3604_v32 }
 0x59c   :  { %v4649_v27 = vpop.eup %4648 }
 0x59d   :  { %4429 = vmatmul.mubr.msk.f32.gmra.mrb[132].mxu1 %vm201_vm0, %v3605_v42  ;;  %v3578_v46 = vmul.f32 %v4649_v27, %v3554_v61 }
 0x59e   :  { %v4651_v11 = vpop.eup %4650 }
 0x59f   :  { %v3579_v38 = vmul.f32 %v4651_v11, %v3555_v51  ;;  %v3592_v19 = vmul.f32 %v6187_v63, %v3578_v46 }
 0x5a1   :  { %v3593_v17 = vmul.f32 %v6187_v63, %v3579_v38  ;;  %v3606_v34 = vadd.f32 %v6197_v12, %v3592_v19 }
 0x5a3   :  { %v3607_v47 = vadd.f32 %v6197_v12, %v3593_v17  ;;  %4431 = vmatprep.mubr.msk.f32.mxu1 %vm201_vm0, %v3606_v34 }
 0x5a5   :  { %4432 = vmatmul.mubr.msk.f32.gmra.mrb[134].mxu1 %vm201_vm0, %v3607_v47 }
 0x660   :  { %v4424_v5 = vpop.f32.mrb[128].mxu1 }
 0x661   :  { %v3719_v62 = vadd.f32 %v4424_v5, %v4017_v35  ;;  %v3713_v18 = vpop.f32.mrb[129].mxu1 }
 0x662   :  { %v3714_v4 = vadd.f32 %v4017_v35, %v3713_v18 }
 0x663   :  { %3753 = vst [vmem:[#allocation2 + $0x8] sm:$0xff] %v3719_v62 }
 0x664   :  { %3752 = vst [vmem:[#allocation2] sm:$0xff] %v3714_v4 }
 0x668   :  { %v4427_v3 = vpop.f32.mrb[130].mxu1 }
 0x669   :  { %v3729_v63 = vadd.f32 %v4427_v3, %v4017_v35  ;;  %v3723_v7 = vpop.f32.mrb[131].mxu1 }
 0x66a   :  { %v3724_v6 = vadd.f32 %v4017_v35, %v3723_v7 }
 0x66b   :  { %3755 = vst [vmem:[#allocation2 + $0x18] sm:$0xff] %v3729_v63 }
 0x66c   :  { %3754 = vst [vmem:[#allocation2 + $0x10] sm:$0xff] %v3724_v6 }
 0x670   :  { %v4430_v14 = vpop.f32.mrb[132].mxu1 }
 0x671   :  { %v3739_v12 = vadd.f32 %v4430_v14, %v4017_v35  ;;  %v3733_v55 = vpop.f32.mrb[133].mxu1 }
 0x672   :  { %v3734_v20 = vadd.f32 %v4017_v35, %v3733_v55 }
 0x673   :  { %3757 = vst [vmem:[#allocation2 + $0x28] sm:$0xff] %v3739_v12 }
 0x674   :  { %3756 = vst [vmem:[#allocation2 + $0x20] sm:$0xff] %v3734_v20 }
 0x678   :  { %v4433_v40 = vpop.f32.mrb[134].mxu1 }
 0x679   :  { %v3749_v13 = vadd.f32 %v4433_v40, %v4017_v35  ;;  %v3743_v60 = vpop.f32.mrb[135].mxu1 }
 0x67a   :  { %v3744_v50 = vadd.f32 %v4017_v35, %v3743_v60 }
 0x67b   :  { %3759 = vst [vmem:[#allocation2 + $0x38] sm:$0xff] %v3749_v13 }
 0x67c   :  { %3758 = vst [vmem:[#allocation2 + $0x30] sm:$0xff] %v3744_v50 }
 0x67d   :  { %4663 = shalt.err (!%p4660_p4)
}
 0x67e   :  { %s4664_s18 = scalar_lea.hbm %s6264_s17, 1024 }
 0x67f   :  { %p4665_p5 = scmp.ne.s32.totalorder %s6264_s17, %s4664_s18  ;;  %p4668_p6 = scmp.lt.u32.totalorder %s4664_s18, %s6264_s17 }
 0x681   :  { %p4670_p7 = pnand %p4668_p6, %p4665_p5 }
 0x683   :  { %4673 = shalt.err (!%p4670_p7)
}
 0x684   :  { %s4679_s1 = smov 128   ;;  %s4680_s20 = smov 8  }
 0x685   :  { %3771 = dma.vmem_to_hbm [thread:$0]  %s3766_s16, 1024, %s6264_s17, [#allocation3], %s4679_s1, %s4679_s1, %s4680_s20  }
 0x686   :  { %4674 = dma.done.wait [#allocation3], 1024  }
 0x687   :  { %4675 = vsyncadd [#allocation3], 4294966272 }
 0x688   :  { %3775 = vsyncpa [#allocation3], 1 }

</bundles_post_ra>
